<compile_context>
chip_gen: v7x
topology: tpu7x:2x2x1
jax: 0.10.0
libtpu: 0.0.40
codegen_flags: <defaults>
</compile_context>

<pallas_src>
import functools

import jax
import jax.numpy as jnp
from jax.experimental import pallas as pl
from jax.experimental.pallas import tpu as pltpu

_VMEM_LIMIT = 32 * 1024 * 1024      # scoped-VMEM cap (safe on v5e/v6e/v7x)
_BLOCK_BUDGET = 14 * 1024 * 1024    # target working-set bytes per grid step

# Feature flags resolved by the self-tests in __main__ (graceful fallback).
_USE_KFOLD = True                   # fold dx taps into the GEMM K dimension
_FUSE_UPSAMPLE = True               # fuse nearest-2x upsample into the up-conv


# ---------------------------------------------------------------------------
# Tiling helpers
# ---------------------------------------------------------------------------
def _conv_row_bytes(w, cin, cout):
    # per-output-row working set: 2x-buffered bf16 input block, bf16 slab,
    # per-dy (w, 3*cin) bf16 im2col value, f32 accumulator, 2x bf16 out block.
    return w * (4 * cin + 2 * cin + 6 * cin + 4 * cout + 4 * cout)


def _resblock_row_bytes(w, c):
    # conv working set + bf16 intermediate tbuf + second im2col / accumulator.
    return _conv_row_bytes(w, c, c) + w * (2 * c + 6 * c + 4 * c)


def _pick_row_tile(h, per_row_bytes, max_rows=64):
    """Largest divisor of h with th <= max_rows and th * per_row <= budget.

    Always >= 1, so pathological H (e.g. prime) degrades to small blocks
    instead of blowing the VMEM limit.
    """
    cap = int(max(1, min(max_rows, _BLOCK_BUDGET // max(per_row_bytes, 1), h)))
    best = 1
    for t in range(1, cap + 1):
        if h % t == 0:
            best = t
    return best


# ---------------------------------------------------------------------------
# In-kernel helpers
# ---------------------------------------------------------------------------
def _rep2(v, axis):
    """Nearest-neighbour x2 replication along `axis` (lane dim untouched)."""
    shape = list(v.shape)
    v = jnp.expand_dims(v, axis + 1)
    tgt = list(v.shape)
    tgt[axis + 1] = 2
    v = jnp.broadcast_to(v, tuple(tgt))
    shape[axis] *= 2
    return v.reshape(tuple(shape))


def _accumulate_conv(tap, w_ref, rows, wd, cin, fold):
    """sum_{dy,dx} tap(dy,dx) @ W[dy,dx] with f32 accumulation on the MXU.

    tap(dy, dx) -> (rows, wd, cin) bf16 slice of the zero-bordered slab.
    w_ref: (3, 3*cin, cout) bf16 with K index = dx*cin + ci.
    fold=True: one K=3*cin matmul per dy (better MXU fill, 3 acc updates).
    fold=False: 9 K=cin matmuls (always-supported fallback, used for cin=3).
    """
    acc = None
    for dy in range(3):
        w_dy = w_ref[dy]                                    # (3*cin, cout)
        if fold:
            lhs = jnp.concatenate([tap(dy, dx) for dx in range(3)], axis=-1)
            part = jnp.dot(lhs.reshape(rows * wd, 3 * cin), w_dy,
                           preferred_element_type=jnp.float32)
            acc = part if acc is None else acc + part
        else:
            for dx in range(3):
                lhs = tap(dy, dx).reshape(rows * wd, cin)
                part = jnp.dot(lhs, w_dy[dx * cin:(dx + 1) * cin],
                               preferred_element_type=jnp.float32)
                acc = part if acc is None else acc + part
    return acc


# ---------------------------------------------------------------------------
# Kernel 1: 3x3 conv (+bias, optional ReLU, optional residual, optional fused
# nearest-2x upsample).  Main rows + 1-row halos arrive through auto-pipelined
# BlockSpecs; the zero-padded slab lives in a VMEM scratch.
# ---------------------------------------------------------------------------
def _conv3x3_kernel(m_ref, top_ref, bot_ref, w_ref, bias_ref, *rest,
                    th, wd, cin, src_th, src_h, relu, has_res, up2, fold):
    if has_res:
        r_ref, o_ref, slab = rest
    else:
        o_ref, slab = rest

    i = pl.program_id(1)
    s0 = i * src_th                      # first source-image row of this block

    # Halo rows: index_maps clamp out-of-image rows to a valid row; zero them
    # here (multiply by 0/1 mask) so they act as the conv's zero padding.
    top = top_ref[0] * (s0 >= 1).astype(jnp.bfloat16)
    bot = bot_ref[0] * (s0 + src_th <= src_h - 1).astype(jnp.bfloat16)
    mid = m_ref[0]
    if up2:                              # fused nearest-2x upsample
        mid = _rep2(_rep2(mid, 1), 0)    # double cols then rows
        top = _rep2(top, 1)              # halos need column doubling only
        bot = _rep2(bot, 1)

    # Assemble the zero-bordered bf16 slab in VMEM.
    slab[0:1, 1:1 + wd, :] = top
    slab[1:1 + th, 1:1 + wd, :] = mid
    slab[th + 1:th + 2, 1:1 + wd, :] = bot
    zcol = jnp.zeros((th + 2, 1, cin), jnp.bfloat16)
    slab[:, 0:1, :] = zcol
    slab[:, wd + 1:wd + 2, :] = zcol

    acc = _accumulate_conv(lambda dy, dx: slab[dy:dy + th, dx:dx + wd, :],
                           w_ref, th, wd, cin, fold)
    acc = acc + bias_ref[...]            # f32 epilogue on the accumulator
    if relu:
        acc = jnp.maximum(acc, 0.0)
    if has_res:
        acc = acc + r_ref[0].astype(jnp.float32).reshape(th * wd, -1)
    o_ref[0] = acc.reshape(th, wd, -1).astype(o_ref.dtype)


def conv3x3_pallas(x, w, bias=None, *, relu=False, residual=None,
                   upsample2=False, out_dtype=None, max_rows=64):
    """3x3 conv, stride 1, pad 1.  x: (N,H,W,Cin) NHWC, w: (3,3,Cin,Cout) HWIO.

    upsample2=True fuses nn.Upsample(scale_factor=2, 'nearest') in front of the
    conv: x stays at half resolution in HBM, replication happens in VMEM.
    """
    x = x.astype(jnp.bfloat16)
    n, sh, sw, cin = x.shape
    cout = w.shape[-1]
    scale = 2 if upsample2 else 1
    oh, ow = sh * scale, sw * scale
    out_dtype = jnp.bfloat16 if out_dtype is None else out_dtype

    src_th = _pick_row_tile(sh, scale * _conv_row_bytes(ow, cin, cout), max_rows)
    th = src_th * scale
    gi = sh // src_th

    w9 = w.reshape(3, 3 * cin, cout).astype(jnp.bfloat16)
    b = jnp.zeros((cout,), jnp.float32) if bias is None else bias
    b = b.astype(jnp.float32).reshape(1, cout)
    fold = _USE_KFOLD and cin % 8 == 0

    in_specs = [
        pl.BlockSpec((1, src_th, sw, cin), lambda bi, i: (bi, i, 0, 0)),
        pl.BlockSpec((1, 1, sw, cin),
                     lambda bi, i: (bi, jnp.maximum(i * src_th - 1, 0), 0, 0)),
        pl.BlockSpec((1, 1, sw, cin),
                     lambda bi, i: (bi, jnp.minimum(i * src_th + src_th, sh - 1), 0, 0)),
        pl.BlockSpec((3, 3 * cin, cout), lambda bi, i: (0, 0, 0)),
        pl.BlockSpec((1, cout), lambda bi, i: (0, 0)),
    ]
    args = [x, x, x, w9, b]
    has_res = residual is not None
    if has_res:
        args.append(residual.astype(jnp.bfloat16))
        in_specs.append(pl.BlockSpec((1, th, ow, cout), lambda bi, i: (bi, i, 0, 0)))

    return pl.pallas_call(
        functools.partial(_conv3x3_kernel, th=th, wd=ow, cin=cin,
                          src_th=src_th, src_h=sh, relu=relu,
                          has_res=has_res, up2=upsample2, fold=fold),
        out_shape=jax.ShapeDtypeStruct((n, oh, ow, cout), out_dtype),
        grid=(n, gi),
        in_specs=in_specs,
        out_specs=pl.BlockSpec((1, th, ow, cout), lambda bi, i: (bi, i, 0, 0)),
        scratch_shapes=[pltpu.VMEM((th + 2, ow + 2, cin), jnp.bfloat16)],
        compiler_params=pltpu.CompilerParams(
            dimension_semantics=("parallel", "parallel"),
            vmem_limit_bytes=_VMEM_LIMIT),
    )(*args)


# ---------------------------------------------------------------------------
# Kernel 2: fused ResBlock  y = x + conv2(ReLU(conv1(x) + b1)) + b2
# (intermediate activation lives in a bf16 VMEM scratch; 2-row input halo)
# ---------------------------------------------------------------------------
def _resblock_kernel(m_ref, t2_ref, t1_ref, d1_ref, d2_ref,
                     w1_ref, b1_ref, w2_ref, b2_ref, o_ref, xslab, tbuf,
                     *, th, wd, c, h, fold):
    i = pl.program_id(1)
    r0 = i * th

    # Assemble the 2-row-halo bf16 input slab (zero padding at image borders).
    xslab[0:1, 1:1 + wd, :] = t2_ref[0] * (r0 >= 2).astype(jnp.bfloat16)
    xslab[1:2, 1:1 + wd, :] = t1_ref[0] * (r0 >= 1).astype(jnp.bfloat16)
    xslab[2:2 + th, 1:1 + wd, :] = m_ref[0]
    xslab[th + 2:th + 3, 1:1 + wd, :] = d1_ref[0] * (r0 + th <= h - 1).astype(jnp.bfloat16)
    xslab[th + 3:th + 4, 1:1 + wd, :] = d2_ref[0] * (r0 + th + 1 <= h - 1).astype(jnp.bfloat16)
    zcol = jnp.zeros((th + 4, 1, c), jnp.bfloat16)
    xslab[:, 0:1, :] = zcol
    xslab[:, wd + 1:wd + 2, :] = zcol

    rows1 = th + 2   # conv1 output rows (1-row halo each side for conv2)
    acc1 = _accumulate_conv(lambda dy, dx: xslab[dy:dy + rows1, dx:dx + wd, :],
                            w1_ref, rows1, wd, c, fold)
    t = jnp.maximum(acc1 + b1_ref[...], 0.0)
    tbuf[:, 1:1 + wd, :] = t.reshape(rows1, wd, c).astype(jnp.bfloat16)
    zcol1 = jnp.zeros((rows1, 1, c), jnp.bfloat16)
    tbuf[:, 0:1, :] = zcol1
    tbuf[:, wd + 1:wd + 2, :] = zcol1

    # At the image border the halo rows of t are conv2's zero padding.
    @pl.when(r0 == 0)
    def _():
        tbuf[0:1, :, :] = jnp.zeros((1, wd + 2, c), jnp.bfloat16)

    @pl.when(r0 + th == h)
    def _():
        tbuf[rows1 - 1:rows1, :, :] = jnp.zeros((1, wd + 2, c), jnp.bfloat16)

    acc2 = _accumulate_conv(lambda dy, dx: tbuf[dy:dy + th, dx:dx + wd, :],
                            w2_ref, th, wd, c, fold)
    out = acc2 + b2_ref[...] + m_ref[0].astype(jnp.float32).reshape(th * wd, c)
    o_ref[0] = out.reshape(th, wd, c).astype(o_ref.dtype)


def resblock_pallas(x, w1, b1, w2, b2, *, max_rows=64):
    x = x.astype(jnp.bfloat16)
    n, h, wd, c = x.shape
    th = _pick_row_tile(h, _resblock_row_bytes(wd, c), max_rows)
    gi = h // th

    w1f = w1.reshape(3, 3 * c, c).astype(jnp.bfloat16)
    w2f = w2.reshape(3, 3 * c, c).astype(jnp.bfloat16)
    b1f = b1.astype(jnp.float32).reshape(1, c)
    b2f = b2.astype(jnp.float32).reshape(1, c)
    fold = _USE_KFOLD and c % 8 == 0

    in_specs = [
        pl.BlockSpec((1, th, wd, c), lambda bi, i: (bi, i, 0, 0)),
        pl.BlockSpec((1, 1, wd, c),
                     lambda bi, i: (bi, jnp.maximum(i * th - 2, 0), 0, 0)),
        pl.BlockSpec((1, 1, wd, c),
                     lambda bi, i: (bi, jnp.maximum(i * th - 1, 0), 0, 0)),
        pl.BlockSpec((1, 1, wd, c),
                     lambda bi, i: (bi, jnp.minimum(i * th + th, h - 1), 0, 0)),
        pl.BlockSpec((1, 1, wd, c),
                     lambda bi, i: (bi, jnp.minimum(i * th + th + 1, h - 1), 0, 0)),
        pl.BlockSpec((3, 3 * c, c), lambda bi, i: (0, 0, 0)),
        pl.BlockSpec((1, c), lambda bi, i: (0, 0)),
        pl.BlockSpec((3, 3 * c, c), lambda bi, i: (0, 0, 0)),
        pl.BlockSpec((1, c), lambda bi, i: (0, 0)),
    ]
    return pl.pallas_call(
        functools.partial(_resblock_kernel, th=th, wd=wd, c=c, h=h, fold=fold),
        out_shape=jax.ShapeDtypeStruct((n, h, wd, c), jnp.bfloat16),
        grid=(n, gi),
        in_specs=in_specs,
        out_specs=pl.BlockSpec((1, th, wd, c), lambda bi, i: (bi, i, 0, 0)),
        scratch_shapes=[pltpu.VMEM((th + 4, wd + 2, c), jnp.bfloat16),
                        pltpu.VMEM((th + 2, wd + 2, c), jnp.bfloat16)],
        compiler_params=pltpu.CompilerParams(
            dimension_semantics=("parallel", "parallel"),
            vmem_limit_bytes=_VMEM_LIMIT),
    )(x, x, x, x, x, w1f, b1f, w2f, b2f)


# ---------------------------------------------------------------------------
# Pure-JAX references (same bf16-activation / f32-accumulate arithmetic).
# ---------------------------------------------------------------------------
def conv3x3_ref(x, w, bias=None, *, relu=False, residual=None, out_dtype=None):
    x = x.astype(jnp.bfloat16)
    out = jax.lax.conv_general_dilated(
        x, w.astype(jnp.bfloat16), window_strides=(1, 1),
        padding=((1, 1), (1, 1)),
        dimension_numbers=("NHWC", "HWIO", "NHWC"),
        preferred_element_type=jnp.float32)
    if bias is not None:
        out = out + bias.astype(jnp.float32)
    if relu:
        out = jnp.maximum(out, 0.0)
    if residual is not None:
        out = out + residual.astype(jnp.float32)
    return out.astype(jnp.bfloat16 if out_dtype is None else out_dtype)


def resblock_ref(x, w1, b1, w2, b2):
    t = conv3x3_ref(x, w1, b1, relu=True)
    return conv3x3_ref(t, w2, b2, residual=x)


def upsample_nearest2(x):
    # nn.Upsample(scale_factor=2, mode='nearest') on NHWC.
    return jnp.repeat(jnp.repeat(x, 2, axis=1), 2, axis=2)


# ---------------------------------------------------------------------------
# MSRResNet0 forward (matches the PyTorch module's sequential structure).
# ---------------------------------------------------------------------------
def msrresnet_forward_pallas(x_nchw, params, *, fuse_upsample=True, max_rows=64):
    x = jnp.transpose(x_nchw, (0, 2, 3, 1)).astype(jnp.bfloat16)   # NCHW->NHWC
    x1 = conv3x3_pallas(x, params["head_w"], params["head_b"], max_rows=max_rows)
    y = x1
    for w1, b1, w2, b2 in params["body"]:
        y = resblock_pallas(y, w1, b1, w2, b2, max_rows=max_rows)
    y = conv3x3_pallas(y, params["bend_w"], params["bend_b"], residual=x1,
                       max_rows=max_rows)                           # shortcut
    for wu, bu in params["up"]:
        if fuse_upsample:
            y = conv3x3_pallas(y, wu, bu, relu=True, upsample2=True,
                               max_rows=max_rows)
        else:
            y = conv3x3_pallas(upsample_nearest2(y), wu, bu, relu=True,
                               max_rows=max_rows)
    y = conv3x3_pallas(y, params["hr0_w"], params["hr0_b"], relu=True,
                       max_rows=max_rows)
    y = conv3x3_pallas(y, params["hr1_w"], None, out_dtype=jnp.float32,
                       max_rows=max_rows)                           # bias=False
    return jnp.transpose(y, (0, 3, 1, 2))                           # NHWC->NCHW


def msrresnet_forward_ref(x_nchw, params):
    x = jnp.transpose(x_nchw, (0, 2, 3, 1)).astype(jnp.bfloat16)
    x1 = conv3x3_ref(x, params["head_w"], params["head_b"])
    y = x1
    for w1, b1, w2, b2 in params["body"]:
        y = resblock_ref(y, w1, b1, w2, b2)
    y = conv3x3_ref(y, params["bend_w"], params["bend_b"], residual=x1)
    for wu, bu in params["up"]:
        y = conv3x3_ref(upsample_nearest2(y), wu, bu, relu=True)
    y = conv3x3_ref(y, params["hr0_w"], params["hr0_b"], relu=True)
    y = conv3x3_ref(y, params["hr1_w"], None, out_dtype=jnp.float32)
    return jnp.transpose(y, (0, 3, 1, 2))


# ---------------------------------------------------------------------------
# Deterministic parameter initialization (shapes follow the module __init__).
# ---------------------------------------------------------------------------
def _init_conv(key, cin, cout, bias=True):
    kw, kb = jax.random.split(key)
    std = (2.0 / (9 * cin)) ** 0.5
    w = jax.random.normal(kw, (3, 3, cin, cout), jnp.float32) * std
    b = jax.random.normal(kb, (cout,), jnp.float32) * 0.01 if bias else None
    return w, b


def init_params(key, in_nc, out_nc, nc, nb, n_upscale):
    keys = jax.random.split(key, 3 + 2 * nb + n_upscale + 2)
    it = iter(keys)
    head_w, head_b = _init_conv(next(it), in_nc, nc)
    body = []
    for _ in range(nb):
        w1, b1 = _init_conv(next(it), nc, nc)
        w2, b2 = _init_conv(next(it), nc, nc)
        body.append((w1, b1, w2, b2))
    bend_w, bend_b = _init_conv(next(it), nc, nc)
    up = []
    for _ in range(n_upscale):
        wu, bu = _init_conv(next(it), nc, nc)
        up.append((wu, bu))
    hr0_w, hr0_b = _init_conv(next(it), nc, nc)
    hr1_w, _ = _init_conv(next(it), nc, out_nc, bias=False)
    return {"head_w": head_w, "head_b": head_b, "body": tuple(body),
            "bend_w": bend_w, "bend_b": bend_b, "up": tuple(up),
            "hr0_w": hr0_w, "hr0_b": hr0_b, "hr1_w": hr1_w}


if __name__ == "__main__":
    # Small configuration consistent with the module: in_nc=3, out_nc=3,
    # nc=32 channels, nb=2 residual blocks, upscale=4 (-> 2 upconv stages).
    in_nc, out_nc, nc, nb, upscale = 3, 3, 32, 2, 4
    n_upscale = 2  # int(log2(4))

    key = jax.random.PRNGKey(0)
    kp, kx, k1, k2, k3, k4 = jax.random.split(key, 6)
    params = init_params(kp, in_nc, out_nc, nc, nb, n_upscale)

    def max_err(a, b):
        return float(jnp.max(jnp.abs(a.astype(jnp.float32) - b.astype(jnp.float32))))

    def scale(b):
        return max(1.0, float(jnp.max(jnp.abs(b.astype(jnp.float32)))))

    # Test tensors: H=32 with max_rows=8 exercises 4 row-blocks (interior and
    # both image-border blocks), halo index clamping and the masked zero rows.
    xa = jax.random.normal(k1, (2, 32, 16, nc), jnp.float32)
    ra = jax.random.normal(k2, (2, 32, 16, nc), jnp.float32)
    wa, ba = _init_conv(k3, nc, nc)
    w1, b1 = _init_conv(k2, nc, nc)
    w2, b2 = _init_conv(k4, nc, nc)

    # ---- feature detection: K-folded (lane-concat) GEMM path ----------------
    def _kfold_probe():
        p = conv3x3_pallas(xa, wa, ba, relu=True, max_rows=8)
        r = conv3x3_ref(xa, wa, ba, relu=True)
        assert max_err(p, r) <= 2e-2 * scale(r)
        p = resblock_pallas(xa, w1, b1, w2, b2, max_rows=8)
        r = resblock_ref(xa, w1, b1, w2, b2)
        assert max_err(p, r) <= 2e-2 * scale(r)
    try:
        _kfold_probe()
    except Exception:
        _USE_KFOLD = False          # fall back to per-tap (K=Cin) matmuls

    # ---- per-kernel checks (whatever path ended up active) -------------------
    p = conv3x3_pallas(xa, wa, ba, relu=True, max_rows=8)
    r = conv3x3_ref(xa, wa, ba, relu=True)
    assert max_err(p, r) <= 2e-2 * scale(r), ("conv_relu", max_err(p, r))

    p = conv3x3_pallas(xa, wa, ba, residual=ra, max_rows=8)
    r = conv3x3_ref(xa, wa, ba, residual=ra)
    assert max_err(p, r) <= 2e-2 * scale(r), ("conv_residual", max_err(p, r))

    xh = jax.random.normal(k4, (2, 16, 16, in_nc), jnp.float32)
    wh, bh = _init_conv(k1, in_nc, nc)
    p = conv3x3_pallas(xh, wh, bh, max_rows=8)
    r = conv3x3_ref(xh, wh, bh)
    assert max_err(p, r) <= 2e-2 * scale(r), ("conv_head", max_err(p, r))

    p = resblock_pallas(xa, w1, b1, w2, b2, max_rows=8)
    r = resblock_ref(xa, w1, b1, w2, b2)
    assert max_err(p, r) <= 2e-2 * scale(r), ("resblock", max_err(p, r))

    # ---- feature detection: fused nearest-2x upsample + conv ----------------
    def _fuse_probe():
        wu, bu = _init_conv(k3, nc, nc)
        p = conv3x3_pallas(xa, wu, bu, relu=True, upsample2=True, max_rows=8)
        r = conv3x3_ref(upsample_nearest2(xa), wu, bu, relu=True)
        assert p.shape == (2, 64, 32, nc)
        assert max_err(p, r) <= 2e-2 * scale(r)
    try:
        _fuse_probe()
    except Exception:
        _FUSE_UPSAMPLE = False      # fall back to host nearest-2x + plain conv

    # ---- full model forward ---------------------------------------------------
    x = jax.random.normal(kx, (2, in_nc, 16, 16), jnp.float32)      # NCHW input
    fwd_pallas = jax.jit(functools.partial(
        msrresnet_forward_pallas, fuse_upsample=_FUSE_UPSAMPLE, max_rows=8))
    fwd_ref = jax.jit(msrresnet_forward_ref)

    y = fwd_pallas(x, params)
    jax.block_until_ready(y)
    assert y.shape == (2, out_nc, 16 * upscale, 16 * upscale), y.shape

    y_ref = fwd_ref(x, params)
    jax.block_until_ready(y_ref)
    # bf16 activations accumulate small rounding divergence across ~10 stacked
    # convs; the tight per-kernel checks above carry the numerical burden.
    assert max_err(y, y_ref) <= 6e-2 * scale(y_ref), max_err(y, y_ref)

    print("KERNEL_OK")
</pallas_src>

<mosaic_0001>
module attributes {stable_mosaic.version = 11 : i64} {
  func.func @_conv3x3_kernel(%arg0: i32, %arg1: i32, %arg2: memref<1x8x16x32xbf16, #tpu.memory_space<vmem>>, %arg3: memref<1x1x16x32xbf16, #tpu.memory_space<vmem>>, %arg4: memref<1x1x16x32xbf16, #tpu.memory_space<vmem>>, %arg5: memref<3x96x32xbf16, #tpu.memory_space<vmem>>, %arg6: memref<1x32xf32, #tpu.memory_space<vmem>>, %arg7: memref<1x8x16x32xbf16, #tpu.memory_space<vmem>>, %arg8: memref<10x18x32xbf16, #tpu.memory_space<vmem>>) attributes {dimension_semantics = [#tpu.dimension_semantics<parallel>, #tpu.dimension_semantics<parallel>], iteration_bounds = array<i64: 2, 4>, scalar_prefetch = 0 : i64, scratch_operands = 1 : i64, tpu.core_type = #tpu.core_type<tc>, window_params = [{transform_indices = @transform_0, window_bounds = array<i64: 1, 8, 16, 32>}, {transform_indices = @transform_1, window_bounds = array<i64: 1, 1, 16, 32>}, {transform_indices = @transform_2, window_bounds = array<i64: 1, 1, 16, 32>}, {pipeline_mode = #tpu.pipeline_mode<synchronous>, transform_indices = @transform_3, window_bounds = array<i64: 3, 96, 32>}, {pipeline_mode = #tpu.pipeline_mode<synchronous>, transform_indices = @transform_4, window_bounds = array<i64: 1, 32>}, {transform_indices = @transform_5, window_bounds = array<i64: 1, 8, 16, 32>}]} {
    %c8_i32 = arith.constant 8 : i32
    %0 = arith.muli %arg1, %c8_i32 : i32
    %c0 = arith.constant 0 : index
    %c0_0 = arith.constant 0 : index
    %c0_1 = arith.constant 0 : index
    %c0_2 = arith.constant 0 : index
    %1 = vector.load %arg3[%c0, %c0_0, %c0_1, %c0_2] : memref<1x1x16x32xbf16, #tpu.memory_space<vmem>>, vector<1x1x16x32xbf16>
    %2 = vector.shape_cast %1 : vector<1x1x16x32xbf16> to vector<1x16x32xbf16>
    %c1_i32 = arith.constant 1 : i32
    %3 = arith.cmpi sge, %0, %c1_i32 : i32
    %4 = arith.extui %3 : i1 to i32
    %5 = arith.sitofp %4 : i32 to f32
    %6 = arith.truncf %5 : f32 to bf16
    %7 = vector.broadcast %6 : bf16 to vector<1x16x32xbf16>
    %8 = arith.mulf %2, %7 : vector<1x16x32xbf16>
    %c0_3 = arith.constant 0 : index
    %c0_4 = arith.constant 0 : index
    %c0_5 = arith.constant 0 : index
    %c0_6 = arith.constant 0 : index
    %9 = vector.load %arg4[%c0_3, %c0_4, %c0_5, %c0_6] : memref<1x1x16x32xbf16, #tpu.memory_space<vmem>>, vector<1x1x16x32xbf16>
    %10 = vector.shape_cast %9 : vector<1x1x16x32xbf16> to vector<1x16x32xbf16>
    %c8_i32_7 = arith.constant 8 : i32
    %11 = arith.addi %0, %c8_i32_7 : i32
    %c31_i32 = arith.constant 31 : i32
    %12 = arith.cmpi sle, %11, %c31_i32 : i32
    %13 = arith.extui %12 : i1 to i32
    %14 = arith.sitofp %13 : i32 to f32
    %15 = arith.truncf %14 : f32 to bf16
    %16 = vector.broadcast %15 : bf16 to vector<1x16x32xbf16>
    %17 = arith.mulf %10, %16 : vector<1x16x32xbf16>
    %c0_8 = arith.constant 0 : index
    %c0_9 = arith.constant 0 : index
    %c0_10 = arith.constant 0 : index
    %c0_11 = arith.constant 0 : index
    %18 = vector.load %arg2[%c0_8, %c0_9, %c0_10, %c0_11] : memref<1x8x16x32xbf16, #tpu.memory_space<vmem>>, vector<1x8x16x32xbf16>
    %19 = vector.shape_cast %18 : vector<1x8x16x32xbf16> to vector<8x16x32xbf16>
    %c0_12 = arith.constant 0 : index
    %c1 = arith.constant 1 : index
    %c0_13 = arith.constant 0 : index
    %20 = vector.load %arg8[%c0_12, %c1, %c0_13] : memref<10x18x32xbf16, #tpu.memory_space<vmem>>, vector<1x16x32xbf16>
    tpu.vector_store %arg8[%c0_12, %c1, %c0_13], %8 {strides = array<i32>} : memref<10x18x32xbf16, #tpu.memory_space<vmem>>, vector<1x16x32xbf16>,
    %c1_14 = arith.constant 1 : index
    %c1_15 = arith.constant 1 : index
    %c0_16 = arith.constant 0 : index
    %21 = vector.load %arg8[%c1_14, %c1_15, %c0_16] : memref<10x18x32xbf16, #tpu.memory_space<vmem>>, vector<8x16x32xbf16>
    tpu.vector_store %arg8[%c1_14, %c1_15, %c0_16], %19 {strides = array<i32>} : memref<10x18x32xbf16, #tpu.memory_space<vmem>>, vector<8x16x32xbf16>,
    %c9 = arith.constant 9 : index
    %c1_17 = arith.constant 1 : index
    %c0_18 = arith.constant 0 : index
    %22 = vector.load %arg8[%c9, %c1_17, %c0_18] : memref<10x18x32xbf16, #tpu.memory_space<vmem>>, vector<1x16x32xbf16>
    tpu.vector_store %arg8[%c9, %c1_17, %c0_18], %17 {strides = array<i32>} : memref<10x18x32xbf16, #tpu.memory_space<vmem>>, vector<1x16x32xbf16>,
    %cst = arith.constant 0.000000e+00 : bf16
    %23 = vector.broadcast %cst : bf16 to vector<10x1x32xbf16>
    %c0_19 = arith.constant 0 : index
    %c0_20 = arith.constant 0 : index
    %c0_21 = arith.constant 0 : index
    %24 = vector.load %arg8[%c0_19, %c0_20, %c0_21] : memref<10x18x32xbf16, #tpu.memory_space<vmem>>, vector<10x1x32xbf16>
    tpu.vector_store %arg8[%c0_19, %c0_20, %c0_21], %23 {strides = array<i32>} : memref<10x18x32xbf16, #tpu.memory_space<vmem>>, vector<10x1x32xbf16>,
    %c0_22 = arith.constant 0 : index
    %c17 = arith.constant 17 : index
    %c0_23 = arith.constant 0 : index
    %25 = vector.load %arg8[%c0_22, %c17, %c0_23] : memref<10x18x32xbf16, #tpu.memory_space<vmem>>, vector<10x1x32xbf16>
    tpu.vector_store %arg8[%c0_22, %c17, %c0_23], %23 {strides = array<i32>} : memref<10x18x32xbf16, #tpu.memory_space<vmem>>, vector<10x1x32xbf16>,
    %c0_24 = arith.constant 0 : index
    %c0_25 = arith.constant 0 : index
    %c0_26 = arith.constant 0 : index
    %26 = vector.load %arg5[%c0_24, %c0_25, %c0_26] : memref<3x96x32xbf16, #tpu.memory_space<vmem>>, vector<1x96x32xbf16>
    %27 = vector.shape_cast %26 : vector<1x96x32xbf16> to vector<96x32xbf16>
    %c0_27 = arith.constant 0 : index
    %c0_28 = arith.constant 0 : index
    %c0_29 = arith.constant 0 : index
    %28 = vector.load %arg8[%c0_27, %c0_28, %c0_29] : memref<10x18x32xbf16, #tpu.memory_space<vmem>>, vector<8x16x32xbf16>
    %c0_30 = arith.constant 0 : index
    %c1_31 = arith.constant 1 : index
    %c0_32 = arith.constant 0 : index
    %29 = vector.load %arg8[%c0_30, %c1_31, %c0_32] : memref<10x18x32xbf16, #tpu.memory_space<vmem>>, vector<8x16x32xbf16>
    %c0_33 = arith.constant 0 : index
    %c2 = arith.constant 2 : index
    %c0_34 = arith.constant 0 : index
    %30 = vector.load %arg8[%c0_33, %c2, %c0_34] : memref<10x18x32xbf16, #tpu.memory_space<vmem>>, vector<8x16x32xbf16>
    %31 = tpu.concatenate %28, %29, %30 in 2 : vector<8x16x32xbf16>, vector<8x16x32xbf16>, vector<8x16x32xbf16> -> vector<8x16x96xbf16>
    %32 = vector.shape_cast %31 : vector<8x16x96xbf16> to vector<128x96xbf16>
    %cst_35 = arith.constant dense<0.000000e+00> : vector<128x32xf32>
    %33 = tpu.matmul %32, %27, %cst_35 {dimension_numbers = #tpu.dot_dimension_numbers<[1], [0], [0], [1], [0, 0, 1, 1], [], []>} : vector<128x96xbf16>, vector<96x32xbf16>, vector<128x32xf32> -> vector<128x32xf32>
    %c1_36 = arith.constant 1 : index
    %c0_37 = arith.constant 0 : index
    %c0_38 = arith.constant 0 : index
    %34 = vector.load %arg5[%c1_36, %c0_37, %c0_38] : memref<3x96x32xbf16, #tpu.memory_space<vmem>>, vector<1x96x32xbf16>
    %35 = vector.shape_cast %34 : vector<1x96x32xbf16> to vector<96x32xbf16>
    %c1_39 = arith.constant 1 : index
    %c0_40 = arith.constant 0 : index
    %c0_41 = arith.constant 0 : index
    %36 = vector.load %arg8[%c1_39, %c0_40, %c0_41] : memref<10x18x32xbf16, #tpu.memory_space<vmem>>, vector<8x16x32xbf16>
    %c1_42 = arith.constant 1 : index
    %c1_43 = arith.constant 1 : index
    %c0_44 = arith.constant 0 : index
    %37 = vector.load %arg8[%c1_42, %c1_43, %c0_44] : memref<10x18x32xbf16, #tpu.memory_space<vmem>>, vector<8x16x32xbf16>
    %c1_45 = arith.constant 1 : index
    %c2_46 = arith.constant 2 : index
    %c0_47 = arith.constant 0 : index
    %38 = vector.load %arg8[%c1_45, %c2_46, %c0_47] : memref<10x18x32xbf16, #tpu.memory_space<vmem>>, vector<8x16x32xbf16>
    %39 = tpu.concatenate %36, %37, %38 in 2 : vector<8x16x32xbf16>, vector<8x16x32xbf16>, vector<8x16x32xbf16> -> vector<8x16x96xbf16>
    %40 = vector.shape_cast %39 : vector<8x16x96xbf16> to vector<128x96xbf16>
    %cst_48 = arith.constant dense<0.000000e+00> : vector<128x32xf32>
    %41 = tpu.matmul %40, %35, %cst_48 {dimension_numbers = #tpu.dot_dimension_numbers<[1], [0], [0], [1], [0, 0, 1, 1], [], []>} : vector<128x96xbf16>, vector<96x32xbf16>, vector<128x32xf32> -> vector<128x32xf32>
    %42 = arith.addf %33, %41 : vector<128x32xf32>
    %c2_49 = arith.constant 2 : index
    %c0_50 = arith.constant 0 : index
    %c0_51 = arith.constant 0 : index
    %43 = vector.load %arg5[%c2_49, %c0_50, %c0_51] : memref<3x96x32xbf16, #tpu.memory_space<vmem>>, vector<1x96x32xbf16>
    %44 = vector.shape_cast %43 : vector<1x96x32xbf16> to vector<96x32xbf16>
    %c2_52 = arith.constant 2 : index
    %c0_53 = arith.constant 0 : index
    %c0_54 = arith.constant 0 : index
    %45 = vector.load %arg8[%c2_52, %c0_53, %c0_54] : memref<10x18x32xbf16, #tpu.memory_space<vmem>>, vector<8x16x32xbf16>
    %c2_55 = arith.constant 2 : index
    %c1_56 = arith.constant 1 : index
    %c0_57 = arith.constant 0 : index
    %46 = vector.load %arg8[%c2_55, %c1_56, %c0_57] : memref<10x18x32xbf16, #tpu.memory_space<vmem>>, vector<8x16x32xbf16>
    %c2_58 = arith.constant 2 : index
    %c2_59 = arith.constant 2 : index
    %c0_60 = arith.constant 0 : index
    %47 = vector.load %arg8[%c2_58, %c2_59, %c0_60] : memref<10x18x32xbf16, #tpu.memory_space<vmem>>, vector<8x16x32xbf16>
    %48 = tpu.concatenate %45, %46, %47 in 2 : vector<8x16x32xbf16>, vector<8x16x32xbf16>, vector<8x16x32xbf16> -> vector<8x16x96xbf16>
    %49 = vector.shape_cast %48 : vector<8x16x96xbf16> to vector<128x96xbf16>
    %cst_61 = arith.constant dense<0.000000e+00> : vector<128x32xf32>
    %50 = tpu.matmul %49, %44, %cst_61 {dimension_numbers = #tpu.dot_dimension_numbers<[1], [0], [0], [1], [0, 0, 1, 1], [], []>} : vector<128x96xbf16>, vector<96x32xbf16>, vector<128x32xf32> -> vector<128x32xf32>
    %51 = arith.addf %42, %50 : vector<128x32xf32>
    %c0_62 = arith.constant 0 : index
    %c0_63 = arith.constant 0 : index
    %52 = vector.load %arg6[%c0_62, %c0_63] : memref<1x32xf32, #tpu.memory_space<vmem>>, vector<1x32xf32>
    %53 = vector.broadcast %52 : vector<1x32xf32> to vector<128x32xf32>
    %54 = arith.addf %51, %53 : vector<128x32xf32>
    %cst_64 = arith.constant 0.000000e+00 : f32
    %55 = vector.broadcast %cst_64 : f32 to vector<128x32xf32>
    %56 = arith.maximumf %54, %55 : vector<128x32xf32>
    %57 = vector.shape_cast %56 : vector<128x32xf32> to vector<8x16x32xf32>
    %58 = arith.truncf %57 : vector<8x16x32xf32> to vector<8x16x32xbf16>
    %c0_65 = arith.constant 0 : index
    %c0_66 = arith.constant 0 : index
    %c0_67 = arith.constant 0 : index
    %c0_68 = arith.constant 0 : index
    %59 = vector.load %arg7[%c0_65, %c0_66, %c0_67, %c0_68] : memref<1x8x16x32xbf16, #tpu.memory_space<vmem>>, vector<1x8x16x32xbf16>
    %60 = vector.shape_cast %59 : vector<1x8x16x32xbf16> to vector<8x16x32xbf16>
    %61 = vector.shape_cast %58 : vector<8x16x32xbf16> to vector<1x8x16x32xbf16>
    tpu.vector_store %arg7[%c0_65, %c0_66, %c0_67, %c0_68], %61 {strides = array<i32>} : memref<1x8x16x32xbf16, #tpu.memory_space<vmem>>, vector<1x8x16x32xbf16>,
    return
  }
  func.func @transform_0(%arg0: i32, %arg1: i32) -> (i32, i32, i32, i32) {
    %c0_i32 = arith.constant 0 : i32
    %c0_i32_0 = arith.constant 0 : i32
    %c0_i32_1 = arith.constant 0 : i32
    return %arg0, %arg1, %c0_i32, %c0_i32_0 : i32, i32, i32, i32
  }
  func.func @transform_1(%arg0: i32, %arg1: i32) -> (i32, i32, i32, i32) {
    %c8_i32 = arith.constant 8 : i32
    %0 = arith.muli %arg1, %c8_i32 : i32
    %c1_i32 = arith.constant 1 : i32
    %1 = arith.subi %0, %c1_i32 : i32
    %c0_i32 = arith.constant 0 : i32
    %2 = arith.maxsi %1, %c0_i32 : i32
    %c0_i32_0 = arith.constant 0 : i32
    %c0_i32_1 = arith.constant 0 : i32
    %c0_i32_2 = arith.constant 0 : i32
    return %arg0, %2, %c0_i32_0, %c0_i32_1 : i32, i32, i32, i32
  }
  func.func @transform_2(%arg0: i32, %arg1: i32) -> (i32, i32, i32, i32) {
    %c8_i32 = arith.constant 8 : i32
    %0 = arith.muli %arg1, %c8_i32 : i32
    %c8_i32_0 = arith.constant 8 : i32
    %1 = arith.addi %0, %c8_i32_0 : i32
    %c31_i32 = arith.constant 31 : i32
    %2 = arith.minsi %1, %c31_i32 : i32
    %c0_i32 = arith.constant 0 : i32
    %c0_i32_1 = arith.constant 0 : i32
    %c0_i32_2 = arith.constant 0 : i32
    return %arg0, %2, %c0_i32, %c0_i32_1 : i32, i32, i32, i32
  }
  func.func @transform_3(%arg0: i32, %arg1: i32) -> (i32, i32, i32) {
    %c0_i32 = arith.constant 0 : i32
    %c0_i32_0 = arith.constant 0 : i32
    %c0_i32_1 = arith.constant 0 : i32
    %c0_i32_2 = arith.constant 0 : i32
    return %c0_i32, %c0_i32_0, %c0_i32_1 : i32, i32, i32
  }
  func.func @transform_4(%arg0: i32, %arg1: i32) -> (i32, i32) {
    %c0_i32 = arith.constant 0 : i32
    %c0_i32_0 = arith.constant 0 : i32
    %c0_i32_1 = arith.constant 0 : i32
    return %c0_i32, %c0_i32_0 : i32, i32
  }
  func.func @transform_5(%arg0: i32, %arg1: i32) -> (i32, i32, i32, i32) {
    %c0_i32 = arith.constant 0 : i32
    %c0_i32_0 = arith.constant 0 : i32
    %c0_i32_1 = arith.constant 0 : i32
    return %arg0, %arg1, %c0_i32, %c0_i32_0 : i32, i32, i32, i32
  }
}

module attributes {stable_mosaic.version = 11 : i64} {
  func.func @_conv3x3_kernel(%arg0: i32, %arg1: i32, %arg2: memref<1x8x16x32xbf16, #tpu.memory_space<vmem>>, %arg3: memref<1x1x16x32xbf16, #tpu.memory_space<vmem>>, %arg4: memref<1x1x16x32xbf16, #tpu.memory_space<vmem>>, %arg5: memref<3x96x32xbf16, #tpu.memory_space<vmem>>, %arg6: memref<1x32xf32, #tpu.memory_space<vmem>>, %arg7: memref<1x8x16x32xbf16, #tpu.memory_space<vmem>>, %arg8: memref<10x18x32xbf16, #tpu.memory_space<vmem>>) attributes {dimension_semantics = [#tpu.dimension_semantics<parallel>, #tpu.dimension_semantics<parallel>], iteration_bounds = array<i64: 2, 4>, scalar_prefetch = 0 : i64, scratch_operands = 1 : i64, tpu.core_type = #tpu.core_type<tc>, window_params = [{transform_indices = @transform_0, window_bounds = array<i64: 1, 8, 16, 32>}, {transform_indices = @transform_1, window_bounds = array<i64: 1, 1, 16, 32>}, {transform_indices = @transform_2, window_bounds = array<i64: 1, 1, 16, 32>}, {pipeline_mode = #tpu.pipeline_mode<synchronous>, transform_indices = @transform_3, window_bounds = array<i64: 3, 96, 32>}, {pipeline_mode = #tpu.pipeline_mode<synchronous>, transform_indices = @transform_4, window_bounds = array<i64: 1, 32>}, {transform_indices = @transform_5, window_bounds = array<i64: 1, 8, 16, 32>}]} {
    %c8_i32 = arith.constant 8 : i32
    %0 = arith.muli %arg1, %c8_i32 : i32
    %c0 = arith.constant 0 : index
    %c0_0 = arith.constant 0 : index
    %c0_1 = arith.constant 0 : index
    %c0_2 = arith.constant 0 : index
    %1 = vector.load %arg3[%c0, %c0_0, %c0_1, %c0_2] : memref<1x1x16x32xbf16, #tpu.memory_space<vmem>>, vector<1x1x16x32xbf16>
    %2 = vector.shape_cast %1 : vector<1x1x16x32xbf16> to vector<1x16x32xbf16>
    %c1_i32 = arith.constant 1 : i32
    %3 = arith.cmpi sge, %0, %c1_i32 : i32
    %4 = arith.extui %3 : i1 to i32
    %5 = arith.sitofp %4 : i32 to f32
    %6 = arith.truncf %5 : f32 to bf16
    %7 = vector.broadcast %6 : bf16 to vector<1x16x32xbf16>
    %8 = arith.mulf %2, %7 : vector<1x16x32xbf16>
    %c0_3 = arith.constant 0 : index
    %c0_4 = arith.constant 0 : index
    %c0_5 = arith.constant 0 : index
    %c0_6 = arith.constant 0 : index
    %9 = vector.load %arg4[%c0_3, %c0_4, %c0_5, %c0_6] : memref<1x1x16x32xbf16, #tpu.memory_space<vmem>>, vector<1x1x16x32xbf16>
    %10 = vector.shape_cast %9 : vector<1x1x16x32xbf16> to vector<1x16x32xbf16>
    %c8_i32_7 = arith.constant 8 : i32
    %11 = arith.addi %0, %c8_i32_7 : i32
    %c31_i32 = arith.constant 31 : i32
    %12 = arith.cmpi sle, %11, %c31_i32 : i32
    %13 = arith.extui %12 : i1 to i32
    %14 = arith.sitofp %13 : i32 to f32
    %15 = arith.truncf %14 : f32 to bf16
    %16 = vector.broadcast %15 : bf16 to vector<1x16x32xbf16>
    %17 = arith.mulf %10, %16 : vector<1x16x32xbf16>
    %c0_8 = arith.constant 0 : index
    %c0_9 = arith.constant 0 : index
    %c0_10 = arith.constant 0 : index
    %c0_11 = arith.constant 0 : index
    %18 = vector.load %arg2[%c0_8, %c0_9, %c0_10, %c0_11] : memref<1x8x16x32xbf16, #tpu.memory_space<vmem>>, vector<1x8x16x32xbf16>
    %19 = vector.shape_cast %18 : vector<1x8x16x32xbf16> to vector<8x16x32xbf16>
    %c0_12 = arith.constant 0 : index
    %c1 = arith.constant 1 : index
    %c0_13 = arith.constant 0 : index
    %20 = vector.load %arg8[%c0_12, %c1, %c0_13] : memref<10x18x32xbf16, #tpu.memory_space<vmem>>, vector<1x16x32xbf16>
    tpu.vector_store %arg8[%c0_12, %c1, %c0_13], %8 {strides = array<i32>} : memref<10x18x32xbf16, #tpu.memory_space<vmem>>, vector<1x16x32xbf16>,
    %c1_14 = arith.constant 1 : index
    %c1_15 = arith.constant 1 : index
    %c0_16 = arith.constant 0 : index
    %21 = vector.load %arg8[%c1_14, %c1_15, %c0_16] : memref<10x18x32xbf16, #tpu.memory_space<vmem>>, vector<8x16x32xbf16>
    tpu.vector_store %arg8[%c1_14, %c1_15, %c0_16], %19 {strides = array<i32>} : memref<10x18x32xbf16, #tpu.memory_space<vmem>>, vector<8x16x32xbf16>,
    %c9 = arith.constant 9 : index
    %c1_17 = arith.constant 1 : index
    %c0_18 = arith.constant 0 : index
    %22 = vector.load %arg8[%c9, %c1_17, %c0_18] : memref<10x18x32xbf16, #tpu.memory_space<vmem>>, vector<1x16x32xbf16>
    tpu.vector_store %arg8[%c9, %c1_17, %c0_18], %17 {strides = array<i32>} : memref<10x18x32xbf16, #tpu.memory_space<vmem>>, vector<1x16x32xbf16>,
    %cst = arith.constant 0.000000e+00 : bf16
    %23 = vector.broadcast %cst : bf16 to vector<10x1x32xbf16>
    %c0_19 = arith.constant 0 : index
    %c0_20 = arith.constant 0 : index
    %c0_21 = arith.constant 0 : index
    %24 = vector.load %arg8[%c0_19, %c0_20, %c0_21] : memref<10x18x32xbf16, #tpu.memory_space<vmem>>, vector<10x1x32xbf16>
    tpu.vector_store %arg8[%c0_19, %c0_20, %c0_21], %23 {strides = array<i32>} : memref<10x18x32xbf16, #tpu.memory_space<vmem>>, vector<10x1x32xbf16>,
    %c0_22 = arith.constant 0 : index
    %c17 = arith.constant 17 : index
    %c0_23 = arith.constant 0 : index
    %25 = vector.load %arg8[%c0_22, %c17, %c0_23] : memref<10x18x32xbf16, #tpu.memory_space<vmem>>, vector<10x1x32xbf16>
    tpu.vector_store %arg8[%c0_22, %c17, %c0_23], %23 {strides = array<i32>} : memref<10x18x32xbf16, #tpu.memory_space<vmem>>, vector<10x1x32xbf16>,
    %c0_24 = arith.constant 0 : index
    %c0_25 = arith.constant 0 : index
    %c0_26 = arith.constant 0 : index
    %26 = vector.load %arg5[%c0_24, %c0_25, %c0_26] : memref<3x96x32xbf16, #tpu.memory_space<vmem>>, vector<1x96x32xbf16>
    %27 = vector.shape_cast %26 : vector<1x96x32xbf16> to vector<96x32xbf16>
    %c0_27 = arith.constant 0 : index
    %c0_28 = arith.constant 0 : index
    %c0_29 = arith.constant 0 : index
    %28 = vector.load %arg8[%c0_27, %c0_28, %c0_29] : memref<10x18x32xbf16, #tpu.memory_space<vmem>>, vector<8x16x32xbf16>
    %29 = vector.shape_cast %28 : vector<8x16x32xbf16> to vector<128x32xbf16>
    %30 = vector.extract_strided_slice %27 {offsets = [0, 0], sizes = [32, 32], strides = [1, 1]} : vector<96x32xbf16> to vector<32x32xbf16>
    %cst_30 = arith.constant dense<0.000000e+00> : vector<128x32xf32>
    %31 = tpu.matmul %29, %30, %cst_30 {dimension_numbers = #tpu.dot_dimension_numbers<[1], [0], [0], [1], [0, 0, 1, 1], [], []>} : vector<128x32xbf16>, vector<32x32xbf16>, vector<128x32xf32> -> vector<128x32xf32>
    %c0_31 = arith.constant 0 : index
    %c1_32 = arith.constant 1 : index
    %c0_33 = arith.constant 0 : index
    %32 = vector.load %arg8[%c0_31, %c1_32, %c0_33] : memref<10x18x32xbf16, #tpu.memory_space<vmem>>, vector<8x16x32xbf16>
    %33 = vector.shape_cast %32 : vector<8x16x32xbf16> to vector<128x32xbf16>
    %34 = vector.extract_strided_slice %27 {offsets = [32, 0], sizes = [32, 32], strides = [1, 1]} : vector<96x32xbf16> to vector<32x32xbf16>
    %cst_34 = arith.constant dense<0.000000e+00> : vector<128x32xf32>
    %35 = tpu.matmul %33, %34, %cst_34 {dimension_numbers = #tpu.dot_dimension_numbers<[1], [0], [0], [1], [0, 0, 1, 1], [], []>} : vector<128x32xbf16>, vector<32x32xbf16>, vector<128x32xf32> -> vector<128x32xf32>
    %36 = arith.addf %31, %35 : vector<128x32xf32>
    %c0_35 = arith.constant 0 : index
    %c2 = arith.constant 2 : index
    %c0_36 = arith.constant 0 : index
    %37 = vector.load %arg8[%c0_35, %c2, %c0_36] : memref<10x18x32xbf16, #tpu.memory_space<vmem>>, vector<8x16x32xbf16>
    %38 = vector.shape_cast %37 : vector<8x16x32xbf16> to vector<128x32xbf16>
    %39 = vector.extract_strided_slice %27 {offsets = [64, 0], sizes = [32, 32], strides = [1, 1]} : vector<96x32xbf16> to vector<32x32xbf16>
    %cst_37 = arith.constant dense<0.000000e+00> : vector<128x32xf32>
    %40 = tpu.matmul %38, %39, %cst_37 {dimension_numbers = #tpu.dot_dimension_numbers<[1], [0], [0], [1], [0, 0, 1, 1], [], []>} : vector<128x32xbf16>, vector<32x32xbf16>, vector<128x32xf32> -> vector<128x32xf32>
    %41 = arith.addf %36, %40 : vector<128x32xf32>
    %c1_38 = arith.constant 1 : index
    %c0_39 = arith.constant 0 : index
    %c0_40 = arith.constant 0 : index
    %42 = vector.load %arg5[%c1_38, %c0_39, %c0_40] : memref<3x96x32xbf16, #tpu.memory_space<vmem>>, vector<1x96x32xbf16>
    %43 = vector.shape_cast %42 : vector<1x96x32xbf16> to vector<96x32xbf16>
    %c1_41 = arith.constant 1 : index
    %c0_42 = arith.constant 0 : index
    %c0_43 = arith.constant 0 : index
    %44 = vector.load %arg8[%c1_41, %c0_42, %c0_43] : memref<10x18x32xbf16, #tpu.memory_space<vmem>>, vector<8x16x32xbf16>
    %45 = vector.shape_cast %44 : vector<8x16x32xbf16> to vector<128x32xbf16>
    %46 = vector.extract_strided_slice %43 {offsets = [0, 0], sizes = [32, 32], strides = [1, 1]} : vector<96x32xbf16> to vector<32x32xbf16>
    %cst_44 = arith.constant dense<0.000000e+00> : vector<128x32xf32>
    %47 = tpu.matmul %45, %46, %cst_44 {dimension_numbers = #tpu.dot_dimension_numbers<[1], [0], [0], [1], [0, 0, 1, 1], [], []>} : vector<128x32xbf16>, vector<32x32xbf16>, vector<128x32xf32> -> vector<128x32xf32>
    %48 = arith.addf %41, %47 : vector<128x32xf32>
    %c1_45 = arith.constant 1 : index
    %c1_46 = arith.constant 1 : index
    %c0_47 = arith.constant 0 : index
    %49 = vector.load %arg8[%c1_45, %c1_46, %c0_47] : memref<10x18x32xbf16, #tpu.memory_space<vmem>>, vector<8x16x32xbf16>
    %50 = vector.shape_cast %49 : vector<8x16x32xbf16> to vector<128x32xbf16>
    %51 = vector.extract_strided_slice %43 {offsets = [32, 0], sizes = [32, 32], strides = [1, 1]} : vector<96x32xbf16> to vector<32x32xbf16>
    %cst_48 = arith.constant dense<0.000000e+00> : vector<128x32xf32>
    %52 = tpu.matmul %50, %51, %cst_48 {dimension_numbers = #tpu.dot_dimension_numbers<[1], [0], [0], [1], [0, 0, 1, 1], [], []>} : vector<128x32xbf16>, vector<32x32xbf16>, vector<128x32xf32> -> vector<128x32xf32>
    %53 = arith.addf %48, %52 : vector<128x32xf32>
    %c1_49 = arith.constant 1 : index
    %c2_50 = arith.constant 2 : index
    %c0_51 = arith.constant 0 : index
    %54 = vector.load %arg8[%c1_49, %c2_50, %c0_51] : memref<10x18x32xbf16, #tpu.memory_space<vmem>>, vector<8x16x32xbf16>
    %55 = vector.shape_cast %54 : vector<8x16x32xbf16> to vector<128x32xbf16>
    %56 = vector.extract_strided_slice %43 {offsets = [64, 0], sizes = [32, 32], strides = [1, 1]} : vector<96x32xbf16> to vector<32x32xbf16>
    %cst_52 = arith.constant dense<0.000000e+00> : vector<128x32xf32>
    %57 = tpu.matmul %55, %56, %cst_52 {dimension_numbers = #tpu.dot_dimension_numbers<[1], [0], [0], [1], [0, 0, 1, 1], [], []>} : vector<128x32xbf16>, vector<32x32xbf16>, vector<128x32xf32> -> vector<128x32xf32>
    %58 = arith.addf %53, %57 : vector<128x32xf32>
    %c2_53 = arith.constant 2 : index
    %c0_54 = arith.constant 0 : index
    %c0_55 = arith.constant 0 : index
    %59 = vector.load %arg5[%c2_53, %c0_54, %c0_55] : memref<3x96x32xbf16, #tpu.memory_space<vmem>>, vector<1x96x32xbf16>
    %60 = vector.shape_cast %59 : vector<1x96x32xbf16> to vector<96x32xbf16>
    %c2_56 = arith.constant 2 : index
    %c0_57 = arith.constant 0 : index
    %c0_58 = arith.constant 0 : index
    %61 = vector.load %arg8[%c2_56, %c0_57, %c0_58] : memref<10x18x32xbf16, #tpu.memory_space<vmem>>, vector<8x16x32xbf16>
    %62 = vector.shape_cast %61 : vector<8x16x32xbf16> to vector<128x32xbf16>
    %63 = vector.extract_strided_slice %60 {offsets = [0, 0], sizes = [32, 32], strides = [1, 1]} : vector<96x32xbf16> to vector<32x32xbf16>
    %cst_59 = arith.constant dense<0.000000e+00> : vector<128x32xf32>
    %64 = tpu.matmul %62, %63, %cst_59 {dimension_numbers = #tpu.dot_dimension_numbers<[1], [0], [0], [1], [0, 0, 1, 1], [], []>} : vector<128x32xbf16>, vector<32x32xbf16>, vector<128x32xf32> -> vector<128x32xf32>
    %65 = arith.addf %58, %64 : vector<128x32xf32>
    %c2_60 = arith.constant 2 : index
    %c1_61 = arith.constant 1 : index
    %c0_62 = arith.constant 0 : index
    %66 = vector.load %arg8[%c2_60, %c1_61, %c0_62] : memref<10x18x32xbf16, #tpu.memory_space<vmem>>, vector<8x16x32xbf16>
    %67 = vector.shape_cast %66 : vector<8x16x32xbf16> to vector<128x32xbf16>
    %68 = vector.extract_strided_slice %60 {offsets = [32, 0], sizes = [32, 32], strides = [1, 1]} : vector<96x32xbf16> to vector<32x32xbf16>
    %cst_63 = arith.constant dense<0.000000e+00> : vector<128x32xf32>
    %69 = tpu.matmul %67, %68, %cst_63 {dimension_numbers = #tpu.dot_dimension_numbers<[1], [0], [0], [1], [0, 0, 1, 1], [], []>} : vector<128x32xbf16>, vector<32x32xbf16>, vector<128x32xf32> -> vector<128x32xf32>
    %70 = arith.addf %65, %69 : vector<128x32xf32>
    %c2_64 = arith.constant 2 : index
    %c2_65 = arith.constant 2 : index
    %c0_66 = arith.constant 0 : index
    %71 = vector.load %arg8[%c2_64, %c2_65, %c0_66] : memref<10x18x32xbf16, #tpu.memory_space<vmem>>, vector<8x16x32xbf16>
    %72 = vector.shape_cast %71 : vector<8x16x32xbf16> to vector<128x32xbf16>
    %73 = vector.extract_strided_slice %60 {offsets = [64, 0], sizes = [32, 32], strides = [1, 1]} : vector<96x32xbf16> to vector<32x32xbf16>
    %cst_67 = arith.constant dense<0.000000e+00> : vector<128x32xf32>
    %74 = tpu.matmul %72, %73, %cst_67 {dimension_numbers = #tpu.dot_dimension_numbers<[1], [0], [0], [1], [0, 0, 1, 1], [], []>} : vector<128x32xbf16>, vector<32x32xbf16>, vector<128x32xf32> -> vector<128x32xf32>
    %75 = arith.addf %70, %74 : vector<128x32xf32>
    %c0_68 = arith.constant 0 : index
    %c0_69 = arith.constant 0 : index
    %76 = vector.load %arg6[%c0_68, %c0_69] : memref<1x32xf32, #tpu.memory_space<vmem>>, vector<1x32xf32>
    %77 = vector.broadcast %76 : vector<1x32xf32> to vector<128x32xf32>
    %78 = arith.addf %75, %77 : vector<128x32xf32>
    %cst_70 = arith.constant 0.000000e+00 : f32
    %79 = vector.broadcast %cst_70 : f32 to vector<128x32xf32>
    %80 = arith.maximumf %78, %79 : vector<128x32xf32>
    %81 = vector.shape_cast %80 : vector<128x32xf32> to vector<8x16x32xf32>
    %82 = arith.truncf %81 : vector<8x16x32xf32> to vector<8x16x32xbf16>
    %c0_71 = arith.constant 0 : index
    %c0_72 = arith.constant 0 : index
    %c0_73 = arith.constant 0 : index
    %c0_74 = arith.constant 0 : index
    %83 = vector.load %arg7[%c0_71, %c0_72, %c0_73, %c0_74] : memref<1x8x16x32xbf16, #tpu.memory_space<vmem>>, vector<1x8x16x32xbf16>
    %84 = vector.shape_cast %83 : vector<1x8x16x32xbf16> to vector<8x16x32xbf16>
    %85 = vector.shape_cast %82 : vector<8x16x32xbf16> to vector<1x8x16x32xbf16>
    tpu.vector_store %arg7[%c0_71, %c0_72, %c0_73, %c0_74], %85 {strides = array<i32>} : memref<1x8x16x32xbf16, #tpu.memory_space<vmem>>, vector<1x8x16x32xbf16>,
    return
  }
  func.func @transform_0(%arg0: i32, %arg1: i32) -> (i32, i32, i32, i32) {
    %c0_i32 = arith.constant 0 : i32
    %c0_i32_0 = arith.constant 0 : i32
    %c0_i32_1 = arith.constant 0 : i32
    return %arg0, %arg1, %c0_i32, %c0_i32_0 : i32, i32, i32, i32
  }
  func.func @transform_1(%arg0: i32, %arg1: i32) -> (i32, i32, i32, i32) {
    %c8_i32 = arith.constant 8 : i32
    %0 = arith.muli %arg1, %c8_i32 : i32
    %c1_i32 = arith.constant 1 : i32
    %1 = arith.subi %0, %c1_i32 : i32
    %c0_i32 = arith.constant 0 : i32
    %2 = arith.maxsi %1, %c0_i32 : i32
    %c0_i32_0 = arith.constant 0 : i32
    %c0_i32_1 = arith.constant 0 : i32
    %c0_i32_2 = arith.constant 0 : i32
    return %arg0, %2, %c0_i32_0, %c0_i32_1 : i32, i32, i32, i32
  }
  func.func @transform_2(%arg0: i32, %arg1: i32) -> (i32, i32, i32, i32) {
    %c8_i32 = arith.constant 8 : i32
    %0 = arith.muli %arg1, %c8_i32 : i32
    %c8_i32_0 = arith.constant 8 : i32
    %1 = arith.addi %0, %c8_i32_0 : i32
    %c31_i32 = arith.constant 31 : i32
    %2 = arith.minsi %1, %c31_i32 : i32
    %c0_i32 = arith.constant 0 : i32
    %c0_i32_1 = arith.constant 0 : i32
    %c0_i32_2 = arith.constant 0 : i32
    return %arg0, %2, %c0_i32, %c0_i32_1 : i32, i32, i32, i32
  }
  func.func @transform_3(%arg0: i32, %arg1: i32) -> (i32, i32, i32) {
    %c0_i32 = arith.constant 0 : i32
    %c0_i32_0 = arith.constant 0 : i32
    %c0_i32_1 = arith.constant 0 : i32
    %c0_i32_2 = arith.constant 0 : i32
    return %c0_i32, %c0_i32_0, %c0_i32_1 : i32, i32, i32
  }
  func.func @transform_4(%arg0: i32, %arg1: i32) -> (i32, i32) {
    %c0_i32 = arith.constant 0 : i32
    %c0_i32_0 = arith.constant 0 : i32
    %c0_i32_1 = arith.constant 0 : i32
    return %c0_i32, %c0_i32_0 : i32, i32
  }
  func.func @transform_5(%arg0: i32, %arg1: i32) -> (i32, i32, i32, i32) {
    %c0_i32 = arith.constant 0 : i32
    %c0_i32_0 = arith.constant 0 : i32
    %c0_i32_1 = arith.constant 0 : i32
    return %arg0, %arg1, %c0_i32, %c0_i32_0 : i32, i32, i32, i32
  }
}

</mosaic_0001>

<bundles_post_ra>
// kernel: tpu_custom_call.1
= control target key start
LH: loop header
LB: loop body
LE: loop exit
PB: predicated region body
PF: predicated region fallthrough
CT: control target
= control target key end

     0   :  { %s4659_s0 = inlined_call_operand.hbm [shape: bf16[2,32,16,32], index: 0, kind: input, shape index: {}]   ;;  %s4660_s1 = inlined_call_operand.hbm [shape: bf16[2,32,16,32], index: 1, kind: input, shape index: {}]   ;;  %s4661_s2 = inlined_call_operand.hbm [shape: bf16[2,32,16,32], index: 2, kind: input, shape index: {}]   ;;  %s4662_s3 = inlined_call_operand.vmem [shape: bf16[3,96,32], index: 3, kind: input, shape index: {}]   ;;  %s4663_s4 = inlined_call_operand.vmem [shape: f32[1,32], index: 4, kind: input, shape index: {}]   ;;  %s4664_s5 = inlined_call_operand.hbm [shape: bf16[2,32,16,32], index: 5, kind: output, shape index: {}]  }
   0x1   :  { %4691 = sst [smem:[#allocation28_spill]] %s4659_s0 }
   0x2   :  { %4692 = sst [smem:[#allocation29_spill]] %s4660_s1 }
   0x3   :  { %4693 = sst [smem:[#allocation30_spill]] %s4661_s2 }
   0x4   :  { %4694 = sst [smem:[#allocation31_spill]] %s4662_s3 }
   0x5   :  { %4695 = sst [smem:[#allocation32_spill]] %s4663_s4 }
   0x6   :  { %4696 = sst [smem:[#allocation33_spill]] %s4664_s5 }
   0x7   :  { %10 = vsyncpa [#allocation4], 0 }
   0x8   :  { %12 = vsyncpa [#allocation4 + $0x1], 0 }
   0x9   :  { %13 = vsyncpa [#allocation7], 0 }
   0xa   :  { %15 = vsyncpa [#allocation7 + $0x1], 0 }
   0xb   :  { %16 = vsyncpa [#allocation5], 0 }
   0xc   :  { %18 = vsyncpa [#allocation5 + $0x1], 0  ;;  %s3368_s18 = smov 0   ;;  %s3370_s19 = smov 0  }
   0xd   :  { %s3372_s20 = smov 0   ;;  %s3374_s21 = smov 0  }
   0xe   :  { %s3376_s22 = smov 0   ;;  %s3378_s23 = smov 0  }
   0xf   :  { %s3380_s24 = smov 0   ;;  %s3382_s25 = smov 0  }
  0x10   :  { %s3384_s26 = smov 0   ;;  %s3386_s27 = smov 0  }
  0x11   :  { %s3388_s28 = smov 0   ;;  %s3390_s29 = smov 0  }
  0x12   :  { %s3392_s30 = smov 0   ;;  %s3394_s6 = smov 0  }
  0x13 LB: > { %4697 = sst [smem:[#allocation14_spill]] %s3291_s22  ;;  %s3439_s7 = sadd.s32 4294967295, %s3327_s6   ;;  %s3327_s6 = sphi %s3394_s6, %s24_s6   ;;  %s3323_s30 = sphi %s3392_s30, %s4773_s30   ;;  %s3319_s29 = sphi %s3390_s29, %s4772_s29   ;;  %s3315_s28 = sphi %s3388_s28, %s4771_s28   ;;  %s3311_s27 = sphi %s3386_s27, %s4770_s27   ;;  %s3307_s26 = sphi %s3384_s26, %s4781_s26   ;;  %s3303_s25 = sphi %s3382_s25, %s4780_s25   ;;  %s3299_s24 = sphi %s3380_s24, %s4779_s24   ;;  %s3295_s23 = sphi %s3378_s23, %s4778_s23   ;;  %s3291_s22 = sphi %s3376_s22, %s4777_s22   ;;  %s3287_s21 = sphi %s3374_s21, %s4766_s21   ;;  %s3283_s20 = sphi %s3372_s20, %s4776_s20   ;;  %s3279_s19 = sphi %s3370_s19, %s4775_s19   ;;  %s3275_s18 = sphi %s3368_s18, %s4774_s18  }
  0x14   : > { %4698 = sst [smem:[#allocation15_spill]] %s3307_s26  ;;  %s33_s8 = sadd.s32 1, %s3319_s29 }
  0x15   : > { %4699 = sst [smem:[#allocation16_spill]] %s3311_s27  ;;  %p34_p0 = scmp.ge.s32.totalorder %s33_s8, 4 }
  0x16   : > { %4700 = sst [smem:[#allocation17_spill]] %s3315_s28  ;;  %s36_s9 = sadd.s32 1, %s3323_s30 }
  0x17   : > { %4701 = sst [smem:[#allocation18_spill]] %s3319_s29  ;;  %p4677_p1 = scmp.eq.s32.totalorder %s3327_s6, 0 }
  0x18   : > { %4702 = sst [smem:[#allocation19_spill]] %s3323_s30  ;;  %p4676_p2 = scmp.eq.s32.totalorder %s3439_s7, 0 }
  0x19   : > { %s4783_s8 = smov (%p34_p0, %s33_s8), 0  ;;  %s4785_s9 = smov (!%p34_p0, %s36_s9), %s3323_s30 }
  0x1a   : > { %4703 = sst [smem:[#allocation20_spill]] %s4783_s8  ;;  %s41_s10 = ssub.s32 %s3319_s29, %s4783_s8 }
  0x1b   : > { %s2480_s11 = sshll.u32 %s3319_s29, 3  ;;  %p38_p3 = scmp.ge.s32.totalorder %s4785_s9, 2 }
  0x1c   : > { %s2481_s12 = sadd.s32 4294967295, %s2480_s11  ;;  %s2482_s13 = sshll.u32 %s4783_s8, 3 }
  0x1d   : > { %p70_p4 = scmp.gt.s32.totalorder %s2481_s12, 0  ;;  %s4787_s9 = smov (%p38_p3, %s4785_s9), 0 }
  0x1e   : > { %4704 = sst [smem:[#allocation21_spill]] %s4787_s9  ;;  %s3456_s14 = ssub.s32 %s3323_s30, %s4787_s9 }
  0x1f   : > { %s4789_s12 = smov (!%p70_p4, %s2481_s12), 0  ;;  %4705 = sst [smem:[#allocation22_spill]] %s3456_s14 }
  0x20   : > { %s2483_s15 = sadd.s32 4294967295, %s2482_s13  ;;  %s3459_s16 = sor.u32 %s41_s10, %s3456_s14 }
  0x21   : > { %p74_p5 = scmp.gt.s32.totalorder %s2483_s15, 0  ;;  %s81_s17 = sadd.s32 1, %s3295_s23 }
  0x22   : > { %p88_p7 = scmp.ne.s32.totalorder %s3295_s23, %s3291_s22  ;;  %p94_p8 = scmp.ne.s32.totalorder %s3291_s22, %s3287_s21 }
  0x23   : > { %s4791_s15 = smov (!%p74_p5, %s2483_s15), 0  ;;  %s3467_s9 = sadd.s32 8, %s2480_s11 }
  0x24   : > { %s77_s8 = ssub.s32 %s4789_s12, %s4791_s15  ;;  %p3472_p9 = por %p88_p7, %p4677_p1 }
  0x25   : > { %s78_s5 = sor.u32 %s77_s8, %s3456_s14  ;;  %p3478_p11 = por %p94_p8, %p4676_p2 }
  0x26   : > { %p79_p10 = scmp.eq.s32.totalorder %s78_s5, 0  ;;  %s3483_s21 = sadd.s32 8, %s2482_s13 }
  0x27   : > { %s4707_s28 = scalar_select %p3478_p11, 1, 0 }
  0x28   : > { %s3486_s11 = scalar_select %p79_p10, %s3295_s23, %s81_s17  }
  0x29   : > { %4708 = sst [smem:[#allocation23_spill]] %s4707_s28  ;;  %p4675_p0 = scmp.lt.s32.totalorder %s3327_s6, 8 }
  0x2a   : > { %4709 = sst [smem:[#allocation24_spill]] %s3486_s11  ;;  %s3491_s8 = sshll.u32 %s3323_s30, 6 }
  0x2b   : > { %s254_s5 = sand.u32 1, %s3327_s6   ;;  %s256_s15 = sand.u32 1, %s3295_s23  }
  0x2c   : > { %s2493_s4 = sshll.u32 %s256_s15, 3  ;;  %s2496_s3 = sshll.u32 %s4789_s12, 1 }
  0x2d   : > { %s268_s27 = sadd.s32 %s2496_s3, %s3491_s8  ;;  %s258_s28 = scalar_lea.vmem [#allocation6], %s2493_s4 }
  0x2e   : > { %s271_s22 = sshll.u32 %s258_s28, 4  ;;  %s2498_s2 = sshll.u32 %s268_s27, 6  ;;  %s3496_s22 = int_to_ptr.vmem [resolvable:$true] %s271_s22 }
  0x2f   : > { %s4710_s1 = sld [smem:[#allocation29_spill]]  ;;  %p3507_p3 = pnand %p4675_p0, %p3472_p9 }
  0x30   : > { %s3513_s3 = scalar_lea.sflag [#allocation7], %s254_s5 }
  0x31   : > { %p3085_p8 = pneg %p3507_p3 }
  0x35   : > { %s3501_s17 = scalar_lea.hbm %s4710_s1, %s2498_s2  ;;  %s3088_s28 = scalar_lea.hbm %s4710_s1, 8192 }
  0x36   : > { %s3083_s4 = scalar_lea.hbm %s3501_s17, 128  ;;  %p3089_p9 = scmp.lt.u32.totalorder %s3501_s17, %s4710_s1 }
  0x37   : > { %p3084_p7 = scmp.ne.s32.totalorder %s3501_s17, %s3083_s4  ;;  %p3090_p12 = scmp.lt.u32.totalorder %s3088_s28, %s3083_s4 }
  0x38   : > { %p3092_p2 = scmp.lt.u32.totalorder %s3083_s4, %s3501_s17 }
  0x39   : > { %p3086_p10 = pnand %p3085_p8, %p3084_p7  ;;  %p3091_p0 = por %p3090_p12, %p3089_p9 }
  0x3b   : > { %p3087_p13 = pneg %p3086_p10  ;;  %p3093_p1 = por %p3092_p2, %p3091_p0 }
  0x3d   : > { %p3094_p6 = pnand %p3093_p1, %p3087_p13 }
  0x3f   : > { %3097 = shalt.err (!%p3094_p6)
}
  0x40   : > { %s3098_s10 = scalar_lea.vmem %s3496_s22, 128  ;;  %s3329_s5 = smov [#allocation6]  }
  0x41   : > { %p3099_p7 = scmp.ne.s32.totalorder %s3496_s22, %s3098_s10  ;;  %s3103_s13 = sshll.u32 %s3329_s5, 4  ;;  %s3104_s13 = int_to_ptr.vmem [resolvable:$false] %s3103_s13 }
  0x42   : > { %s3105_s2 = scalar_lea.vmem %s3104_s13, 256  ;;  %p3106_p5 = scmp.lt.s32.totalorder %s3496_s22, %s3104_s13 }
  0x43   : > { %p3101_p10 = pnand %p3099_p7, %p3085_p8  ;;  %p3107_p12 = scmp.lt.s32.totalorder %s3105_s2, %s3098_s10 }
  0x45   : > { %p3102_p4 = pneg %p3101_p10  ;;  %p3108_p9 = por %p3107_p12, %p3106_p5 }
  0x47   : > { %p3109_p2 = pnand %p3108_p9, %p3102_p4 }
  0x49   : > { %3112 = shalt.err (!%p3109_p2)
}
  0x4a   : > { %s4678_s4 = smov 64   ;;  %s4680_s27 = smov 4  }
  0x4b   : > { %2874 = dma.hbm_to_vmem [thread:$0]  (!%p3507_p3), %s3501_s17, 128, %s3496_s22, %s3513_s3, %s4678_s4, %s4678_s4, %s4680_s27  }
  0x4c   : > { %p4712_p1 = scmp.lt.s32.totalorder %s3327_s6, 9  ;;  %p4713_p6 = scmp.ge.s32.totalorder %s3327_s6, 1 }
  0x4d   : > { %s2479_s12 = sadd.s32 4294967294, %s3327_s6   ;;  %s45_s14 = sadd.s32 1, %s3307_s26 }
  0x4e   : > { %p3548_p13 = pnand %p4713_p6, %p4712_p1  ;;  %p4715_p0 = scmp.eq.s32.totalorder %s3459_s16, 0 }
  0x4f   : > { %p52_p4 = scmp.ne.s32.totalorder %s3307_s26, %s3303_s25  ;;  %p58_p5 = scmp.ne.s32.totalorder %s3303_s25, %s3299_s24 }
  0x50   : > { %s3557_s10 = scalar_select %p4715_p0, %s3307_s26, %s45_s14  }
  0x51   : > { %p198_p8 = scmp.eq.s32.totalorder %s3439_s7, 7  ;;  %p204_p7 = scmp.eq.s32.totalorder %s2479_s12, 7 }
  0x52   : > { %4716 = sst [smem:[#allocation25_spill]] %s3557_s10  ;;  %p4717_p10 = scmp.eq.s32.totalorder %s3327_s6, 0 }
  0x53   : > { %p4719_p3 = scmp.eq.s32.totalorder %s3439_s7, 0  ;;  %p3576_p2 = por %p198_p8, %p52_p4 }
  0x54   : > { %p3566_p12 = por %p4717_p10, %p52_p4  ;;  %p3580_p1 = por %p204_p7, %p58_p5 }
  0x55   : > { %p3572_p9 = por %p4719_p3, %p58_p5  ;;  %s230_s5 = sand.u32 1, %s3307_s26  }
  0x56   : > { %s4721_s16 = scalar_select %p3576_p2, 1, 0 }
  0x57   : > { %s4720_s17 = scalar_select %p3572_p9, 1, 0 }
  0x58   : > { %s4722_s15 = scalar_select %p3580_p1, 1, 0 }
  0x59   : > { %s2672_s13 = sshll.u32 %s3319_s29, 4  ;;  %s2488_s2 = sshll.u32 %s230_s5, 6 }
  0x5a   : > { %s241_s12 = sadd.s32 %s2672_s13, %s3491_s8  ;;  %s234_s4 = scalar_lea.vmem [#allocation3], %s2488_s2 }
  0x5b   : > { %s2492_s14 = sshll.u32 %s241_s12, 6  ;;  %s244_s27 = sshll.u32 %s234_s4, 4  ;;  %s3592_s27 = int_to_ptr.vmem [resolvable:$true] %s244_s27 }
  0x5c   : > { %s4723_s0 = sld [smem:[#allocation28_spill]]  ;;  %p4724_p6 = scmp.lt.s32.totalorder %s3327_s6, 8 }
  0x5d   : > { %s3602_s4 = scalar_lea.sflag [#allocation4], %s230_s5 }
  0x5e   : > { %p3598_p0 = pnand %p4724_p6, %p3566_p12 }
  0x60   : > { %p3115_p5 = pneg %p3598_p0 }
  0x62   : > { %s3590_s10 = scalar_lea.hbm %s4723_s0, %s2492_s14  ;;  %s3118_s22 = scalar_lea.hbm %s4723_s0, 8192 }
  0x63   : > { %s3113_s13 = scalar_lea.hbm %s3590_s10, 1024  ;;  %p3119_p10 = scmp.lt.u32.totalorder %s3590_s10, %s4723_s0 }
  0x64   : > { %p3114_p4 = scmp.ne.s32.totalorder %s3590_s10, %s3113_s13  ;;  %p3120_p12 = scmp.lt.u32.totalorder %s3118_s22, %s3113_s13 }
  0x65   : > { %p3122_p6 = scmp.lt.u32.totalorder %s3113_s13, %s3590_s10 }
  0x66   : > { %p3116_p8 = pnand %p3115_p5, %p3114_p4  ;;  %p3121_p3 = por %p3120_p12, %p3119_p10 }
  0x68   : > { %p3117_p7 = pneg %p3116_p8  ;;  %p3123_p1 = por %p3122_p6, %p3121_p3 }
  0x6a   : > { %p3124_p2 = pnand %p3123_p1, %p3117_p7 }
  0x6c   : > { %3127 = shalt.err (!%p3124_p2)
}
  0x6d   : > { %s3128_s5 = scalar_lea.vmem %s3592_s27, 1024  ;;  %s3332_s14 = smov [#allocation3]  }
  0x6e   : > { %p3129_p4 = scmp.ne.s32.totalorder %s3592_s27, %s3128_s5  ;;  %s3133_s1 = sshll.u32 %s3332_s14, 4  ;;  %s3134_s1 = int_to_ptr.vmem [resolvable:$false] %s3133_s1 }
  0x6f   : > { %s3135_s30 = scalar_lea.vmem %s3134_s1, 2048  ;;  %p3136_p9 = scmp.lt.s32.totalorder %s3592_s27, %s3134_s1 }
  0x70   : > { %p3131_p8 = pnand %p3129_p4, %p3115_p5  ;;  %p3137_p10 = scmp.lt.s32.totalorder %s3135_s30, %s3128_s5 }
  0x72   : > { %p3132_p11 = pneg %p3131_p8  ;;  %p3138_p12 = por %p3137_p10, %p3136_p9 }
  0x74   : > { %p3139_p3 = pnand %p3138_p12, %p3132_p11 }
  0x76   : > { %3142 = shalt.err (!%p3139_p3)
}
  0x77   : > { %s4726_s13 = smov 4   ;;  %s4727_s22 = smov 64  }
  0x78   : > { %s4728_s2 = sld [smem:[#allocation22_spill]]  ;;  %p4729_p11 = scmp.lt.s32.totalorder %s3467_s9, 31 }
  0x79   : > { %2871 = dma.hbm_to_vmem [thread:$0]  (!%p3598_p0), %s3590_s10, 1024, %s3592_s27, %s3602_s4, %s4727_s22, %s4727_s22, %s4726_s13  }
  0x7a   : > { %s4793_s9 = smov (!%p4729_p11, %s3467_s9), 31  ;;  %p4730_p9 = scmp.lt.s32.totalorder %s3483_s21, 31 }
  0x7b   : > { %s117_s29 = sadd.s32 1, %s3283_s20  ;;  %p124_p2 = scmp.ne.s32.totalorder %s3283_s20, %s3279_s19 }
  0x7c   : > { %s4795_s21 = smov (!%p4730_p9, %s3483_s21), 31  ;;  %p130_p1 = scmp.ne.s32.totalorder %s3279_s19, %s3275_s18 }
  0x7d   : > { %s113_s12 = ssub.s32 %s4793_s9, %s4795_s21  ;;  %p4731_p5 = scmp.eq.s32.totalorder %s3327_s6, 0 }
  0x7e   : > { %s114_s5 = sor.u32 %s113_s12, %s4728_s2  ;;  %p4733_p4 = scmp.eq.s32.totalorder %s3439_s7, 0 }
  0x7f   : > { %p3647_p7 = por %p124_p2, %p4731_p5  ;;  %p115_p6 = scmp.eq.s32.totalorder %s114_s5, 0 }
  0x80   : > { %p3653_p8 = por %p130_p1, %p4733_p4  ;;  %s283_s10 = sand.u32 1, %s3283_s20  }
  0x81   : > { %s2501_s4 = sshll.u32 %s4793_s9, 1  ;;  %s2499_s21 = sshll.u32 %s283_s10, 3 }
  0x82   : > { %s4734_s27 = scalar_select %p3653_p8, 1, 0 }
  0x83   : > { %s3659_s1 = scalar_select %p115_p6, %s3283_s20, %s117_s29  }
  0x84   : > { %s295_s30 = sadd.s32 %s2501_s4, %s3491_s8  ;;  %s4735_s0 = sld [smem:[#allocation30_spill]] }
  0x85   : > { %s2503_s18 = sshll.u32 %s295_s30, 6  ;;  %s285_s5 = scalar_lea.vmem [#allocation8], %s2499_s21 }
  0x86   : > { %s298_s11 = sshll.u32 %s285_s5, 4  ;;  %p4736_p0 = scmp.lt.s32.totalorder %s3327_s6, 8  ;;  %s3667_s11 = int_to_ptr.vmem [resolvable:$true] %s298_s11 }
  0x88   : > { %p3673_p10 = pnand %p4736_p0, %p3647_p7 }
  0x8a   : > { %s3665_s26 = scalar_lea.hbm %s4735_s0, %s2503_s18  ;;  %p3145_p3 = pneg %p3673_p10 }
  0x8b   : > { %s3143_s8 = scalar_lea.hbm %s3665_s26, 128  ;;  %s3148_s4 = scalar_lea.hbm %s4735_s0, 8192 }
  0x8c   : > { %p3144_p12 = scmp.ne.s32.totalorder %s3665_s26, %s3143_s8  ;;  %p3149_p2 = scmp.lt.u32.totalorder %s3665_s26, %s4735_s0 }
  0x8d   : > { %p3150_p1 = scmp.lt.u32.totalorder %s3148_s4, %s3143_s8  ;;  %p3152_p7 = scmp.lt.u32.totalorder %s3143_s8, %s3665_s26 }
  0x8e   : > { %p3146_p11 = pnand %p3145_p3, %p3144_p12 }
  0x8f   : > { %p3151_p5 = por %p3150_p1, %p3149_p2 }
  0x90   : > { %p3147_p9 = pneg %p3146_p11 }
  0x91   : > { %p3153_p6 = por %p3152_p7, %p3151_p5 }
  0x93   : > { %p3154_p4 = pnand %p3153_p6, %p3147_p9 }
  0x95   : > { %3157 = shalt.err (!%p3154_p4)
}
  0x96   : > { %s3158_s30 = scalar_lea.vmem %s3667_s11, 128  ;;  %s3333_s18 = smov [#allocation8]  }
  0x97   : > { %p3159_p0 = scmp.ne.s32.totalorder %s3667_s11, %s3158_s30  ;;  %s3163_s2 = sshll.u32 %s3333_s18, 4  ;;  %s3164_s2 = int_to_ptr.vmem [resolvable:$false] %s3163_s2 }
  0x98   : > { %s3165_s12 = scalar_lea.vmem %s3164_s2, 256  ;;  %p3166_p8 = scmp.lt.s32.totalorder %s3667_s11, %s3164_s2 }
  0x99   : > { %p3161_p12 = pnand %p3159_p0, %p3145_p3  ;;  %p3167_p2 = scmp.lt.s32.totalorder %s3165_s12, %s3158_s30 }
  0x9b   : > { %p3162_p11 = pneg %p3161_p12  ;;  %p3168_p1 = por %p3167_p2, %p3166_p8 }
  0x9d   : > { %p3169_p5 = pnand %p3168_p1, %p3162_p11 }
  0x9f   : > { %3172 = shalt.err (!%p3169_p5)
}
  0xa0   : > { %2877 = dma.hbm_to_vmem [thread:$0]  (!%p3673_p10), %s3665_s26, 128, %s3667_s11, %s3513_s3, %s4727_s22, %s4727_s22, %s4726_s13  }
  0xa1   : > { %310 = sbr.rel (%p3548_p13) target bundleno = 693 (0x2b5), region = 40 }
  0xa8   : > { %s3709_s5 = sand.u32 1, %s3303_s25   ;;  %p4738_p8 = scmp.ne.s32.totalorder %s4720_s17, 0 }
  0xa9   : > { %s2505_s8 = sshll.u32 %s3709_s5, 6  ;;  %s313_s29 = scalar_lea.sflag [#allocation4], %s3709_s5 }
  0xaa   : > { %s3715_s9 = scalar_lea.vmem [#allocation3], %s2505_s8 }
  0xab   : > { %3258 = dma.done.wait (%p4738_p8), %s313_s29, 1024  }
  0xac   : > { %3260 = vsyncadd (%p4738_p8), %s313_s29, 4294966272  ;;  %s4739_s26 = sld [smem:[#allocation14_spill]]  ;;  %s4740_s11 = sld [smem:[#allocation23_spill]] }
  0xad   : > { %s321_s3 = sand.u32 1, %s3439_s7  }
  0xae   : > { %s322_s22 = scalar_lea.sflag [#allocation7], %s321_s3 }
  0xb2   : > { %s323_s28 = sand.u32 1, %s4739_s26   ;;  %p4741_p13 = scmp.ne.s32.totalorder %s4740_s11, 0 }
  0xb3   : > { %s3723_s13 = sshll.u32 %s323_s28, 3 }
  0xb4   : > { %s325_s10 = scalar_lea.vmem [#allocation6], %s3723_s13 }
  0xb5   : > { %3262 = dma.done.wait (%p4741_p13), %s322_s22, 128  }
  0xb6   : > { %3264 = vsyncadd (%p4741_p13), %s322_s22, 4294967168  ;;  %s332_s4 = sand.u32 1, %s3279_s19   ;;  %p4742_p10 = scmp.ne.s32.totalorder %s4734_s27, 0 }
  0xb7   : > { %s3731_s17 = sshll.u32 %s332_s4, 3 }
  0xb8   : > { %s334_s14 = scalar_lea.vmem [#allocation8], %s3731_s17 }
  0xb9   : > { %3266 = dma.done.wait (%p4742_p10), %s322_s22, 128  }
  0xba   : > { %3268 = vsyncadd (%p4742_p10), %s322_s22, 4294967168  ;;  %s4743_s7 = sld [smem:[#allocation16_spill]]  ;;  %vm443_vm0 = vsmask.f32 4368  ;;  %vm442_vm1 = vsmask.f32 256 }
  0xbb   : > { %vm466_vm2 = vsmask.f32 7938  ;;  %v426_v0 = vld [vmem:[%s3715_s9] sm:$0xf]  ;;  %v427_v1 = vld [vmem:[%s3715_s9 + $0x4] sm:$0xf]  ;;  %vm3742_vm5 = vmor %vm442_vm1, %vm443_vm0 }
  0xbc   : > { %vm465_vm3 = vcmask 257024   ;;  %vm473_vm4 = vcmask 253952   ;;  %v479_v3 = vshrl.u32 %v426_v0, 16  ;;  %v482_v4 = vshll.u32 %v426_v0, 16  ;;  %v639_v7 = vld [vmem:[#allocation2 + $0xc] sm:$0xf] }
  0xbd   : > { %v487_v5 = vshrl.u32 %v427_v1, 16  ;;  %v490_v6 = vshll.u32 %v427_v1, 16  ;;  %v428_v8 = vld [vmem:[%s3715_s9 + $0x8] sm:$0xf]  ;;  %v429_v9 = vld [vmem:[%s3715_s9 + $0xc] sm:$0xf]  ;;  %vm3756_vm6 = vmand %vm465_vm3, %vm466_vm2 }
  0xbe   : > { %v481_v11 = vrot.slane %v479_v3, 7  ;;  %v643_v13 = vld [vmem:[#allocation2 + $0x14] sm:$0x1]  ;;  %v496_v14 = vshrl.u32 %v428_v8, 16  ;;  %v499_v15 = vshll.u32 %v428_v8, 16  ;;  %vm3762_vm7 = vmand %vm473_vm4, %vm442_vm1  ;;  %v504_v17 = vshrl.u32 %v429_v9, 16 }
  0xbf   : > { %v489_v12 = vrot.slane %v487_v5, 7  ;;  %v507_v18 = vshll.u32 %v429_v9, 16  ;;  %v430_v19 = vld [vmem:[%s3715_s9 + $0x10] sm:$0xf]  ;;  %v431_v20 = vld [vmem:[%s3715_s9 + $0x14] sm:$0xf]  ;;  %vm3794_vm8 = vmand %vm473_vm4, %vm466_vm2 }
  0xc0   : > { %s2509_s21 = sshll.u32 %s4743_s7, 3  ;;  %v484_v21 = vor.u32 %v482_v4, %v481_v11  ;;  %v485_v22 = vrot.slane %v481_v11, 4  ;;  %v498_v25 = vrot.slane %v496_v14, 7  ;;  %v506_v26 = vrot.slane %v504_v17, 7  ;;  %v432_v29 = vld [vmem:[%s3715_s9 + $0x18] sm:$0xf] }
  0xc1   : > { %p3748_p3 = scmp.ge.s32.totalorder %s2509_s21, 1  ;;  %v492_v23 = vor.u32 %v490_v6, %v489_v12  ;;  %v494_v24 = vrot.slane %v489_v12, 4  ;;  %v513_v27 = vshrl.u32 %v430_v19, 16  ;;  %v516_v28 = vshll.u32 %v430_v19, 16  ;;  %v646_v33 = vld [vmem:[#allocation2 + $0x18] sm:$0xf] }
  0xc2   : > { %v640_v31 = vsel %vm3756_vm6, %v484_v21, %v639_v7  ;;  %v650_v34 = vld [vmem:[#allocation2 + $0x20] sm:$0x1]  ;;  %v521_v35 = vshrl.u32 %v431_v20, 16  ;;  %v501_v36 = vor.u32 %v499_v15, %v498_v25  ;;  %v502_v37 = vrot.slane %v498_v25, 4  ;;  %v433_v40 = vld [vmem:[%s3715_s9 + $0x1c] sm:$0xf] }
  0xc3   : > { %s386_s30 = scalar_select %p3748_p3, 1, 0  ;;  %v493_v30 = vsel %vm3742_vm5, %v485_v22, %v492_v23  ;;  %v644_v32 = vsel %vm3762_vm7, %v494_v24, %v643_v13  ;;  %641 = vst [vmem:[#allocation2 + $0xc] sm:$0xf] %v640_v31  ;;  %v509_v38 = vor.u32 %v507_v18, %v506_v26  ;;  %v511_v39 = vrot.slane %v506_v26, 4 }
  0xc4   : > { %642 = vst.msk [vmem:[#allocation2 + $0x10] sm:$0xf] %vm465_vm3, %v493_v30  ;;  %645 = vst [vmem:[#allocation2 + $0x14] sm:$0x1] %v644_v32  ;;  %v515_v41 = vrot.slane %v513_v27, 7  ;;  %v523_v42 = vrot.slane %v521_v35, 7  ;;  %v647_v47 = vsel %vm3756_vm6, %v501_v36, %v646_v33 }
  0xc5   : > { %v524_v43 = vshll.u32 %v431_v20, 16  ;;  %v530_v44 = vshrl.u32 %v432_v29, 16  ;;  %v434_v45 = vld [vmem:[%s3715_s9 + $0x20] sm:$0xf]  ;;  %v510_v46 = vsel %vm3742_vm5, %v502_v37, %v509_v38  ;;  %v651_v48 = vsel %vm3762_vm7, %v511_v39, %v650_v34  ;;  %v653_v49 = vld [vmem:[#allocation2 + $0x24] sm:$0xf]  ;;  %s3789_s18 = scvt.s32.f32 %s386_s30 }
  0xc6   : > { %v657_v50 = vld [vmem:[#allocation2 + $0x2c] sm:$0x1]  ;;  %v533_v51 = vshll.u32 %v432_v29, 16  ;;  %648 = vst [vmem:[#allocation2 + $0x18] sm:$0xf] %v647_v47  ;;  %v518_v52 = vor.u32 %v516_v28, %v515_v41  ;;  %v519_v53 = vrot.slane %v515_v41, 4 }
  0xc7   : > { %649 = vst.msk [vmem:[#allocation2 + $0x1c] sm:$0xf] %vm465_vm3, %v510_v46  ;;  %652 = vst [vmem:[#allocation2 + $0x20] sm:$0x1] %v651_v48  ;;  %v526_v54 = vor.u32 %v524_v43, %v523_v42  ;;  %v528_v55 = vrot.slane %v523_v42, 4  ;;  %v532_v56 = vrot.slane %v530_v44, 7  ;;  %p389_p7 = scmp.ne.f32.partialorder %s3789_s18, %s3789_s18 }
  0xc8   : > { %v538_v57 = vshrl.u32 %v433_v40, 16  ;;  %v541_v58 = vshll.u32 %v433_v40, 16  ;;  %v547_v59 = vshrl.u32 %v434_v45, 16  ;;  %v654_v62 = vsel %vm3756_vm6, %v518_v52, %v653_v49  ;;  %v660_v0 = vld [vmem:[#allocation2 + $0x30] sm:$0xf]  ;;  %s390_s2 = sshrl.u32 %s3789_s18, 16 }
  0xc9   : > { %v527_v61 = vsel %vm3742_vm5, %v519_v53, %v526_v54  ;;  %v658_v63 = vsel %vm3762_vm7, %v528_v55, %v657_v50  ;;  %v664_v1 = vld [vmem:[#allocation2 + $0x38] sm:$0x1]  ;;  %v550_v3 = vshll.u32 %v434_v45, 16  ;;  %655 = vst [vmem:[#allocation2 + $0x24] sm:$0xf] %v654_v62  ;;  %v535_v4 = vor.u32 %v533_v51, %v532_v56  ;;  %s3822_s12 = sand.u32 1, %s390_s2 }
  0xca   : > { %656 = vst.msk [vmem:[#allocation2 + $0x28] sm:$0xf] %vm465_vm3, %v527_v61  ;;  %659 = vst [vmem:[#allocation2 + $0x2c] sm:$0x1] %v658_v63  ;;  %v536_v5 = vrot.slane %v532_v56, 4  ;;  %v540_v6 = vrot.slane %v538_v57, 7 }
  0xcb   : > { %v3805_v7 = vrot.slane %v547_v59, 7  ;;  %v667_v8 = vld [vmem:[#allocation2 + $0x3c] sm:$0xf]  ;;  %v757_v9 = vld [vmem:[#allocation2 + $0x14] sm:$0x1]  ;;  %vm1029_vm9 = vcmask 1046528   ;;  %v661_v21 = vsel %vm3756_vm6, %v535_v4, %v660_v0 }
  0xcc   : > { %v1118_v11 = vld [vmem:[#allocation2 + $0x10] sm:$0xf]  ;;  %v1141_v12 = vld [vmem:[#allocation2 + $0xc] sm:$0xe]  ;;  %v758_v13 = vsel %vm3794_vm8, 0, %v757_v9  ;;  %v543_v17 = vor.u32 %v541_v58, %v540_v6  ;;  %v545_v18 = vrot.slane %v540_v6, 4 }
  0xcd   : > { %v726_v14 = vld [vmem:[#allocation2 + $0xc] sm:$0x1]  ;;  %v3810_v15 = vld [vmem:[#allocation2 + $0x10] sm:$0xf]  ;;  %759 = vst [vmem:[#allocation2 + $0x14] sm:$0x1] %v758_v13  ;;  %v552_v23 = vor.u32 %v550_v3, %v3805_v7  ;;  %v2562_v24 = vcombine.low %v1141_v12, %v1118_v11 }
  0xce   : > { %v727_v19 = vsel %vm3762_vm7, 0, %v726_v14  ;;  %v821_v20 = vld [vmem:[#allocation2 + $0xc] sm:$0xe]  ;;  %v435_v22 = vld [vmem:[%s3715_s9 + $0x24] sm:$0xf]  ;;  %v544_v27 = vsel %vm3742_vm5, %v536_v5, %v543_v17  ;;  %v665_v28 = vsel %vm3762_vm7, %v545_v18, %v664_v1  ;;  %v553_v37 = vrot.slane %v3805_v7, 4 }
  0xcf   : > { %728 = vst [vmem:[#allocation2 + $0xc] sm:$0x1] %v727_v19  ;;  %v729_v25 = vld [vmem:[#allocation2 + $0x18] sm:$0x1]  ;;  %v760_v26 = vld [vmem:[#allocation2 + $0x20] sm:$0x1]  ;;  %v2527_v29 = vcombine.low %v821_v20, %v3810_v15  ;;  %v668_v34 = vsel %vm3756_vm6, %v552_v23, %v667_v8 }
  0xd0   : > { %662 = vst [vmem:[#allocation2 + $0x30] sm:$0xf] %v661_v21  ;;  %v730_v30 = vsel %vm3762_vm7, 0, %v729_v25  ;;  %v761_v31 = vsel %vm3794_vm8, 0, %v760_v26  ;;  %v1120_v32 = vld [vmem:[#allocation2 + $0x1c] sm:$0xf] }
  0xd1   : > { %v1142_v33 = vld [vmem:[#allocation2 + $0x18] sm:$0xe]  ;;  %663 = vst.msk [vmem:[#allocation2 + $0x34] sm:$0xf] %vm465_vm3, %v544_v27  ;;  %666 = vst [vmem:[#allocation2 + $0x38] sm:$0x1] %v665_v28 }
  0xd2   : > { %731 = vst [vmem:[#allocation2 + $0x18] sm:$0x1] %v730_v30  ;;  %762 = vst [vmem:[#allocation2 + $0x20] sm:$0x1] %v761_v31  ;;  %v3832_v35 = vld [vmem:[#allocation2 + $0x1c] sm:$0xf]  ;;  %v2563_v39 = vcombine.low %v1142_v33, %v1120_v32 }
  0xd3   : > { %v822_v36 = vld [vmem:[#allocation2 + $0x18] sm:$0xe]  ;;  %v555_v38 = vshrl.u32 %v435_v22, 16  ;;  %669 = vst [vmem:[#allocation2 + $0x3c] sm:$0xf] %v668_v34  ;;  %v1349_v44 = vrot.slane %v2562_v24, 1 }
  0xd4   : > { %v732_v40 = vld [vmem:[#allocation2 + $0x24] sm:$0x1]  ;;  %v763_v41 = vld [vmem:[#allocation2 + $0x2c] sm:$0x1]  ;;  %v803_v42 = vld [vmem:[#allocation2 + $0x28] sm:$0xf]  ;;  %v2528_v43 = vcombine.low %v822_v36, %v3832_v35 }
  0xd5   : > { %v733_v45 = vsel %vm3762_vm7, 0, %v732_v40  ;;  %v764_v46 = vsel %vm3794_vm8, 0, %v763_v41  ;;  %v823_v47 = vld [vmem:[#allocation2 + $0x24] sm:$0xe]  ;;  %v557_v48 = vrot.slane %v555_v38, 7  ;;  %v1033_v50 = vrot.slane %v2527_v29, 1 }
  0xd6   : > { %v671_v49 = vld [vmem:[#allocation2 + $0x44] sm:$0x1]  ;;  %734 = vst [vmem:[#allocation2 + $0x24] sm:$0x1] %v733_v45  ;;  %765 = vst [vmem:[#allocation2 + $0x2c] sm:$0x1] %v764_v46  ;;  %v2529_v51 = vcombine.low %v823_v47, %v803_v42 }
  0xd7   : > { %v1122_v52 = vld [vmem:[#allocation2 + $0x28] sm:$0xf]  ;;  %v1143_v53 = vld [vmem:[#allocation2 + $0x24] sm:$0xe]  ;;  %v558_v54 = vshll.u32 %v435_v22, 16  ;;  %v562_v56 = vrot.slane %v557_v48, 4 }
  0xd8   : > { %v3001_v55 = vld [vmem:[#allocation2 + $0x14] ss:$0 sps:$4 sm:$0x11]   ;;  %v1117_v57 = vld [vmem:[#allocation2 + $0xc] sm:$0xf]  ;;  %v1352_v58 = vrot.slane %v2563_v39, 1  ;;  %v2564_v4 = vcombine.low %v1143_v53, %v1122_v52 }
  0xd9   : > { %v1036_v59 = vrot.slane %v2528_v43, 1  ;;  %v560_v61 = vor.u32 %v558_v54, %v557_v48  ;;  %v1350_v62 = vrot.slane %v3001_v55, 1  ;;  %v3840_v63 = vcombine.low %v1117_v57, %v1118_v11  ;;  %v3842_v0 = vld [vmem:[#allocation2 + $0x14] ss:$0 sps:$4 sm:$0x11]   ;;  %s392_s29 = sadd.s32 32767, %s3822_s12 }
  0xda   : > { %v798_v1 = vld [vmem:[#allocation2 + $0xc] sm:$0xf]  ;;  %v1039_v3 = vrot.slane %v2529_v51, 1  ;;  %vm892_vm10 = vsmask.f32 7424  ;;  %v672_v8 = vsel %vm3762_vm7, %v562_v56, %v671_v49  ;;  %v1034_v11 = vrot.slane %v3842_v0, 1  ;;  %s3899_s11 = sadd.s32 %s392_s29, %s3789_s18 }
  0xdb   : > { %v1119_v5 = vld [vmem:[#allocation2 + $0x18] sm:$0xf]  ;;  %v561_v7 = vsel %vm3742_vm5, %v553_v37, %v560_v61  ;;  %v1351_v9 = vsel %vm1029_vm9, %v1349_v44, %v1350_v62  ;;  %v3007_v13 = vld [vmem:[#allocation2 + $0x20] ss:$0 sps:$4 sm:$0x11]   ;;  %s3334_s26 = smov 64   ;;  %v3860_v24 = vcombine.low %v798_v1, %v3810_v15 }
  0xdc   : > { %v800_v6 = vld [vmem:[#allocation2 + $0x18] sm:$0xf]  ;;  %v3851_v12 = vcombine.low %v1119_v5, %v1120_v32  ;;  %670 = vst.msk [vmem:[#allocation2 + $0x40] sm:$0xf] %vm465_vm3, %v561_v7  ;;  %673 = vst [vmem:[#allocation2 + $0x44] sm:$0x1] %v672_v8  ;;  %1373 = vrot.lane.b32.xlu1 %v1351_v9, %s3334_s26  ;;  %v1035_v20 = vsel %vm1029_vm9, %v1033_v50, %v1034_v11 }
  0xdd   : > { %v3013_v14 = vld [vmem:[#allocation2 + $0x20] ss:$0 sps:$4 sm:$0x11]   ;;  %v1214_v17 = vshrl.u32 %v3840_v63, 16  ;;  %v1216_v18 = vshll.u32 %v3840_v63, 16  ;;  %v1221_v19 = vshll.u32 %v3001_v55, 16  ;;  %1056 = vrot.lane.b32.xlu0 %v1035_v20, %s3334_s26  ;;  %v3866_v30 = vcombine.low %v800_v6, %v3832_v35 }
  0xde   : > { %v1353_v21 = vrot.slane %v3007_v13, 1  ;;  %v802_v22 = vld [vmem:[#allocation2 + $0x24] sm:$0xf]  ;;  %v1355_v23 = vrot.slane %v2564_v4, 1  ;;  %v1037_v26 = vrot.slane %v3013_v14, 1  ;;  %v1226_v32 = vshrl.u32 %v3851_v12, 16 }
  0xdf   : > { %v3862_v25 = vld [vmem:[#allocation2 + $0x2c] ss:$0 sps:$4 sm:$0x11]   ;;  %v1218_v27 = vrot.slane %v1216_v18, 1  ;;  %v1223_v28 = vrot.slane %v1221_v19, 1  ;;  %v1228_v33 = vshll.u32 %v3851_v12, 16  ;;  %v3871_v34 = vcombine.low %v802_v22, %v803_v42 }
  0xe0   : > { %v1354_v29 = vsel %vm1029_vm9, %v1352_v58, %v1353_v21  ;;  %v1121_v31 = vld [vmem:[#allocation2 + $0x24] sm:$0xf]  ;;  %v1040_v15 = vrot.slane %v3862_v25, 1  ;;  %v1038_v36 = vsel %vm1029_vm9, %v1036_v59, %v1037_v26  ;;  %v3875_v38 = vld [vmem:[#allocation2 + $0x2c] ss:$0 sps:$4 sm:$0x11]  }
  0xe1   : > { %1375 = vrot.lane.b32.xlu1 %v1354_v29, %s3334_s26  ;;  %v1219_v37 = vor.u32 %v1218_v27, %v1214_v17  ;;  %v735_v39 = vld [vmem:[#allocation2 + $0x30] sm:$0x1]  ;;  %v1230_v40 = vrot.slane %v1228_v33, 1  ;;  %v1233_v35 = vshll.u32 %v3007_v13, 16  ;;  %v766_v43 = vld [vmem:[#allocation2 + $0x38] sm:$0x1]  ;;  %v3881_v42 = vcombine.low %v1121_v31, %v1122_v52 }
  0xe2   : > { %v736_v41 = vsel %vm3762_vm7, 0, %v735_v39  ;;  %v918_v44 = vshrl.u32 %v3866_v30, 16  ;;  %v1041_v45 = vsel %vm1029_vm9, %v1039_v3, %v1040_v15  ;;  %v1356_v46 = vrot.slane %v3875_v38, 1  ;;  %v1124_v48 = vld [vmem:[#allocation2 + $0x34] sm:$0xf]  ;;  %s3903_s3 = sadd.s32 8, %s2509_s21 }
  0xe3   : > { %737 = vst [vmem:[#allocation2 + $0x30] sm:$0x1] %v736_v41  ;;  %v767_v47 = vsel %vm3794_vm8, 0, %v766_v43  ;;  %v1144_v49 = vld [vmem:[#allocation2 + $0x30] sm:$0xe]  ;;  %1060 = vrot.lane.b32.xlu0 %v1041_v45, %s3334_s26  ;;  %v1231_v50 = vor.u32 %v1230_v40, %v1226_v32  ;;  %v1235_v51 = vrot.slane %v1233_v35, 1  ;;  %v1224_v56 = vsel %vm892_vm10, %v1219_v37, %v1223_v28 }
  0xe4   : > { %768 = vst [vmem:[#allocation2 + $0x38] sm:$0x1] %v767_v47  ;;  %v2565_v53 = vcombine.low %v1144_v49, %v1124_v48  ;;  %v920_v54 = vshll.u32 %v3866_v30, 16  ;;  %v805_v52 = vld [vmem:[#allocation2 + $0x34] sm:$0xf]  ;;  %v1357_v57 = vsel %vm1029_vm9, %v1355_v23, %v1356_v46  ;;  %v925_v58 = vshll.u32 %v3013_v14, 16 }
  0xe5   : > { %v824_v55 = vld [vmem:[#allocation2 + $0x30] sm:$0xe]  ;;  %1058 = vrot.lane.b32.xlu1 %v1038_v36, %s3334_s26  ;;  %v738_v61 = vld [vmem:[#allocation2 + $0x3c] sm:$0x1]  ;;  %v769_v62 = vld [vmem:[#allocation2 + $0x44] sm:$0x1]  ;;  %v1236_v1 = vsel %vm892_vm10, %v1231_v50, %v1235_v51 }
  0xe6   : > { %v2530_v59 = vcombine.low %v824_v55, %v805_v52  ;;  %v922_v3 = vrot.slane %v920_v54, 1  ;;  %v930_v4 = vshrl.u32 %v3871_v34, 16  ;;  %v932_v5 = vshll.u32 %v3871_v34, 16  ;;  %v3894_v6 = vld [vmem:[#allocation2 + $0x40] sm:$0xf]  ;;  %s3335_s28 = smov 32  }
  0xe7   : > { %v1358_v7 = vrot.slane %v2565_v53, 1  ;;  %v927_v8 = vrot.slane %v925_v58, 1  ;;  %v937_v9 = vshll.u32 %v3862_v25, 16  ;;  %v739_v11 = vsel %vm3762_vm7, 0, %v738_v61  ;;  %v1145_v13 = vld [vmem:[#allocation2 + $0x3c] sm:$0xe]  ;;  %1309 = vrot.lane.b32.xlu0 %v1224_v56, %s3335_s28 }
  0xe8   : > { %v923_v14 = vor.u32 %v922_v3, %v918_v44  ;;  %v934_v17 = vrot.slane %v932_v5, 1  ;;  %740 = vst [vmem:[#allocation2 + $0x3c] sm:$0x1] %v739_v11  ;;  %v770_v18 = vsel %vm3794_vm8, 0, %v769_v62  ;;  %v2566_v19 = vcombine.low %v1145_v13, %v3894_v6  ;;  %s394_s22 = sand.u32 4294901760, %s3899_s11  ;;  %p407_p9 = scmp.le.s32.totalorder %s3903_s3, 31 }
  0xe9   : > { %1377 = vrot.lane.b32.xlu1 %v1357_v57, %s3334_s26  ;;  %v1042_v20 = vrot.slane %v2530_v59, 1  ;;  %v939_v21 = vrot.slane %v937_v9, 1  ;;  %771 = vst [vmem:[#allocation2 + $0x44] sm:$0x1] %v770_v18  ;;  %v906_v22 = vshrl.u32 %v3860_v24, 16  ;;  %v908_v23 = vshll.u32 %v3860_v24, 16 }
  0xea   : > { %v1123_v25 = vld [vmem:[#allocation2 + $0x30] sm:$0xf]  ;;  %v1361_v27 = vrot.slane %v2566_v19, 1  ;;  %v913_v28 = vshll.u32 %v3842_v0, 16  ;;  %v1238_v33 = vshrl.u32 %v3881_v42, 16  ;;  %v928_v15 = vsel %vm892_vm10, %v923_v14, %v927_v8  ;;  %s4797_s22 = smov (%p389_p7, %s394_s22), 2143289344 }
  0xeb   : > { %v804_v26 = vld [vmem:[#allocation2 + $0x30] sm:$0xf]  ;;  %v3920_v29 = vcombine.low %v1123_v25, %v1124_v48  ;;  %v3019_v31 = vld [vmem:[#allocation2 + $0x38] ss:$0 sps:$4 sm:$0x11]   ;;  %1311 = vrot.lane.b32.xlu0 %v1236_v1, %s3335_s28  ;;  %v935_v37 = vor.u32 %v934_v17, %v930_v4  ;;  %v910_v39 = vrot.slane %v908_v23, 1 }
  0xec   : > { %v3922_v32 = vcombine.low %v804_v26, %v805_v52  ;;  %v3022_v36 = vld [vmem:[#allocation2 + $0x38] ss:$0 sps:$4 sm:$0x11]   ;;  %v1359_v0 = vrot.slane %v3019_v31, 1  ;;  %v1257_v41 = vshll.u32 %v3019_v31, 16  ;;  %v915_v62 = vrot.slane %v913_v28, 1 }
  0xed   : > { %v1250_v40 = vshrl.u32 %v3920_v29, 16  ;;  %v1252_v35 = vshll.u32 %v3920_v29, 16  ;;  %v3929_v43 = vld [vmem:[#allocation2 + $0x40] sm:$0xf]  ;;  %v1043_v44 = vrot.slane %v3022_v36, 1  ;;  %v949_v47 = vshll.u32 %v3022_v36, 16 }
  0xee   : > { %v942_v45 = vshrl.u32 %v3922_v32, 16  ;;  %v944_v46 = vshll.u32 %v3922_v32, 16  ;;  %v1360_v48 = vsel %vm1029_vm9, %v1358_v7, %v1359_v0  ;;  %v1259_v51 = vrot.slane %v1257_v41, 1  ;;  %v436_v54 = vld [vmem:[%s3715_s9 + $0x28] sm:$0xf]  ;;  %s397_s21 = sshrl.u32 %s4797_s22, 16 }
  0xef   : > { %v1125_v49 = vld [vmem:[#allocation2 + $0x3c] sm:$0xf]  ;;  %v1254_v50 = vrot.slane %v1252_v35, 1  ;;  %1379 = vrot.lane.b32.xlu1 %v1360_v48, %s3334_s26  ;;  %993 = vrot.lane.b32.xlu0 %v928_v15, %s3335_s28  ;;  %v940_v52 = vsel %vm892_vm10, %v935_v37, %v939_v21  ;;  %v1044_v58 = vsel %vm1029_vm9, %v1042_v20, %v1043_v44  ;;  %v911_v61 = vor.u32 %v910_v39, %v906_v22  ;;  %s3956_s4 = scalar_select %p407_p9, 1, 0 }
  0xf0   : > { %v806_v53 = vld [vmem:[#allocation2 + $0x3c] sm:$0xf]  ;;  %v3025_v55 = vld [vmem:[#allocation2 + $0x44] ss:$0 sps:$4 sm:$0x11]   ;;  %v946_v56 = vrot.slane %v944_v46, 1  ;;  %v3950_v3 = vcombine.low %v1125_v49, %v3894_v6 }
  0xf1   : > { %v3944_v57 = vcombine.low %v806_v53, %v3929_v43  ;;  %v1255_v59 = vor.u32 %v1254_v50, %v1250_v40  ;;  %v3947_v1 = vld [vmem:[#allocation2 + $0x44] ss:$0 sps:$4 sm:$0x11]   ;;  %v1362_v4 = vrot.slane %v3025_v55, 1  ;;  %v951_v8 = vrot.slane %v949_v47, 1  ;;  %s398_s27 = sshll.u32 %s397_s21, 16  ;;  %s3981_s12 = scvt.s32.f32 %s3956_s4 }
  0xf2   : > { %v961_v9 = vshll.u32 %v3947_v1, 16  ;;  %v1240_v11 = vshll.u32 %v3881_v42, 16  ;;  %v1245_v13 = vshll.u32 %v3875_v38, 16  ;;  %v437_v14 = vld [vmem:[%s3715_s9 + $0x2c] sm:$0xf]  ;;  %v947_v17 = vor.u32 %v946_v56, %v942_v45  ;;  %s4753_s2 = sld [smem:[#allocation31_spill]]  ;;  %s399_s29 = sor.u32 %s398_s27, %s397_s21 }
  0xf3   : > { %v954_v5 = vshrl.u32 %v3944_v57, 16  ;;  %v956_v7 = vshll.u32 %v3944_v57, 16  ;;  %1062 = vrot.lane.b32.xlu1 %v1044_v58, %s3334_s26  ;;  %995 = vrot.lane.b32.xlu0 %v940_v52, %s3335_s28  ;;  %v1260_v6 = vsel %vm892_vm10, %v1255_v59, %v1259_v51  ;;  %v564_v19 = vshrl.u32 %v436_v54, 16  ;;  %v674_v25 = vld [vmem:[#allocation2 + $0x48] sm:$0xf]  ;;  %s412_s13 = sshrl.u32 %s3981_s12, 16  ;;  %p411_p6 = scmp.ne.f32.partialorder %s3981_s12, %s3981_s12 }
  0xf4   : > { %v1363_v20 = vsel %vm1029_vm9, %v1361_v27, %v1362_v4  ;;  %v963_v21 = vrot.slane %v961_v9, 1  ;;  %v1242_v22 = vrot.slane %v1240_v11, 1  ;;  %v567_v23 = vshll.u32 %v436_v54, 16  ;;  %v438_v15 = vld [vmem:[%s3715_s9 + $0x30] sm:$0xf]  ;;  %s2689_s3 = sshll.u32 %s4743_s7, 4 }
  0xf5   : > { %v958_v18 = vrot.slane %v956_v7, 1  ;;  %v566_v26 = vrot.slane %v564_v19, 7  ;;  %v572_v28 = vshrl.u32 %v437_v14, 16  ;;  %v575_v31 = vshll.u32 %v437_v14, 16  ;;  %v439_v45 = vld [vmem:[%s3715_s9 + $0x34] sm:$0xf] }
  0xf6   : > { %v1247_v36 = vrot.slane %v1245_v13, 1  ;;  %v1262_v37 = vshrl.u32 %v3950_v3, 16  ;;  %v1264_v39 = vshll.u32 %v3950_v3, 16  ;;  %v1269_v0 = vshll.u32 %v3025_v55, 16  ;;  %v678_v48 = vld [vmem:[#allocation2 + $0x50] sm:$0x1] }
  0xf7   : > { %v959_v38 = vor.u32 %v958_v18, %v954_v5  ;;  %1381 = vrot.lane.b32.xlu1 %v1363_v20, %s3334_s26  ;;  %1315 = vrot.lane.b32.xlu0 %v1260_v6, %s3335_s28  ;;  %v1243_v40 = vor.u32 %v1242_v22, %v1238_v33  ;;  %v569_v35 = vor.u32 %v567_v23, %v566_v26  ;;  %v570_v41 = vrot.slane %v566_v26, 4  ;;  %v383_v51 = vld [vmem:[%s325_s10] sm:$0xf]  ;;  %v384_v55 = vld [vmem:[%s325_s10 + $0x4] sm:$0xf]  ;;  %s4005_s10 = sand.u32 1, %s412_s13 }
  0xf8   : > { %v3065_v27 = vld [vmem:[%s4753_s2 + $0x30] sm:$0xff]   ;;  %v574_v44 = vrot.slane %v572_v28, 7  ;;  %v952_v46 = vsel %vm892_vm10, %v947_v17, %v951_v8  ;;  %v916_v47 = vsel %vm892_vm10, %v911_v61, %v915_v62  ;;  %v1266_v49 = vrot.slane %v1264_v39, 1  ;;  %v685_v17 = vld [vmem:[#allocation2 + $0x5c] sm:$0x1]  ;;  %s4761_s21 = sld [smem:[#allocation33_spill]] }
  0xf9   : > { %v1271_v50 = vrot.slane %v1269_v0, 1  ;;  %2732 = vmatprep.subr.bf16.mxu1 %v3065_v27  ;;  %v964_v33 = vsel %vm892_vm10, %v959_v38, %v963_v21  ;;  %v675_v52 = vsel %vm3756_vm6, %v569_v35, %v674_v25  ;;  %v440_v56 = vld [vmem:[%s3715_s9 + $0x38] sm:$0xf]  ;;  %v581_v59 = vshrl.u32 %v438_v15, 16  ;;  %v681_v14 = vld [vmem:[#allocation2 + $0x54] sm:$0xf] }
  0xfa   : > { %v577_v53 = vor.u32 %v575_v31, %v574_v44  ;;  %v579_v54 = vrot.slane %v574_v44, 4  ;;  %2733 = vmatpush3.bf16.msra.mxu1 %v3065_v27  ;;  %676 = vst [vmem:[#allocation2 + $0x48] sm:$0xf] %v675_v52  ;;  %v1267_v58 = vor.u32 %v1266_v49, %v1262_v37  ;;  %v584_v61 = vshll.u32 %v438_v15, 16  ;;  %p4763_p0 = scmp.ne.s32.totalorder %s4721_s16, 0 }
  0xfb   : > { %v589_v62 = vshrl.u32 %v439_v45, 16  ;;  %997 = vrot.lane.b32.xlu0 %v952_v46, %s3335_s28  ;;  %991 = vrot.lane.b32.xlu1 %v916_v47, %s3335_s28  ;;  %v1248_v4 = vsel %vm892_vm10, %v1243_v40, %v1247_v36  ;;  %v592_v8 = vshll.u32 %v439_v45, 16  ;;  %v583_v11 = vrot.slane %v581_v59, 7  ;;  %v441_v36 = vld [vmem:[%s3715_s9 + $0x3c] sm:$0xf]  ;;  %s414_s9 = sadd.s32 32767, %s4005_s10 }
  0xfc   : > { %v578_v5 = vsel %vm3742_vm5, %v570_v41, %v577_v53  ;;  %v679_v7 = vsel %vm3762_vm7, %v579_v54, %v678_v48  ;;  %v1272_v9 = vsel %vm892_vm10, %v1267_v58, %v1271_v50  ;;  %v400_v6 = vstv %s399_s29  ;;  %v468_v45 = vld [vmem:[#allocation2] sm:$0xf]  ;;  %v825_v58 = vld [vmem:[#allocation2 + $0x3c] sm:$0xe]  ;;  %s4029_s22 = sadd.s32 %s414_s9, %s3981_s12  ;;  %s4759_s9 = sld [smem:[#allocation32_spill]] }
  0xfd   : > { %677 = vst.msk [vmem:[#allocation2 + $0x4c] sm:$0xf] %vm465_vm3, %v578_v5  ;;  %680 = vst [vmem:[#allocation2 + $0x50] sm:$0x1] %v679_v7  ;;  %v591_v13 = vrot.slane %v589_v62, 7  ;;  %v402_v18 = vmul.bf16 %v400_v6, %v383_v51  ;;  %v403_v19 = vmul.bf16 %v400_v6, %v384_v55  ;;  %v598_v20 = vshrl.u32 %v440_v56, 16 }
  0xfe   : > { %v601_v21 = vshll.u32 %v440_v56, 16  ;;  %v586_v22 = vor.u32 %v584_v61, %v583_v11  ;;  %v587_v23 = vrot.slane %v583_v11, 4  ;;  %v606_v47 = vshrl.u32 %v441_v36, 16  ;;  %v475_v51 = vld [vmem:[#allocation2 + $0x8] sm:$0x1]  ;;  %v3066_v56 = vld [vmem:[%s4753_s2 + $0x38] sm:$0xff]   ;;  %s4762_s13 = smov %s4761_s21 }
  0xff   : > { %v594_v25 = vor.u32 %v592_v8, %v591_v13  ;;  %v596_v38 = vrot.slane %v591_v13, 4  ;;  %999 = vrot.lane.b32.xlu0 %v964_v33, %s3335_s28  ;;  %1313 = vrot.lane.b32.xlu1 %v1248_v4, %s3335_s28  ;;  %v446_v26 = vshrl.u32 %v402_v18, 16  ;;  %v449_v28 = vshll.u32 %v402_v18, 16  ;;  %v688_v33 = vld [vmem:[#allocation2 + $0x60] sm:$0xf]  ;;  %s416_s27 = sand.u32 4294901760, %s4029_s22 }
 0x100   : > { %v454_v31 = vshrl.u32 %v403_v19, 16  ;;  %v457_v15 = vshll.u32 %v403_v19, 16  ;;  %v682_v39 = vsel %vm3756_vm6, %v586_v22, %v681_v14  ;;  %v600_v27 = vrot.slane %v598_v20, 7  ;;  %v692_v11 = vld [vmem:[#allocation2 + $0x68] sm:$0x1]  ;;  %2734 = vmatprep.subr.bf16.mxu1 %v3066_v56  ;;  %v3067_v13 = vld [vmem:[%s4753_s2 + $0x40] sm:$0xff]  }
 0x101   : > { %v595_v37 = vsel %vm3742_vm5, %v587_v23, %v594_v25  ;;  %v686_v0 = vsel %vm3762_vm7, %v596_v38, %v685_v17  ;;  %v741_v40 = vld [vmem:[#allocation2 + $0x48] sm:$0x1]  ;;  %683 = vst [vmem:[#allocation2 + $0x54] sm:$0xf] %v682_v39  ;;  %v448_v35 = vrot.slane %v446_v26, 7  ;;  %v608_v62 = vrot.slane %v606_v47, 7  ;;  %2735 = vmatpush3.bf16.msra.mxu1 %v3066_v56 }
 0x102   : > { %684 = vst.msk [vmem:[#allocation2 + $0x58] sm:$0xf] %vm465_vm3, %v595_v37  ;;  %687 = vst [vmem:[#allocation2 + $0x5c] sm:$0x1] %v686_v0  ;;  %v456_v41 = vrot.slane %v454_v31, 7  ;;  %v742_v44 = vsel %vm3762_vm7, 0, %v741_v40  ;;  %v603_v46 = vor.u32 %v601_v21, %v600_v27  ;;  %v2531_v19 = vcombine.low %v825_v58, %v3929_v43  ;;  %2736 = vmatprep.subr.bf16.mxu1 %v3067_v13 }
 0x103   : > { %743 = vst [vmem:[#allocation2 + $0x48] sm:$0x1] %v742_v44  ;;  %1317 = vrot.lane.b32.xlu1 %v1272_v9, %s3335_s28  ;;  %v451_v49 = vor.u32 %v449_v28, %v448_v35  ;;  %v1146_v54 = vld [vmem:[#allocation2 + $0x48] sm:$0xe]  ;;  %v452_v52 = vrot.slane %v448_v35, 4  ;;  %v604_v61 = vrot.slane %v600_v27, 4 }
 0x104   : > { %v772_v48 = vld [vmem:[#allocation2 + $0x50] sm:$0x1]  ;;  %v459_v50 = vor.u32 %v457_v15, %v456_v41  ;;  %v461_v55 = vrot.slane %v456_v41, 4  ;;  %v609_v4 = vshll.u32 %v441_v36, 16  ;;  %v1128_v5 = vld [vmem:[#allocation2 + $0x4c] sm:$0xf]  ;;  %v689_v9 = vsel %vm3756_vm6, %v603_v46, %v688_v33 }
 0x105   : > { %v773_v53 = vsel %vm3794_vm8, 0, %v772_v48  ;;  %v469_v59 = vsel %vm3756_vm6, %v451_v49, %v468_v45  ;;  %v2567_v14 = vcombine.low %v1146_v54, %v1128_v5  ;;  %v4040_v6 = vld [vmem:[#allocation2 + $0x4c] sm:$0xf]  ;;  %v613_v18 = vrot.slane %v608_v62, 4  ;;  %690 = vst [vmem:[#allocation2 + $0x60] sm:$0xf] %v689_v9  ;;  %2737 = vmatpush3.bf16.msra.mxu1 %v3067_v13 }
 0x106   : > { %774 = vst [vmem:[#allocation2 + $0x50] sm:$0x1] %v773_v53  ;;  %v460_v7 = vsel %vm3742_vm5, %v452_v52, %v459_v50  ;;  %470 = vst [vmem:[#allocation2] sm:$0xf] %v469_v59  ;;  %v476_v8 = vsel %vm3762_vm7, %v461_v55, %v475_v51  ;;  %v611_v17 = vor.u32 %v609_v4, %v608_v62  ;;  %v3068_v22 = vld [vmem:[%s4753_s2 + $0x48] sm:$0xff]   ;;  %s4799_s27 = smov (%p411_p6, %s416_s27), 2143289344 }
 0x107   : > { %472 = vst.msk [vmem:[#allocation2 + $0x4] sm:$0xf] %vm465_vm3, %v460_v7  ;;  %477 = vst [vmem:[#allocation2 + $0x8] sm:$0x1] %v476_v8  ;;  %v693_v43 = vsel %vm3762_vm7, %v613_v18, %v692_v11  ;;  %v1364_v15 = vrot.slane %v2567_v14, 1  ;;  %2738 = vmatprep.subr.bf16.mxu1 %v3068_v22  ;;  %v3069_v0 = vld [vmem:[%s4753_s2 + $0x50] sm:$0xff]  }
 0x108   : > { %v744_v20 = vld [vmem:[#allocation2 + $0x54] sm:$0x1]  ;;  %v612_v38 = vsel %vm3742_vm5, %v604_v61, %v611_v17  ;;  %694 = vst [vmem:[#allocation2 + $0x68] sm:$0x1] %v693_v43  ;;  %v826_v39 = vld [vmem:[#allocation2 + $0x48] sm:$0xe] }
 0x109   : > { %v775_v21 = vld [vmem:[#allocation2 + $0x5c] sm:$0x1]  ;;  %v745_v23 = vsel %vm3762_vm7, 0, %v744_v20  ;;  %691 = vst.msk [vmem:[#allocation2 + $0x64] sm:$0xf] %vm465_vm3, %v612_v38  ;;  %v1045_v35 = vrot.slane %v2531_v19, 1  ;;  %2739 = vmatpush3.bf16.msra.mxu1 %v3068_v22  ;;  %v2532_v7 = vcombine.low %v826_v39, %v4040_v6 }
 0x10a   : > { %v776_v25 = vsel %vm3794_vm8, 0, %v775_v21  ;;  %v1127_v26 = vld [vmem:[#allocation2 + $0x48] sm:$0xf]  ;;  %746 = vst [vmem:[#allocation2 + $0x54] sm:$0x1] %v745_v23  ;;  %v1046_v46 = vrot.slane %v3947_v1, 1  ;;  %2740 = vmatprep.subr.bf16.mxu1 %v3069_v0 }
 0x10b   : > { %v808_v28 = vld [vmem:[#allocation2 + $0x48] sm:$0xf]  ;;  %777 = vst [vmem:[#allocation2 + $0x5c] sm:$0x1] %v776_v25  ;;  %v4059_v31 = vcombine.low %v1127_v26, %v1128_v5  ;;  %v4075_v44 = vld [vmem:[#allocation2 + $0x58] sm:$0xf] }
 0x10c   : > { %v4062_v36 = vcombine.low %v808_v28, %v4040_v6  ;;  %v1734_v53 = vld [vmem:[#allocation2 + $0x18] sm:$0xf]  ;;  %v4081_v54 = vld [vmem:[#allocation2 + $0x1c] sm:$0xf]  ;;  %s419_s12 = sshrl.u32 %s4799_s27, 16  ;;  %v1047_v17 = vsel %vm1029_vm9, %v1045_v35, %v1046_v46  ;;  %v4115_v38 = vrot.slane %v2532_v7, 1 }
 0x10d   : > { %v3030_v37 = vld [vmem:[#allocation2 + $0x50] ss:$0 sps:$4 sm:$0x11]   ;;  %v1274_v27 = vshrl.u32 %v4059_v31, 16  ;;  %v1276_v40 = vshll.u32 %v4059_v31, 16  ;;  %v3070_v61 = vld [vmem:[%s4753_s2 + $0x58] sm:$0xff]   ;;  %2741 = vmatpush3.bf16.msra.mxu1 %v3069_v0  ;;  %v4109_v22 = vcombine.low %v1734_v53, %v4081_v54 }
 0x10e   : > { %v968_v41 = vshll.u32 %v4062_v36, 16  ;;  %v1281_v45 = vshll.u32 %v3030_v37, 16  ;;  %v1365_v47 = vrot.slane %v3030_v37, 1  ;;  %v4078_v48 = vld [vmem:[#allocation2 + $0x50] ss:$0 sps:$4 sm:$0x11]   ;;  %2742 = vmatprep.subr.bf16.mxu1 %v3070_v61 }
 0x10f   : > { %v1278_v49 = vrot.slane %v1276_v40, 1  ;;  %v966_v50 = vshrl.u32 %v4062_v36, 16  ;;  %v754_v33 = vld [vmem:[#allocation2 + $0x8] sm:$0x1]  ;;  %v973_v56 = vshll.u32 %v4078_v48, 16  ;;  %s4113_s11 = sshll.u32 %s419_s12, 16 }
 0x110   : > { %v970_v51 = vrot.slane %v968_v41, 1  ;;  %v1283_v52 = vrot.slane %v1281_v45, 1  ;;  %v1366_v55 = vsel %vm1029_vm9, %v1364_v15, %v1365_v47  ;;  %v755_v1 = vsel %vm3794_vm8, 0, %v754_v33  ;;  %v820_v58 = vld [vmem:[#allocation2] sm:$0xe]  ;;  %s4145_s4 = sor.u32 %s4113_s11, %s419_s12  ;;  %s4519_s11 = scalar_lea.vmem [#allocation9], %s2505_s8 }
 0x111   : > { %v4088_v59 = vld [vmem:[#allocation2 + $0x58] sm:$0xf]  ;;  %v1279_v62 = vor.u32 %v1278_v49, %v1274_v27  ;;  %1383 = vrot.lane.b32.xlu1 %v1366_v55, %s3334_s26  ;;  %v1129_v4 = vld [vmem:[#allocation2 + $0x54] sm:$0xf]  ;;  %756 = vst [vmem:[#allocation2 + $0x8] sm:$0x1] %v755_v1  ;;  %2743 = vmatpush3.bf16.msra.mxu1 %v3070_v61 }
 0x112   : > { %v723_v5 = vld [vmem:[#allocation2] sm:$0x1]  ;;  %v4096_v8 = vcombine.low %v1129_v4, %v4075_v44  ;;  %v4098_v9 = vld [vmem:[#allocation2 + $0x5c] ss:$0 sps:$4 sm:$0x11]   ;;  %v971_v23 = vor.u32 %v970_v51, %v966_v50  ;;  %v975_v25 = vrot.slane %v973_v56, 1 }
 0x113   : > { %v797_v11 = vld [vmem:[#allocation2 + $0x4] sm:$0xf]  ;;  %v724_v13 = vsel %vm3762_vm7, 0, %v723_v5  ;;  %v1284_v14 = vsel %vm892_vm10, %v1279_v62, %v1283_v52  ;;  %v810_v19 = vld [vmem:[#allocation2 + $0x54] sm:$0xf]  ;;  %v1293_v21 = vshll.u32 %v4098_v9, 16 }
 0x114   : > { %v2526_v18 = vcombine.low %v820_v58, %v797_v11  ;;  %725 = vst [vmem:[#allocation2] sm:$0x1] %v724_v13  ;;  %1319 = vrot.lane.b32.xlu0 %v1284_v14, %s3335_s28  ;;  %v1286_v6 = vshrl.u32 %v4096_v8, 16  ;;  %v1288_v20 = vshll.u32 %v4096_v8, 16  ;;  %v4118_v43 = vcombine.low %v810_v19, %v4088_v59  ;;  %v747_v26 = vld [vmem:[#allocation2 + $0x60] sm:$0x1] }
 0x115   : > { %v778_v28 = vld [vmem:[#allocation2 + $0x68] sm:$0x1]  ;;  %v1295_v37 = vrot.slane %v1293_v21, 1  ;;  %v1147_v39 = vld [vmem:[#allocation2 + $0x54] sm:$0xe]  ;;  %v748_v0 = vsel %vm3762_vm7, 0, %v747_v26  ;;  %v976_v53 = vsel %vm892_vm10, %v971_v23, %v975_v25 }
 0x116   : > { %4754 = vst [vmem:[#allocation26_spill] sm:$0xff] %v4118_v43  ;;  %v1290_v15 = vrot.slane %v1288_v20, 1  ;;  %v1736_v40 = vld [vmem:[#allocation2 + $0x24] sm:$0xf]  ;;  %v4123_v35 = vld [vmem:[#allocation2 + $0x28] sm:$0xf]  ;;  %v2568_v52 = vcombine.low %v1147_v39, %v4075_v44 }
 0x117   : > { %v1030_v41 = vrot.slane %v2526_v18, 1  ;;  %v4125_v45 = vld [vmem:[#allocation2 + $0x5c] ss:$0 sps:$4 sm:$0x11]   ;;  %749 = vst [vmem:[#allocation2 + $0x60] sm:$0x1] %v748_v0 }
 0x118   : > { %v779_v46 = vsel %vm3794_vm8, 0, %v778_v28  ;;  %v4129_v47 = vld [vmem:[#allocation2 + $0x4c] sm:$0xf]  ;;  %v3071_v49 = vld [vmem:[%s4753_s2] sm:$0xff]   ;;  %1064 = vrot.lane.b32.xlu0 %v1047_v17, %s3334_s26  ;;  %v1291_v50 = vor.u32 %v1290_v15, %v1286_v6  ;;  %v980_v33 = vshll.u32 %v4118_v43, 16  ;;  %v1049_v4 = vrot.slane %v4078_v48, 1 }
 0x119   : > { %v3036_v51 = vld [vmem:[#allocation2 + $0x8] ss:$0 sps:$4 sm:$0x11]   ;;  %780 = vst [vmem:[#allocation2 + $0x68] sm:$0x1] %v779_v46  ;;  %2760 = vmatprep.subr.bf16.mxu0 %v3071_v49  ;;  %v985_v13 = vshll.u32 %v4125_v45, 16  ;;  %v4155_v17 = vcombine.low %v1736_v40, %v4123_v35 }
 0x11a   : > { %v827_v55 = vld [vmem:[#allocation2 + $0x54] sm:$0xe]  ;;  %v1742_v56 = vld [vmem:[#allocation2 + $0x48] sm:$0xf]  ;;  %v1296_v1 = vsel %vm892_vm10, %v1291_v50, %v1295_v37  ;;  %v1031_v58 = vrot.slane %v3036_v51, 1  ;;  %v901_v62 = vshll.u32 %v3036_v51, 16  ;;  %2761 = vmatpush3.bf16.msra.mxu0 %v3071_v49  ;;  %v422_v37 = vstv %s4145_s4 }
 0x11b   : > { %v796_v61 = vld [vmem:[#allocation2] sm:$0xf]  ;;  %v4140_v5 = vld [vmem:[#allocation2 + $0x58] sm:$0xf]  ;;  %v3072_v44 = vld [vmem:[%s4753_s2 + $0x8] sm:$0xff]   ;;  %1321 = vrot.lane.b32.xlu1 %v1296_v1, %s3335_s28  ;;  %v982_v6 = vrot.slane %v980_v33, 1  ;;  %v4164_v20 = vcombine.low %v1742_v56, %v4129_v47  ;;  %v2533_v46 = vcombine.low %v827_v55, %v4088_v59  ;;  %v1050_v51 = vsel %vm1029_vm9, %v4115_v38, %v1049_v4 }
 0x11c   : > { %v4151_v7 = vcombine.low %v796_v61, %v797_v11  ;;  %v1132_v14 = vld [vmem:[#allocation2 + $0x64] sm:$0xf]  ;;  %v1148_v48 = vld [vmem:[#allocation2 + $0x60] sm:$0xe]  ;;  %v3073_v18 = vld [vmem:[%s4753_s2 + $0x10] sm:$0xff]   ;;  %1001 = vrot.lane.b32.xlu0 %v976_v53, %s3335_s28  ;;  %v1032_v19 = vsel %vm1029_vm9, %v1030_v41, %v1031_v58  ;;  %v978_v11 = vshrl.u32 %v4118_v43, 16  ;;  %2762 = vmatprep.subr.bf16.mxu0 %v3072_v44 }
 0x11d   : > { %v1744_v21 = vld [vmem:[#allocation2 + $0x54] sm:$0xf]  ;;  %v4168_v26 = vld [vmem:[#allocation2 + $0x50] ss:$0 sps:$4 sm:$0x11]   ;;  %v1833_v28 = vshll.u32 %v4109_v22, 16  ;;  %v2569_v55 = vcombine.low %v1148_v48, %v1132_v14 }
 0x11e   : > { %v894_v23 = vshrl.u32 %v4151_v7, 16  ;;  %v896_v25 = vshll.u32 %v4151_v7, 16  ;;  %v404_v15 = vld [vmem:[%s334_s14] sm:$0xf]  ;;  %v903_v39 = vrot.slane %v901_v62, 1  ;;  %v1367_v0 = vrot.slane %v2568_v52, 1  ;;  %2763 = vmatpush3.bf16.msra.mxu0 %v3072_v44 }
 0x11f   : > { %v1368_v40 = vrot.slane %v4098_v9, 1  ;;  %v1131_v41 = vld [vmem:[#allocation2 + $0x60] sm:$0xf]  ;;  %v3074_v49 = vld [vmem:[%s4753_s2 + $0x18] sm:$0xff]   ;;  %1054 = vrot.lane.b32.xlu1 %v1032_v19, %s3334_s26  ;;  %v4185_v9 = vcombine.low %v1744_v21, %v4140_v5  ;;  %2764 = vmatprep.subr.bf16.mxu0 %v3073_v18  ;;  %v983_v59 = vor.u32 %v982_v6, %v978_v11  ;;  %v987_v52 = vrot.slane %v985_v13, 1  ;;  %s4760_s8 = sld [smem:[#allocation17_spill]] }
 0x120   : > { %v898_v50 = vrot.slane %v896_v25, 1  ;;  %v4182_v33 = vcombine.low %v1131_v41, %v1132_v14  ;;  %v3041_v53 = vld [vmem:[#allocation2 + $0x68] ss:$0 sps:$4 sm:$0x11]   ;;  %v1881_v56 = vshll.u32 %v4164_v20, 16  ;;  %v1051_v4 = vrot.slane %v2533_v46, 1 }
 0x121   : > { %4755 = vst [vmem:[#allocation27_spill] sm:$0xff] %v4185_v9  ;;  %v1305_v62 = vshll.u32 %v3041_v53, 16  ;;  %v4190_v38 = vld [vmem:[#allocation2 + $0x20] ss:$0 sps:$4 sm:$0x11]   ;;  %v1879_v44 = vshrl.u32 %v4164_v20, 16  ;;  %v4196_v21 = vmul.bf16 %v422_v37, %v404_v15  ;;  %v1369_v48 = vsel %vm1029_vm9, %v1367_v0, %v1368_v40 }
 0x122   : > { %v899_v1 = vor.u32 %v898_v50, %v894_v23  ;;  %v1298_v58 = vshrl.u32 %v4182_v33, 16  ;;  %v1300_v61 = vshll.u32 %v4182_v33, 16  ;;  %v1886_v19 = vshll.u32 %v4168_v26, 16  ;;  %2765 = vmatpush3.bf16.msra.mxu0 %v3073_v18  ;;  %v4201_v13 = vld [vmem:[%s4753_s2 + $0x60] sm:$0xff]   ;;  %v4214_v46 = vld [vmem:[#allocation2 + $0x18] sm:$0xe] }
 0x123   : > { %1066 = vrot.lane.b32.xlu1 %v1050_v51, %s3334_s26  ;;  %v4206_v6 = vld [vmem:[#allocation2 + $0x5c] ss:$0 sps:$4 sm:$0x11]   ;;  %v1893_v23 = vshll.u32 %v4185_v9, 16  ;;  %2766 = vmatprep.subr.bf16.mxu0 %v3074_v49  ;;  %v3075_v18 = vld [vmem:[%s4753_s2 + $0x20] sm:$0xff]   ;;  %v1370_v25 = vrot.slane %v2569_v55, 1  ;;  %v988_v40 = vsel %vm892_vm10, %v983_v59, %v987_v52 }
 0x124   : > { %v904_v14 = vsel %vm892_vm10, %v899_v1, %v903_v39  ;;  %v1302_v11 = vrot.slane %v1300_v61, 1  ;;  %v1371_v15 = vrot.slane %v3041_v53, 1  ;;  %v1052_v39 = vrot.slane %v4125_v45, 1  ;;  %v4216_v0 = vld [vmem:[#allocation2 + $0x24] sm:$0xe]  ;;  %2816 = vmatprep.subr.bf16.mxu1 %v4201_v13  ;;  %v3076_v59 = vld [vmem:[%s4753_s2 + $0x28] sm:$0xff]  }
 0x125   : > { %989 = vrot.lane.b32.xlu0 %v904_v14, %s3335_s28  ;;  %v1883_v41 = vrot.slane %v1881_v56, 1  ;;  %v1307_v51 = vrot.slane %v1305_v62, 1  ;;  %v1835_v1 = vrot.slane %v1833_v28, 1  ;;  %v4220_v61 = vld [vmem:[#allocation2 + $0x2c] ss:$0 sps:$4 sm:$0x11]  }
 0x126   : > { %v1303_v50 = vor.u32 %v1302_v11, %v1298_v58  ;;  %v1762_v27 = vld [vmem:[#allocation2 + $0x48] sm:$0xe]  ;;  %v405_v53 = vld [vmem:[%s334_s14 + $0x4] sm:$0xf]  ;;  %v1888_v55 = vrot.slane %v1886_v19, 1  ;;  %v1838_v45 = vshll.u32 %v4190_v38, 16  ;;  %2767 = vmatpush3.bf16.msra.mxu0 %v3074_v49  ;;  %v1372_v58 = vsel %vm1029_vm9, %v1370_v25, %v1371_v15 }
 0x127   : > { %v1891_v56 = vshrl.u32 %v4185_v9, 16  ;;  %v1845_v14 = vshll.u32 %v4155_v17, 16  ;;  %1385 = vrot.lane.b32.xlu1 %v1369_v48, %s3334_s26  ;;  %v1895_v28 = vrot.slane %v1893_v23, 1  ;;  %v1898_v52 = vshll.u32 %v4206_v6, 16  ;;  %2768 = vmatprep.subr.bf16.mxu0 %v3075_v18  ;;  %v1746_v19 = vld [vmem:[#allocation2 + $0x60] sm:$0xf] }
 0x128   : > { %v1884_v62 = vor.u32 %v1883_v41, %v1879_v44  ;;  %v425_v11 = vmul.bf16 %v422_v37, %v405_v53  ;;  %v1308_v49 = vsel %vm892_vm10, %v1303_v50, %v1307_v51  ;;  %v2630_v43 = vcombine.low %v1762_v27, %v4129_v47  ;;  %v4242_v23 = vld [vmem:[#allocation2 + $0x64] sm:$0xf]  ;;  %v1763_v41 = vld [vmem:[#allocation2 + $0x54] sm:$0xe]  ;;  %v1738_v37 = vld [vmem:[#allocation2 + $0x30] sm:$0xf] }
 0x129   : > { %1003 = vrot.lane.b32.xlu0 %v988_v40, %s3335_s28  ;;  %v2626_v9 = vcombine.low %v4214_v46, %v4081_v54  ;;  %v2627_v48 = vcombine.low %v4216_v0, %v4123_v35  ;;  %v1053_v40 = vsel %vm1029_vm9, %v1051_v4, %v1052_v39  ;;  %v4756_v25 = vshrl.u32 %v4109_v22, 16  ;;  %v4247_v53 = vld [vmem:[#allocation2 + $0x34] sm:$0xf]  ;;  %v716_v51 = vld [vmem:[#allocation2 + $0x6c] sm:$0xf]  ;;  %s2668_s22 = sshll.u32 %s4760_s8, 6 }
 0x12a   : > { %v1840_v15 = vrot.slane %v1838_v45, 1  ;;  %v696_v27 = vshrl.u32 %v4196_v21, 16  ;;  %2769 = vmatpush3.bf16.msra.mxu0 %v3075_v18  ;;  %v1896_v54 = vor.u32 %v1895_v28, %v1891_v56  ;;  %v1900_v47 = vrot.slane %v1898_v52, 1  ;;  %v720_v28 = vld [vmem:[#allocation2 + $0x74] sm:$0x1]  ;;  %s2336_s7 = sadd.s32 %s2689_s3, %s2668_s22  ;;  %s2339_s14 = sshll.u32 %s4519_s11, 4  ;;  %s4575_s14 = int_to_ptr.vmem [resolvable:$true] %s2339_s14 }
 0x12b   : > { %v1836_v44 = vor.u32 %v1835_v1, %v4756_v25  ;;  %1387 = vrot.lane.b32.xlu1 %v1372_v58, %s3334_s26  ;;  %v1850_v35 = vshll.u32 %v4220_v61, 16  ;;  %v699_v46 = vshll.u32 %v4196_v21, 16  ;;  %2770 = vmatprep.subr.bf16.mxu0 %v3076_v59  ;;  %v1889_v4 = vsel %vm892_vm10, %v1884_v62, %v1888_v55  ;;  %v4260_v21 = vld [vmem:[#allocation2 + $0x68] ss:$0 sps:$4 sm:$0x11]   ;;  %s2669_s17 = sshll.u32 %s2336_s7, 6 }
 0x12c   : > { %v4256_v39 = vcombine.low %v1746_v19, %v4242_v23  ;;  %v698_v0 = vrot.slane %v696_v27, 7  ;;  %v704_v50 = vshrl.u32 %v425_v11, 16  ;;  %v1843_v18 = vshrl.u32 %v4155_v17, 16  ;;  %v1740_v55 = vld [vmem:[#allocation2 + $0x3c] sm:$0xf]  ;;  %s4571_s30 = scalar_lea.hbm %s4761_s21, %s2669_s17  ;;  %s2323_s27 = scalar_lea.sflag [#allocation5], %s3709_s5 }
 0x12d   : > { %1323 = vrot.lane.b32.xlu0 %v1308_v49, %s3335_s28  ;;  %v1847_v1 = vrot.slane %v1845_v14, 1  ;;  %v1978_v45 = vrot.slane %v2630_v43, 1  ;;  %v707_v56 = vshll.u32 %v425_v11, 16  ;;  %v2631_v52 = vcombine.low %v1763_v41, %v4140_v5  ;;  %v4262_v62 = vld [vmem:[#allocation2 + $0x40] sm:$0xf]  ;;  %s3173_s18 = scalar_lea.vmem %s4575_s14, 1024 }
 0x12e   : > { %v701_v58 = vor.u32 %v699_v46, %v698_v0  ;;  %v702_v49 = vrot.slane %v698_v0, 4  ;;  %v706_v25 = vrot.slane %v704_v50, 7  ;;  %2771 = vmatpush3.bf16.msra.mxu0 %v3076_v59  ;;  %v1901_v19 = vsel %vm892_vm10, %v1896_v54, %v1900_v47  ;;  %v4270_v5 = vld [vmem:[#allocation2 + $0x38] ss:$0 sps:$4 sm:$0x11]   ;;  %p3174_p4 = scmp.ne.s32.totalorder %s4575_s14, %s3173_s18  ;;  %s3336_s29 = smov [#allocation9]  }
 0x12f   : > { %1934 = vrot.lane.b32.xlu1 %v1889_v4, %s3335_s28  ;;  %v1852_v27 = vrot.slane %v1850_v35, 1  ;;  %v1979_v43 = vrot.slane %v4168_v26, 1  ;;  %v4268_v14 = vcombine.low %v1738_v37, %v4247_v53  ;;  %2788 = vmatprep.subr.bf16.mxu0 %v4201_v13  ;;  %v1905_v11 = vshll.u32 %v4256_v39, 16  ;;  %s3177_s12 = sshll.u32 %s3336_s29, 4  ;;  %s3178_s12 = int_to_ptr.vmem [resolvable:$false] %s3177_s12 }
 0x130   : > { %v709_v41 = vor.u32 %v707_v56, %v706_v25  ;;  %v711_v59 = vrot.slane %v706_v25, 4  ;;  %v717_v46 = vsel %vm3756_vm6, %v701_v58, %v716_v51  ;;  %v1841_v54 = vsel %vm892_vm10, %v1836_v44, %v1840_v15  ;;  %p3175_p12 = pnand %p3174_p4, %p4763_p0  ;;  %s3179_s10 = scalar_lea.vmem %s3178_s12, 2048 }
 0x131   : > { %1068 = vrot.lane.b32.xlu0 %v1053_v40, %s3334_s26  ;;  %v1848_v47 = vor.u32 %v1847_v1, %v1843_v18  ;;  %v1966_v26 = vrot.slane %v2626_v9, 1  ;;  %v1967_v37 = vrot.slane %v4190_v38, 1  ;;  %718 = vst [vmem:[#allocation2 + $0x6c] sm:$0xf] %v717_v46  ;;  %v1981_v35 = vrot.slane %v2631_v52, 1  ;;  %p3180_p2 = scmp.lt.s32.totalorder %s4575_s14, %s3178_s12  ;;  %p3181_p1 = scmp.lt.s32.totalorder %s3179_s10, %s3173_s18 }
 0x132   : > { %v1982_v4 = vrot.slane %v4206_v6, 1  ;;  %v710_v40 = vsel %vm3742_vm5, %v702_v49, %v709_v41  ;;  %v721_v0 = vsel %vm3762_vm7, %v711_v59, %v720_v28  ;;  %v1980_v10 = vsel %vm1029_vm9, %v1978_v45, %v1979_v43  ;;  %v4298_v18 = vld [vmem:[#allocation2 + $0x44] ss:$0 sps:$4 sm:$0x11]   ;;  %p3176_p11 = pneg %p3175_p12 }
 0x133   : > { %1936 = vrot.lane.b32.xlu1 %v1901_v19, %s3335_s28  ;;  %v1969_v50 = vrot.slane %v2627_v48, 1  ;;  %v1970_v44 = vrot.slane %v4220_v61, 1  ;;  %719 = vst.msk [vmem:[#allocation2 + $0x70] sm:$0xf] %vm465_vm3, %v710_v40  ;;  %722 = vst [vmem:[#allocation2 + $0x74] sm:$0x1] %v721_v0  ;;  %v4289_v9 = vcombine.low %v1740_v55, %v4262_v62  ;;  %v1853_v51 = vsel %vm892_vm10, %v1848_v47, %v1852_v27  ;;  %p3182_p5 = por %p3181_p1, %p3180_p2 }
 0x134   : > { %v1903_v2 = vshrl.u32 %v4256_v39, 16  ;;  %v1907_v38 = vrot.slane %v1905_v11, 1  ;;  %v1910_v6 = vshll.u32 %v4260_v21, 16  ;;  %v1855_v15 = vshrl.u32 %v4268_v14, 16 }
 0x135   : > { %1926 = vrot.lane.b32.xlu0 %v1841_v54, %s3335_s28  ;;  %v1857_v48 = vshll.u32 %v4268_v14, 16  ;;  %v1862_v61 = vshll.u32 %v4270_v5, 16  ;;  %v1983_v1 = vsel %vm1029_vm9, %v1981_v35, %v1982_v4  ;;  %v1869_v52 = vshll.u32 %v4289_v9, 16  ;;  %v1760_v54 = vld [vmem:[#allocation2 + $0x30] sm:$0xe]  ;;  %p3183_p8 = pnand %p3182_p5, %p3176_p11 }
 0x136   : > { %v1908_v45 = vor.u32 %v1907_v38, %v1903_v2  ;;  %v1912_v56 = vrot.slane %v1910_v6, 1  ;;  %v1968_v58 = vsel %vm1029_vm9, %v1966_v26, %v1967_v37  ;;  %v1867_v43 = vshrl.u32 %v4289_v9, 16  ;;  %v1764_v4 = vld [vmem:[#allocation2 + $0x60] sm:$0xe] }
 0x137   : > { %1998 = vrot.lane.b32.xlu1 %v1980_v10, %s3334_s26  ;;  %v1859_v49 = vrot.slane %v1857_v48, 1  ;;  %v1871_v11 = vrot.slane %v1869_v52, 1  ;;  %v1874_v41 = vshll.u32 %v4298_v18, 16  ;;  %v1971_v16 = vsel %vm1029_vm9, %v1969_v50, %v1970_v44  ;;  %v1761_v10 = vld [vmem:[#allocation2 + $0x3c] sm:$0xe] }
 0x138   : > { %v750_v28 = vld [vmem:[#allocation2 + $0x6c] sm:$0x1]  ;;  %v1913_v27 = vsel %vm892_vm10, %v1908_v45, %v1912_v56  ;;  %v1864_v46 = vrot.slane %v1862_v61, 1  ;;  %v2628_v40 = vcombine.low %v1760_v54, %v4247_v53  ;;  %v2632_v6 = vcombine.low %v1764_v4, %v4242_v23  ;;  %v1765_v61 = vld [vmem:[#allocation2 + $0x6c] sm:$0xe] }
 0x139   : > { %1928 = vrot.lane.b32.xlu0 %v1853_v51, %s3335_s28  ;;  %v751_v25 = vsel %vm3762_vm7, 0, %v750_v28  ;;  %v1860_v59 = vor.u32 %v1859_v49, %v1855_v15  ;;  %v1872_v60 = vor.u32 %v1871_v11, %v1867_v43  ;;  %v1876_v26 = vrot.slane %v1874_v41, 1 }
 0x13a   : > { %752 = vst [vmem:[#allocation2 + $0x6c] sm:$0x1] %v751_v25  ;;  %v781_v55 = vld [vmem:[#allocation2 + $0x74] sm:$0x1]  ;;  %v1749_v47 = vld [vmem:[#allocation2 + $0x70] sm:$0xf]  ;;  %v2629_v53 = vcombine.low %v1761_v10, %v4262_v62 }
 0x13b   : > { %2000 = vrot.lane.b32.xlu1 %v1983_v1, %s3334_s26  ;;  %v782_v19 = vsel %vm3794_vm8, 0, %v781_v55  ;;  %v1865_v37 = vsel %vm892_vm10, %v1860_v59, %v1864_v46  ;;  %v1877_v38 = vsel %vm892_vm10, %v1872_v60, %v1876_v26  ;;  %v1972_v51 = vrot.slane %v2628_v40, 1  ;;  %v4365_v40 = vld [vmem:[%s4753_s2 + $0x70] sm:$0xff]   ;;  %v4374_v10 = vld [vmem:[%s4753_s2 + $0x78] sm:$0xff]  }
 0x13c   : > { %783 = vst [vmem:[#allocation2 + $0x74] sm:$0x1] %v782_v19  ;;  %v1973_v48 = vrot.slane %v4270_v5, 1  ;;  %v1984_v28 = vrot.slane %v2632_v6, 1  ;;  %v1985_v52 = vrot.slane %v4260_v21, 1  ;;  %v1975_v25 = vrot.slane %v2629_v53, 1 }
 0x13d   : > { %1990 = vrot.lane.b32.xlu0 %v1968_v58, %s3334_s26  ;;  %v2633_v58 = vcombine.low %v1765_v61, %v1749_v47  ;;  %v1976_v23 = vrot.slane %v4298_v18, 1  ;;  %vm1070_vm11 = vcmask 261120   ;;  %vm1087_vm12 = vcmask 523264  }
 0x13e   : > { %v1974_v49 = vsel %vm1029_vm9, %v1972_v51, %v1973_v48  ;;  %v1986_v62 = vsel %vm1029_vm9, %v1984_v28, %v1985_v52  ;;  %vm1457_vm13 = vcmask 785408  }
 0x13f   : > { %1938 = vrot.lane.b32.xlu1 %v1913_v27, %s3335_s28  ;;  %v1987_v5 = vrot.slane %v2633_v58, 1  ;;  %v1977_v27 = vsel %vm1029_vm9, %v1975_v25, %v1976_v23 }
 0x141   : > { %1992 = vrot.lane.b32.xlu0 %v1971_v16, %s3334_s26  ;;  %v1748_v35 = vld [vmem:[#allocation2 + $0x6c] sm:$0xf] }
 0x142   : > { %v4319_v0 = vcombine.low %v1748_v35, %v1749_v47 }
 0x143   : > { %v3060_v50 = vld [vmem:[#allocation2 + $0x74] ss:$0 sps:$4 sm:$0x11]  }
 0x144   : > { %v1915_v44 = vshrl.u32 %v4319_v0, 16  ;;  %v1917_v2 = vshll.u32 %v4319_v0, 16  ;;  %v1922_v15 = vshll.u32 %v3060_v50, 16  ;;  %v1988_v19 = vrot.slane %v3060_v50, 1 }
 0x145   : > { %1930 = vrot.lane.b32.xlu0 %v1865_v37, %s3335_s28  ;;  %v4356_v37 = vld [vmem:[%s4753_s2 + $0x68] sm:$0xff]  }
 0x146   : > { %v1919_v1 = vrot.slane %v1917_v2, 1  ;;  %v1924_v45 = vrot.slane %v1922_v15, 1  ;;  %v1989_v21 = vsel %vm1029_vm9, %v1987_v5, %v1988_v19  ;;  %v4381_v2 = vld [vmem:[%s4753_s2 + $0x80] sm:$0xff]   ;;  %v4388_v15 = vld [vmem:[%s4753_s2 + $0x88] sm:$0xff]  }
 0x148   : > { %v1920_v56 = vor.u32 %v1919_v1, %v1915_v44 }
 0x149   : > { %1932 = vrot.lane.b32.xlu0 %v1877_v38, %s3335_s28 }
 0x14a   : > { %v1925_v55 = vsel %vm892_vm10, %v1920_v56, %v1924_v45 }
 0x14b   : > { %1940 = vrot.lane.b32.xlu1 %v1925_v55, %s3335_s28 }
 0x14d   : > { %1994 = vrot.lane.b32.xlu0 %v1974_v49, %s3334_s26 }
 0x14e   : > { %v1374_v43 = vpop.permute.xlu1 %1373 }
 0x14f   : > { %2002 = vrot.lane.b32.xlu1 %v1986_v62, %s3334_s26  ;;  %v4340_v18 = vpop.permute.xlu0 %1056 }
 0x151   : > { %1996 = vrot.lane.b32.xlu0 %v1977_v27, %s3334_s26 }
 0x153   : > { %v1376_v11 = vpop.permute.xlu1 %1375  ;;  %2004 = vrot.lane.b32.xlu1 %v1989_v21, %s3334_s26 }
 0x155   : > { %v4343_v41 = vpop.permute.xlu0 %1060 }
 0x157   : > { %v4345_v16 = vpop.permute.xlu1 %1058 }
 0x159   : > { %v1310_v59 = vpop.permute.xlu0 %1309 }
 0x15a   : > { %v1390_v46 = vsel %vm1070_vm11, %v3840_v63, %v1310_v59 }
 0x15b   : > { %v1406_v54 = vsel %vm1087_vm12, %v1390_v46, %v1374_v43  ;;  %v1378_v47 = vpop.permute.xlu1 %1377 }
 0x15c   : > { %2744 = vmatprep.mubr.msk.bf16.mxu1 %vm1457_vm13, %v1406_v54 }
 0x15d   : > { %v1312_v60 = vpop.permute.xlu0 %1311 }
 0x15e   : > { %v1392_v26 = vsel %vm1070_vm11, %v3851_v12, %v1312_v60 }
 0x15f   : > { %v1408_v35 = vsel %vm1087_vm12, %v1392_v26, %v1376_v11 }
 0x160   : > { %2745 = vmatmul.mubr.msk.bf16.vlgmr.msra.gmra.mrb[0].mxu1 %vm1457_vm13, %v1408_v35 }
 0x161   : > { %v1380_v4 = vpop.permute.xlu1 %1379  ;;  %2822 = vmatpush3.bf16.msra.mxu1 %v4201_v13  ;;  %v994_v63 = vpop.permute.xlu0 %993 }
 0x162   : > { %2817 = vmatprep.subr.bf16.mxu1 %v4356_v37  ;;  %v1076_v43 = vsel %vm1070_vm11, %v3866_v30, %v994_v63 }
 0x163   : > { %v1093_v30 = vsel %vm1087_vm12, %v1076_v43, %v4345_v16 }
 0x165   : > { %v4367_v12 = vpop.permute.xlu1 %1062  ;;  %2823 = vmatpush3.bf16.msra.mxu1 %v4356_v37  ;;  %v996_v50 = vpop.permute.xlu0 %995 }
 0x166   : > { %2818 = vmatprep.subr.bf16.mxu1 %v4365_v40 }
 0x169   : > { %v1382_v44 = vpop.permute.xlu1 %1381  ;;  %2824 = vmatpush3.bf16.msra.mxu1 %v4365_v40  ;;  %v1316_v6 = vpop.permute.xlu0 %1315 }
 0x16a   : > { %2819 = vmatprep.subr.bf16.mxu1 %v4374_v10  ;;  %v1396_v51 = vsel %vm1070_vm11, %v3920_v29, %v1316_v6  ;;  %v4758_v6 = vld [vmem:[#allocation26_spill] sm:$0xff] }
 0x16b   : > { %v1412_v1 = vsel %vm1087_vm12, %v1396_v51, %v1380_v4 }
 0x16d   : > { %v992_v38 = vpop.permute.xlu1 %991  ;;  %2825 = vmatpush3.bf16.msra.mxu1 %v4374_v10 }
 0x16e   : > { %2820 = vmatprep.subr.bf16.mxu1 %v4381_v2  ;;  %v1074_v19 = vsel %vm1070_vm11, %v3860_v24, %v992_v38 }
 0x16f   : > { %v1091_v59 = vsel %vm1087_vm12, %v1074_v19, %v4340_v18 }
 0x171   : > { %v1314_v48 = vpop.permute.xlu1 %1313  ;;  %2826 = vmatpush3.bf16.msra.mxu1 %v4381_v2 }
 0x172   : > { %v1394_v61 = vsel %vm1070_vm11, %v3881_v42, %v1314_v48  ;;  %2821 = vmatprep.subr.bf16.mxu1 %v4388_v15  ;;  %v998_v42 = vpop.permute.xlu0 %997 }
 0x173   : > { %v1410_v53 = vsel %vm1087_vm12, %v1394_v61, %v1378_v47  ;;  %v1080_v47 = vsel %vm1070_vm11, %v3922_v32, %v998_v42 }
 0x174   : > { %2748 = vmatprep.mubr.msk.bf16.mxu1 %vm1457_vm13, %v1410_v53  ;;  %v1097_v32 = vsel %vm1087_vm12, %v1080_v47, %v4367_v12 }
 0x175   : > { %2749 = vmatmul.mubr.msk.bf16.gmra.mrb[4].mxu1 %vm1457_vm13, %v1412_v1  ;;  %v1318_v45 = vpop.permute.xlu1 %1317 }
 0x176   : > { %v1398_v29 = vsel %vm1070_vm11, %v3950_v3, %v1318_v45  ;;  %2827 = vmatpush3.bf16.msra.mxu1 %v4388_v15  ;;  %v1000_v28 = vpop.permute.xlu0 %999 }
 0x177   : > { %v1414_v56 = vsel %vm1087_vm12, %v1398_v29, %v1382_v44 }
 0x178   : > { %2752 = vmatprep.mubr.msk.bf16.mxu1 %vm1457_vm13, %v1414_v56 }
 0x183   : > { %v1384_v52 = vpop.permute.xlu1 %1383 }
 0x186   : > { %v1320_v58 = vpop.permute.xlu0 %1319 }
 0x187   : > { %v1400_v49 = vsel %vm1070_vm11, %v4059_v31, %v1320_v58 }
 0x188   : > { %v1416_v25 = vsel %vm1087_vm12, %v1400_v49, %v1384_v52 }
 0x189   : > { %2753 = vmatmul.mubr.msk.bf16.gmra.mrb[8].mxu1 %vm1457_vm13, %v1416_v25 }
 0x18a   : > { %v1065_v23 = vpop.permute.xlu0 %1064 }
 0x18d   : > { %v1322_v55 = vpop.permute.xlu1 %1321 }
 0x18e   : > { %v1002_v3 = vpop.permute.xlu0 %1001  ;;  %v1402_v11 = vsel %vm1070_vm11, %v4096_v8, %v1322_v55 }
 0x18f   : > { %v1084_v4 = vsel %vm1070_vm11, %v4062_v36, %v1002_v3 }
 0x191   : > { %v1055_v62 = vpop.permute.xlu1 %1054 }
 0x195   : > { %v1067_v5 = vpop.permute.xlu1 %1066 }
 0x196   : > { %v1101_v12 = vsel %vm1087_vm12, %v1084_v4, %v1067_v5 }
 0x197   : > { %v990_v27 = vpop.permute.xlu0 %989 }
 0x198   : > { %v1072_v21 = vsel %vm1070_vm11, %v4151_v7, %v990_v27  ;;  %v1078_v7 = vsel %vm1070_vm11, %v3871_v34, %v996_v50 }
 0x199   : > { %v1089_v31 = vsel %vm1087_vm12, %v1072_v21, %v1055_v62  ;;  %v1386_v46 = vpop.permute.xlu1 %1385 }
 0x19a   : > { %2772 = vmatprep.mubr.msk.bf16.mxu0 %vm1457_vm13, %v1089_v31  ;;  %v1418_v54 = vsel %vm1087_vm12, %v1402_v11, %v1386_v46 }
 0x19b   : > { %2773 = vmatmul.mubr.msk.bf16.vlgmr.msra.gmra.mrb[0].mxu0 %vm1457_vm13, %v1091_v59  ;;  %v1004_v24 = vpop.permute.xlu0 %1003  ;;  %2756 = vmatprep.mubr.msk.bf16.mxu1 %vm1457_vm13, %v1418_v54 }
 0x19c   : > { %2776 = vmatprep.mubr.msk.bf16.mxu0 %vm1457_vm13, %v1093_v30  ;;  %2789 = vmatpush3.bf16.msra.mxu0 %v4201_v13  ;;  %v1095_v13 = vsel %vm1087_vm12, %v1078_v7, %v4343_v41  ;;  %v1082_v41 = vsel %vm1070_vm11, %v3944_v57, %v1000_v28  ;;  %v4757_v57 = vld [vmem:[#allocation27_spill] sm:$0xff]  ;;  %v1086_v51 = vsel %vm1070_vm11, %v4758_v6, %v1004_v24 }
 0x19d   : > { %2790 = vmatprep.subr.bf16.mxu0 %v4356_v37  ;;  %v1388_v8 = vpop.permute.xlu1 %1387  ;;  %v1099_v35 = vsel %vm1087_vm12, %v1082_v41, %v1065_v23 }
 0x19f   : > { %v1324_v18 = vpop.permute.xlu0 %1323 }
 0x1a0   : > { %v1404_v16 = vsel %vm1070_vm11, %v4182_v33, %v1324_v18  ;;  %2791 = vmatpush3.bf16.msra.mxu0 %v4356_v37 }
 0x1a1   : > { %v1420_v60 = vsel %vm1087_vm12, %v1404_v16, %v1388_v8  ;;  %2792 = vmatprep.subr.bf16.mxu0 %v4365_v40  ;;  %v1935_v26 = vpop.permute.xlu1 %1934 }
 0x1a2   : > { %2757 = vmatmul.mubr.msk.bf16.gmra.mrb[12].mxu1 %vm1457_vm13, %v1420_v60  ;;  %v2015_v63 = vsel %vm1070_vm11, %v4164_v20, %v1935_v26 }
 0x1a3   : > { %2777 = vmatmul.mubr.msk.bf16.gmra.mrb[4].mxu0 %vm1457_vm13, %v1095_v13  ;;  %v1069_v34 = vpop.permute.xlu0 %1068 }
 0x1a4   : > { %2780 = vmatprep.mubr.msk.bf16.mxu0 %vm1457_vm13, %v1097_v32  ;;  %2793 = vmatpush3.bf16.msra.mxu0 %v4365_v40  ;;  %v1103_v48 = vsel %vm1087_vm12, %v1086_v51, %v1069_v34 }
 0x1a5   : > { %2794 = vmatprep.subr.bf16.mxu0 %v4374_v10  ;;  %v1937_v33 = vpop.permute.xlu1 %1936 }
 0x1a6   : > { %v2017_v36 = vsel %vm1070_vm11, %v4757_v57, %v1937_v33  ;;  %v4509_v33 = vld [vmem:[%s4759_s9] ss:$0 sm:$0xff] }
 0x1a7   : > { %v1927_v37 = vpop.permute.xlu0 %1926 }
 0x1a8   : > { %2795 = vmatpush3.bf16.msra.mxu0 %v4374_v10 }
 0x1a9   : > { %2796 = vmatprep.subr.bf16.mxu0 %v4381_v2  ;;  %v1999_v40 = vpop.permute.xlu1 %1998 }
 0x1aa   : > { %v2031_v10 = vsel %vm1087_vm12, %v2015_v63, %v1999_v40 }
 0x1ab   : > { %2781 = vmatmul.mubr.msk.bf16.gmra.mrb[8].mxu0 %vm1457_vm13, %v1099_v35  ;;  %v1929_v50 = vpop.permute.xlu0 %1928  ;;  %2808 = vmatprep.mubr.msk.bf16.mxu1 %vm1457_vm13, %v2031_v10 }
 0x1ac   : > { %2784 = vmatprep.mubr.msk.bf16.mxu0 %vm1457_vm13, %v1101_v12  ;;  %2797 = vmatpush3.bf16.msra.mxu0 %v4381_v2  ;;  %v2007_v2 = vsel %vm1070_vm11, %v4109_v22, %v1927_v37  ;;  %v2009_v29 = vsel %vm1070_vm11, %v4155_v17, %v1929_v50 }
 0x1ad   : > { %v2001_v44 = vpop.permute.xlu1 %2000  ;;  %2798 = vmatprep.subr.bf16.mxu0 %v4388_v15 }
 0x1ae   : > { %v2033_v38 = vsel %vm1087_vm12, %v2017_v36, %v2001_v44 }
 0x1af   : > { %v1991_v20 = vpop.permute.xlu0 %1990  ;;  %2809 = vmatmul.mubr.msk.bf16.vlgmr.msra.gmra.mrb[16].mxu1 %vm1457_vm13, %v2033_v38 }
 0x1b0   : > { %2799 = vmatpush3.bf16.msra.mxu0 %v4388_v15  ;;  %v2023_v61 = vsel %vm1087_vm12, %v2007_v2, %v1991_v20 }
 0x1b1   : > { %v1939_v45 = vpop.permute.xlu1 %1938 }
 0x1b2   : > { %v2019_v58 = vsel %vm1070_vm11, %v4256_v39, %v1939_v45 }
 0x1b3   : > { %2785 = vmatmul.mubr.msk.bf16.gmra.mrb[12].mxu0 %vm1457_vm13, %v1103_v48  ;;  %v1993_v53 = vpop.permute.xlu0 %1992 }
 0x1b4   : > { %2800 = vmatprep.mubr.msk.bf16.mxu0 %vm1457_vm13, %v2023_v61  ;;  %v2025_v56 = vsel %vm1087_vm12, %v2009_v29, %v1993_v53 }
 0x1b7   : > { %v1931_v1 = vpop.permute.xlu0 %1930 }
 0x1b8   : > { %v2011_v22 = vsel %vm1070_vm11, %v4268_v14, %v1931_v1 }
 0x1bb   : > { %2801 = vmatmul.mubr.msk.bf16.vlgmr.msra.gmra.mrb[0].mxu0 %vm1457_vm13, %v2025_v56  ;;  %v1933_v15 = vpop.permute.xlu0 %1932 }
 0x1bc   : > { %v2013_v17 = vsel %vm1070_vm11, %v4289_v9, %v1933_v15 }
 0x1bd   : > { %v1941_v42 = vpop.permute.xlu1 %1940 }
 0x1be   : > { %v2021_v14 = vsel %vm1070_vm11, %v4319_v0, %v1941_v42 }
 0x1bf   : > { %v1995_v28 = vpop.permute.xlu0 %1994 }
 0x1c0   : > { %v2027_v52 = vsel %vm1087_vm12, %v2011_v22, %v1995_v28 }
 0x1c1   : > { %2804 = vmatprep.mubr.msk.bf16.mxu0 %vm1457_vm13, %v2027_v52  ;;  %v2003_v49 = vpop.permute.xlu1 %2002 }
 0x1c2   : > { %v2035_v25 = vsel %vm1087_vm12, %v2019_v58, %v2003_v49 }
 0x1c3   : > { %v1997_v23 = vpop.permute.xlu0 %1996  ;;  %2812 = vmatprep.mubr.msk.bf16.mxu1 %vm1457_vm13, %v2035_v25 }
 0x1c4   : > { %v2029_v55 = vsel %vm1087_vm12, %v2013_v17, %v1997_v23 }
 0x1c5   : > { %2805 = vmatmul.mubr.msk.bf16.gmra.mrb[4].mxu0 %vm1457_vm13, %v2029_v55  ;;  %v2005_v3 = vpop.permute.xlu1 %2004 }
 0x1c6   : > { %v2037_v62 = vsel %vm1087_vm12, %v2021_v14, %v2005_v3 }
 0x1c7   : > { %2813 = vmatmul.mubr.msk.bf16.gmra.mrb[20].mxu1 %vm1457_vm13, %v2037_v62 }
 0x233   : > { %v2746_v39 = vpop.f32.mrb[0].mxu1 }
 0x234   : > { %v1508_v5 = vpop.f32.mrb[1].mxu1 }
 0x235   : > { %v2747_v9 = vpop.f32.mrb[2].mxu1 }
 0x236   : > { %v4496_v19 = vpop.f32.mrb[3].mxu1 }
 0x248   : > { %v4498_v27 = vpop.f32.mrb[4].mxu1 }
 0x249   : > { %v4500_v43 = vpop.f32.mrb[5].mxu1 }
 0x24a   : > { %v4502_v21 = vpop.f32.mrb[6].mxu1 }
 0x24b   : > { %v4504_v31 = vpop.f32.mrb[7].mxu1 }
 0x25c   : > { %v2754_v11 = vpop.f32.mrb[8].mxu1 }
 0x25d   : > { %v1540_v0 = vpop.f32.mrb[9].mxu1 }
 0x25e   : > { %v2755_v59 = vpop.f32.mrb[10].mxu1 }
 0x25f   : > { %v1543_v46 = vpop.f32.mrb[11].mxu1 }
 0x275   : > { %v2758_v24 = vpop.f32.mrb[12].mxu1 }
 0x276   : > { %v1556_v30 = vpop.f32.mrb[13].mxu1 }
 0x277   : > { %v2759_v54 = vpop.f32.mrb[14].mxu1 }
 0x278   : > { %v1559_v8 = vpop.f32.mrb[15].mxu1 }
 0x27e   : > { %v2782_v7 = vpop.f32.mrb[8].mxu0 }
 0x27f   : > { %v1698_v18 = vadd.f32 %v2782_v7, %v2754_v11  ;;  %v1689_v47 = vpop.f32.mrb[9].mxu0 }
 0x280   : > { %v1690_v16 = vadd.f32 %v1689_v47, %v1540_v0  ;;  %v2783_v60 = vpop.f32.mrb[10].mxu0 }
 0x281   : > { %v1701_v13 = vadd.f32 %v2783_v60, %v2755_v59  ;;  %v1692_v26 = vpop.f32.mrb[11].mxu0 }
 0x282   : > { %v1693_v34 = vadd.f32 %v1692_v26, %v1543_v46  ;;  %v2810_v32 = vpop.f32.mrb[16].mxu1 }
 0x283   : > { %v2197_v37 = vadd.f32 %v2810_v32, %v1698_v18  ;;  %v2156_v41 = vpop.f32.mrb[17].mxu1 }
 0x284   : > { %v2195_v35 = vadd.f32 %v2156_v41, %v1690_v16  ;;  %v2811_v4 = vpop.f32.mrb[18].mxu1 }
 0x285   : > { %v2220_v40 = vadd.f32 %v4509_v33, %v2197_v37  ;;  %v2198_v12 = vadd.f32 %v2811_v4, %v1701_v13  ;;  %v2159_v50 = vpop.f32.mrb[19].mxu1 }
 0x286   : > { %v2786_v63 = vpop.f32.mrb[12].mxu0  ;;  %v2218_v36 = vadd.f32 %v4509_v33, %v2195_v35  ;;  %v2196_v44 = vadd.f32 %v2159_v50, %v1693_v34 }
 0x287   : > { %v1714_v10 = vadd.f32 %v2786_v63, %v2758_v24  ;;  %v1705_v57 = vpop.f32.mrb[13].mxu0  ;;  %v2236_v6 = vmax.f32 %v2220_v40, 0.0  ;;  %v2221_v51 = vadd.f32 %v4509_v33, %v2198_v12 }
 0x288   : > { %v1706_v20 = vadd.f32 %v1705_v57, %v1556_v30  ;;  %v2787_v38 = vpop.f32.mrb[14].mxu0  ;;  %v2234_v61 = vmax.f32 %v2218_v36, 0.0  ;;  %v2219_v53 = vadd.f32 %v4509_v33, %v2196_v44 }
 0x289   : > { %v1717_v48 = vadd.f32 %v2787_v38, %v2759_v54  ;;  %v1708_v2 = vpop.f32.mrb[15].mxu0  ;;  %v2683_v1 = vpack.c.bf16 %v2236_v6, %v2236_v6  ;;  %v2237_v29 = vmax.f32 %v2221_v51, 0.0 }
 0x28a   : > { %v4515_v45 = vadd.f32 %v1708_v2, %v1559_v8  ;;  %v2681_v56 = vpack.c.bf16 %v2234_v61, %v2234_v61  ;;  %v2235_v15 = vmax.f32 %v2219_v53, 0.0 }
 0x28b   : > { %2316 = vst.msk [vmem:[%s4519_s11 + $0x28] sm:$0xf] %vm465_vm3, %v2683_v1  ;;  %v2684_v42 = vpack.c.bf16 %v2237_v29, %v2237_v29 }
 0x28c   : > { %2314 = vst.msk [vmem:[%s4519_s11 + $0x20] sm:$0xf] %vm465_vm3, %v2681_v56  ;;  %v2682_v22 = vpack.c.bf16 %v2235_v15, %v2235_v15 }
 0x28d   : > { %2317 = vst.msk [vmem:[%s4519_s11 + $0x2c] sm:$0xf] %vm465_vm3, %v2684_v42 }
 0x28e   : > { %v2802_v28 = vpop.f32.mrb[0].mxu0  ;;  %2315 = vst.msk [vmem:[%s4519_s11 + $0x24] sm:$0xf] %vm465_vm3, %v2682_v22 }
 0x28f   : > { %v2828_v52 = vadd.f32 %v2802_v28, %v2746_v39  ;;  %v2124_v58 = vpop.f32.mrb[1].mxu0 }
 0x290   : > { %v2829_v49 = vadd.f32 %v2124_v58, %v1508_v5  ;;  %v2803_v17 = vpop.f32.mrb[2].mxu0 }
 0x291   : > { %v2212_v25 = vadd.f32 %v2828_v52, %v4509_v33  ;;  %v2830_v23 = vadd.f32 %v2803_v17, %v2747_v9  ;;  %v2127_v55 = vpop.f32.mrb[3].mxu0 }
 0x292   : > { %v2210_v14 = vadd.f32 %v2829_v49, %v4509_v33  ;;  %v2831_v3 = vadd.f32 %v2127_v55, %v4496_v19 }
 0x293   : > { %v2228_v62 = vmax.f32 %v2212_v25, 0.0  ;;  %v2213_v11 = vadd.f32 %v2830_v23, %v4509_v33 }
 0x294   : > { %v2226_v0 = vmax.f32 %v2210_v14, 0.0  ;;  %v2211_v39 = vadd.f32 %v2831_v3, %v4509_v33 }
 0x295   : > { %v2675_v59 = vpack.c.bf16 %v2228_v62, %v2228_v62  ;;  %v2229_v5 = vmax.f32 %v2213_v11, 0.0 }
 0x296   : > { %v2673_v46 = vpack.c.bf16 %v2226_v0, %v2226_v0  ;;  %v2227_v24 = vmax.f32 %v2211_v39, 0.0 }
 0x297   : > { %2308 = vst.msk [vmem:[%s4519_s11 + $0x8] sm:$0xf] %vm465_vm3, %v2675_v59  ;;  %v2676_v9 = vpack.c.bf16 %v2229_v5, %v2229_v5 }
 0x298   : > { %2306 = vst.msk [vmem:[%s4519_s11] sm:$0xf] %vm465_vm3, %v2673_v46  ;;  %v2674_v30 = vpack.c.bf16 %v2227_v24, %v2227_v24  ;;  %v2806_v19 = vpop.f32.mrb[4].mxu0 }
 0x299   : > { %2309 = vst.msk [vmem:[%s4519_s11 + $0xc] sm:$0xf] %vm465_vm3, %v2676_v9  ;;  %v2832_v54 = vadd.f32 %v2806_v19, %v4498_v27  ;;  %v2140_v8 = vpop.f32.mrb[5].mxu0 }
 0x29a   : > { %2307 = vst.msk [vmem:[%s4519_s11 + $0x4] sm:$0xf] %vm465_vm3, %v2674_v30  ;;  %v2833_v7 = vadd.f32 %v2140_v8, %v4500_v43  ;;  %v2807_v18 = vpop.f32.mrb[6].mxu0  ;;  %v2814_v16 = vpop.f32.mrb[20].mxu1 }
 0x29b   : > { %v2216_v47 = vadd.f32 %v2832_v54, %v4509_v33  ;;  %v2834_v60 = vadd.f32 %v2807_v18, %v4502_v21  ;;  %v2143_v13 = vpop.f32.mrb[7].mxu0  ;;  %v2201_v26 = vadd.f32 %v2814_v16, %v1714_v10  ;;  %v2172_v32 = vpop.f32.mrb[21].mxu1 }
 0x29c   : > { %v2214_v34 = vadd.f32 %v2833_v7, %v4509_v33  ;;  %v2835_v27 = vadd.f32 %v2143_v13, %v4504_v31  ;;  %v2199_v41 = vadd.f32 %v2172_v32, %v1706_v20  ;;  %v2815_v43 = vpop.f32.mrb[22].mxu1 }
 0x29d   : > { %v2232_v37 = vmax.f32 %v2216_v47, 0.0  ;;  %v2217_v35 = vadd.f32 %v2834_v60, %v4509_v33  ;;  %v2224_v4 = vadd.f32 %v4509_v33, %v2201_v26  ;;  %v2202_v40 = vadd.f32 %v2815_v43, %v1717_v48  ;;  %v2175_v12 = vpop.f32.mrb[23].mxu1 }
 0x29e   : > { %v2230_v63 = vmax.f32 %v2214_v34, 0.0  ;;  %v2215_v21 = vadd.f32 %v2835_v27, %v4509_v33  ;;  %v2222_v10 = vadd.f32 %v4509_v33, %v2199_v41  ;;  %v2200_v57 = vadd.f32 %v2175_v12, %v4515_v45 }
 0x29f   : > { %v2679_v50 = vpack.c.bf16 %v2232_v37, %v2232_v37  ;;  %v2233_v31 = vmax.f32 %v2217_v35, 0.0  ;;  %v2240_v36 = vmax.f32 %v2224_v4, 0.0  ;;  %v2225_v20 = vadd.f32 %v4509_v33, %v2202_v40 }
 0x2a0   : > { %v2677_v44 = vpack.c.bf16 %v2230_v63, %v2230_v63  ;;  %v2231_v38 = vmax.f32 %v2215_v21, 0.0  ;;  %v2238_v6 = vmax.f32 %v2222_v10, 0.0  ;;  %v2223_v48 = vadd.f32 %v4509_v33, %v2200_v57 }
 0x2a1   : > { %2312 = vst.msk [vmem:[%s4519_s11 + $0x18] sm:$0xf] %vm465_vm3, %v2679_v50  ;;  %v2680_v51 = vpack.c.bf16 %v2233_v31, %v2233_v31  ;;  %v2687_v2 = vpack.c.bf16 %v2240_v36, %v2240_v36  ;;  %v2241_v61 = vmax.f32 %v2225_v20, 0.0 }
 0x2a2   : > { %2310 = vst.msk [vmem:[%s4519_s11 + $0x10] sm:$0xf] %vm465_vm3, %v2677_v44  ;;  %v2678_v53 = vpack.c.bf16 %v2231_v38, %v2231_v38  ;;  %v2685_v1 = vpack.c.bf16 %v2238_v6, %v2238_v6  ;;  %v2239_v45 = vmax.f32 %v2223_v48, 0.0 }
 0x2a3   : > { %2313 = vst.msk [vmem:[%s4519_s11 + $0x1c] sm:$0xf] %vm465_vm3, %v2680_v51  ;;  %2320 = vst.msk [vmem:[%s4519_s11 + $0x38] sm:$0xf] %vm465_vm3, %v2687_v2  ;;  %v2688_v29 = vpack.c.bf16 %v2241_v61, %v2241_v61 }
 0x2a4   : > { %2311 = vst.msk [vmem:[%s4519_s11 + $0x14] sm:$0xf] %vm465_vm3, %v2678_v53  ;;  %2318 = vst.msk [vmem:[%s4519_s11 + $0x30] sm:$0xf] %vm465_vm3, %v2685_v1  ;;  %v2686_v33 = vpack.c.bf16 %v2239_v45, %v2239_v45 }
 0x2a5   : > { %2321 = vst.msk [vmem:[%s4519_s11 + $0x3c] sm:$0xf] %vm465_vm3, %v2688_v29 }
 0x2a6   : > { %2319 = vst.msk [vmem:[%s4519_s11 + $0x34] sm:$0xf] %vm465_vm3, %v2686_v33 }
 0x2a7   : > { %3186 = shalt.err (!%p3183_p8)
}
 0x2a8   : > { %s3187_s9 = scalar_lea.hbm %s4571_s30, 1024  ;;  %s3191_s3 = scalar_lea.hbm %s4762_s13, 8192 }
 0x2a9   : > { %p3188_p13 = scmp.ne.s32.totalorder %s4571_s30, %s3187_s9  ;;  %p3192_p9 = scmp.lt.u32.totalorder %s4571_s30, %s4762_s13 }
 0x2aa   : > { %p3193_p7 = scmp.lt.u32.totalorder %s3191_s3, %s3187_s9  ;;  %p3195_p4 = scmp.lt.u32.totalorder %s3187_s9, %s4571_s30 }
 0x2ab   : > { %p3189_p10 = pnand %p3188_p13, %p4763_p0 }
 0x2ac   : > { %p3194_p6 = por %p3193_p7, %p3192_p9 }
 0x2ad   : > { %p3190_p3 = pneg %p3189_p10 }
 0x2ae   : > { %p3196_p12 = por %p3195_p4, %p3194_p6 }
 0x2b0   : > { %p3197_p11 = pnand %p3196_p12, %p3190_p3 }
 0x2b2   : > { %3200 = shalt.err (!%p3197_p11)
}
 0x2b3   : > { %s3337_s17 = smov 4  }
 0x2b4   : > { %2866 = dma.vmem_to_hbm [thread:$0]  (%p4763_p0), %s4575_s14, 1024, %s4571_s30, %s2323_s27, %s3334_s26, %s3334_s26, %s3337_s17  }
 0x2b5 PF: > { %p2883_p2 = scmp.ge.s32.totalorder %s3327_s6, 2  ;;  %s2354_s28 = sand.u32 1, %s3299_s24  }
 0x2b6   : > { %p4764_p1 = scmp.ne.s32.totalorder %s4722_s15, 0  ;;  %s2355_s4 = scalar_lea.sflag [#allocation5], %s2354_s28 }
 0x2b8   : > { %p2879_p5 = pnand %p2883_p2, %p4764_p1 }
 0x2ba   : > { %3270 = dma.done.wait (!%p2879_p5), %s2355_s4, 1024  }
 0x2bb   : > { %3272 = vsyncadd (!%p2879_p5), %s2355_s4, 4294966272  ;;  %s24_s6 = sadd.s32 1, %s3327_s6   ;;  %s4766_s21 = sld [smem:[#allocation14_spill]] }
 0x2bc   : > { %p4612_p8 = scmp.ge.s32.totalorder %s24_s6, 10   ;;  %s4767_s5 = sld [smem:[#allocation24_spill]] }
 0x2bd   : > { %s4768_s26 = sld [smem:[#allocation15_spill]]  ;;  %s4769_s14 = sld [smem:[#allocation25_spill]] }
 0x2be   : > { %s4770_s27 = sld [smem:[#allocation18_spill]]  ;;  %s4771_s28 = sld [smem:[#allocation19_spill]] }
 0x2bf   : > { %s4772_s29 = sld [smem:[#allocation20_spill]]  ;;  %s4773_s30 = sld [smem:[#allocation21_spill]] }
 0x2c0   : > { %s4774_s18 = smov %s3279_s19  ;;  %s4775_s19 = smov %s3283_s20 }
 0x2c1   : > { %s4776_s20 = smov %s3659_s1  ;;  %s4777_s22 = smov %s3295_s23 }
 0x2c2   : > { %s4778_s23 = smov %s4767_s5  ;;  %s4779_s24 = smov %s3303_s25 }
 0x2c3   : > { %s4780_s25 = smov %s4768_s26  ;;  %s4781_s26 = smov %s4769_s14 }
 0x2c4   :  { %23 = sbr.rel (!%p4612_p8) target bundleno = 19 (0x13), region = 114 }
 0x2cb   :  { %2360 = vsyncpa [#allocation4], 1 }
 0x2cc   :  { %2362 = vsyncpa [#allocation4 + $0x1], 1 }
 0x2cd   :  { %2363 = vsyncpa [#allocation7], 1 }
 0x2ce   :  { %2365 = vsyncpa [#allocation7 + $0x1], 1 }
 0x2cf   :  { %2366 = vsyncpa [#allocation5], 1 }
 0x2d0   :  { %2368 = vsyncpa [#allocation5 + $0x1], 1 }

// kernel: tpu_custom_call.1
= control target key start
LH: loop header
LB: loop body
LE: loop exit
PB: predicated region body
PF: predicated region fallthrough
CT: control target
= control target key end

     0   :  { %s6358_s0 = inlined_call_operand.hbm [shape: bf16[2,32,16,32], index: 0, kind: input, shape index: {}]   ;;  %s6359_s1 = inlined_call_operand.hbm [shape: bf16[2,32,16,32], index: 1, kind: input, shape index: {}]   ;;  %s6360_s2 = inlined_call_operand.hbm [shape: bf16[2,32,16,32], index: 2, kind: input, shape index: {}]   ;;  %s6361_s3 = inlined_call_operand.vmem [shape: bf16[3,96,32], index: 3, kind: input, shape index: {}]   ;;  %s6362_s4 = inlined_call_operand.vmem [shape: f32[1,32], index: 4, kind: input, shape index: {}]   ;;  %s6363_s5 = inlined_call_operand.hbm [shape: bf16[2,32,16,32], index: 5, kind: output, shape index: {}]  }
   0x1   :  { %6392 = sst [smem:[#allocation29_spill]] %s6358_s0 }
   0x2   :  { %6393 = sst [smem:[#allocation30_spill]] %s6359_s1 }
   0x3   :  { %6394 = sst [smem:[#allocation31_spill]] %s6360_s2 }
   0x4   :  { %6395 = sst [smem:[#allocation32_spill]] %s6361_s3 }
   0x5   :  { %6396 = sst [smem:[#allocation33_spill]] %s6362_s4 }
   0x6   :  { %6397 = sst [smem:[#allocation34_spill]] %s6363_s5 }
   0x7   :  { %10 = vsyncpa [#allocation4], 0 }
   0x8   :  { %12 = vsyncpa [#allocation4 + $0x1], 0 }
   0x9   :  { %13 = vsyncpa [#allocation7], 0 }
   0xa   :  { %15 = vsyncpa [#allocation7 + $0x1], 0 }
   0xb   :  { %16 = vsyncpa [#allocation5], 0 }
   0xc   :  { %18 = vsyncpa [#allocation5 + $0x1], 0  ;;  %s4763_s18 = smov 0   ;;  %s4765_s19 = smov 0  }
   0xd   :  { %s4767_s20 = smov 0   ;;  %s4769_s21 = smov 0  }
   0xe   :  { %s4771_s22 = smov 0   ;;  %s4773_s23 = smov 0  }
   0xf   :  { %s4775_s24 = smov 0   ;;  %s4777_s25 = smov 0  }
  0x10   :  { %s4779_s26 = smov 0   ;;  %s4781_s27 = smov 0  }
  0x11   :  { %s4783_s28 = smov 0   ;;  %s4785_s29 = smov 0  }
  0x12   :  { %s4787_s30 = smov 0   ;;  %s4789_s6 = smov 0  }
  0x13 LB: > { %6398 = sst [smem:[#allocation14_spill]] %s4687_s22  ;;  %s4834_s7 = sadd.s32 4294967295, %s4723_s6   ;;  %s4723_s6 = sphi %s4789_s6, %s24_s6   ;;  %s4719_s30 = sphi %s4787_s30, %s6491_s30   ;;  %s4715_s29 = sphi %s4785_s29, %s6490_s29   ;;  %s4711_s28 = sphi %s4783_s28, %s6489_s28   ;;  %s4707_s27 = sphi %s4781_s27, %s6488_s27   ;;  %s4703_s26 = sphi %s4779_s26, %s6487_s26   ;;  %s4699_s25 = sphi %s4777_s25, %s6498_s25   ;;  %s4695_s24 = sphi %s4775_s24, %s6497_s24   ;;  %s4691_s23 = sphi %s4773_s23, %s6496_s23   ;;  %s4687_s22 = sphi %s4771_s22, %s6495_s22   ;;  %s4683_s21 = sphi %s4769_s21, %s6484_s21   ;;  %s4679_s20 = sphi %s4767_s20, %s6494_s20   ;;  %s4675_s19 = sphi %s4765_s19, %s6493_s19   ;;  %s4671_s18 = sphi %s4763_s18, %s6492_s18  }
  0x14   : > { %6399 = sst [smem:[#allocation15_spill]] %s4703_s26  ;;  %s33_s8 = sadd.s32 1, %s4715_s29 }
  0x15   : > { %6400 = sst [smem:[#allocation16_spill]] %s4707_s27  ;;  %p34_p0 = scmp.ge.s32.totalorder %s33_s8, 4 }
  0x16   : > { %6401 = sst [smem:[#allocation17_spill]] %s4711_s28  ;;  %s36_s9 = sadd.s32 1, %s4719_s30 }
  0x17   : > { %6402 = sst [smem:[#allocation18_spill]] %s4715_s29  ;;  %p6376_p1 = scmp.eq.s32.totalorder %s4723_s6, 0 }
  0x18   : > { %6403 = sst [smem:[#allocation19_spill]] %s4719_s30  ;;  %p6375_p2 = scmp.eq.s32.totalorder %s4834_s7, 0 }
  0x19   : > { %s6500_s8 = smov (%p34_p0, %s33_s8), 0  ;;  %s6502_s9 = smov (!%p34_p0, %s36_s9), %s4719_s30 }
  0x1a   : > { %6404 = sst [smem:[#allocation20_spill]] %s6500_s8  ;;  %s41_s10 = ssub.s32 %s4715_s29, %s6500_s8 }
  0x1b   : > { %s3616_s11 = sshll.u32 %s4715_s29, 3  ;;  %p38_p3 = scmp.ge.s32.totalorder %s6502_s9, 2 }
  0x1c   : > { %s3617_s12 = sadd.s32 4294967295, %s3616_s11  ;;  %s3618_s13 = sshll.u32 %s6500_s8, 3 }
  0x1d   : > { %p70_p4 = scmp.gt.s32.totalorder %s3617_s12, 0  ;;  %s6504_s9 = smov (%p38_p3, %s6502_s9), 0 }
  0x1e   : > { %6405 = sst [smem:[#allocation21_spill]] %s6504_s9  ;;  %s4851_s14 = ssub.s32 %s4719_s30, %s6504_s9 }
  0x1f   : > { %s6506_s12 = smov (!%p70_p4, %s3617_s12), 0  ;;  %6406 = sst [smem:[#allocation22_spill]] %s4851_s14 }
  0x20   : > { %s3619_s15 = sadd.s32 4294967295, %s3618_s13  ;;  %s4854_s16 = sor.u32 %s41_s10, %s4851_s14 }
  0x21   : > { %p74_p5 = scmp.gt.s32.totalorder %s3619_s15, 0  ;;  %s81_s17 = sadd.s32 1, %s4691_s23 }
  0x22   : > { %p88_p7 = scmp.ne.s32.totalorder %s4691_s23, %s4687_s22  ;;  %p94_p8 = scmp.ne.s32.totalorder %s4687_s22, %s4683_s21 }
  0x23   : > { %s6508_s15 = smov (!%p74_p5, %s3619_s15), 0  ;;  %s4862_s9 = sadd.s32 8, %s3616_s11 }
  0x24   : > { %s77_s8 = ssub.s32 %s6506_s12, %s6508_s15  ;;  %p4867_p9 = por %p88_p7, %p6376_p1 }
  0x25   : > { %s78_s5 = sor.u32 %s77_s8, %s4851_s14  ;;  %p4873_p11 = por %p94_p8, %p6375_p2 }
  0x26   : > { %p79_p10 = scmp.eq.s32.totalorder %s78_s5, 0  ;;  %s4878_s21 = sadd.s32 8, %s3618_s13 }
  0x27   : > { %s6408_s28 = scalar_select %p4873_p11, 1, 0 }
  0x28   : > { %s4881_s11 = scalar_select %p79_p10, %s4691_s23, %s81_s17  }
  0x29   : > { %6409 = sst [smem:[#allocation23_spill]] %s6408_s28  ;;  %p6374_p0 = scmp.lt.s32.totalorder %s4723_s6, 8 }
  0x2a   : > { %6410 = sst [smem:[#allocation24_spill]] %s4881_s11  ;;  %s4886_s8 = sshll.u32 %s4719_s30, 6 }
  0x2b   : > { %s254_s5 = sand.u32 1, %s4723_s6   ;;  %s256_s15 = sand.u32 1, %s4691_s23  }
  0x2c   : > { %s3629_s4 = sshll.u32 %s256_s15, 3  ;;  %s3632_s3 = sshll.u32 %s6506_s12, 1 }
  0x2d   : > { %s268_s27 = sadd.s32 %s3632_s3, %s4886_s8  ;;  %s258_s28 = scalar_lea.vmem [#allocation6], %s3629_s4 }
  0x2e   : > { %s271_s22 = sshll.u32 %s258_s28, 4  ;;  %s3634_s2 = sshll.u32 %s268_s27, 6  ;;  %s4891_s22 = int_to_ptr.vmem [resolvable:$true] %s271_s22 }
  0x2f   : > { %s6411_s1 = sld [smem:[#allocation30_spill]]  ;;  %p4902_p3 = pnand %p6374_p0, %p4867_p9 }
  0x30   : > { %s4908_s3 = scalar_lea.sflag [#allocation7], %s254_s5 }
  0x31   : > { %p4481_p8 = pneg %p4902_p3 }
  0x35   : > { %s4896_s17 = scalar_lea.hbm %s6411_s1, %s3634_s2  ;;  %s4484_s28 = scalar_lea.hbm %s6411_s1, 8192 }
  0x36   : > { %s4479_s4 = scalar_lea.hbm %s4896_s17, 128  ;;  %p4485_p9 = scmp.lt.u32.totalorder %s4896_s17, %s6411_s1 }
  0x37   : > { %p4480_p7 = scmp.ne.s32.totalorder %s4896_s17, %s4479_s4  ;;  %p4486_p12 = scmp.lt.u32.totalorder %s4484_s28, %s4479_s4 }
  0x38   : > { %p4488_p2 = scmp.lt.u32.totalorder %s4479_s4, %s4896_s17 }
  0x39   : > { %p4482_p10 = pnand %p4481_p8, %p4480_p7  ;;  %p4487_p0 = por %p4486_p12, %p4485_p9 }
  0x3b   : > { %p4483_p13 = pneg %p4482_p10  ;;  %p4489_p1 = por %p4488_p2, %p4487_p0 }
  0x3d   : > { %p4490_p6 = pnand %p4489_p1, %p4483_p13 }
  0x3f   : > { %4493 = shalt.err (!%p4490_p6)
}
  0x40   : > { %s4494_s10 = scalar_lea.vmem %s4891_s22, 128  ;;  %s4725_s5 = smov [#allocation6]  }
  0x41   : > { %p4495_p7 = scmp.ne.s32.totalorder %s4891_s22, %s4494_s10  ;;  %s4499_s13 = sshll.u32 %s4725_s5, 4  ;;  %s4500_s13 = int_to_ptr.vmem [resolvable:$false] %s4499_s13 }
  0x42   : > { %s4501_s2 = scalar_lea.vmem %s4500_s13, 256  ;;  %p4502_p5 = scmp.lt.s32.totalorder %s4891_s22, %s4500_s13 }
  0x43   : > { %p4497_p10 = pnand %p4495_p7, %p4481_p8  ;;  %p4503_p12 = scmp.lt.s32.totalorder %s4501_s2, %s4494_s10 }
  0x45   : > { %p4498_p4 = pneg %p4497_p10  ;;  %p4504_p9 = por %p4503_p12, %p4502_p5 }
  0x47   : > { %p4505_p2 = pnand %p4504_p9, %p4498_p4 }
  0x49   : > { %4508 = shalt.err (!%p4505_p2)
}
  0x4a   : > { %s6377_s4 = smov 64   ;;  %s6379_s27 = smov 4  }
  0x4b   : > { %4314 = dma.hbm_to_vmem [thread:$0]  (!%p4902_p3), %s4896_s17, 128, %s4891_s22, %s4908_s3, %s6377_s4, %s6377_s4, %s6379_s27  }
  0x4c   : > { %p6413_p1 = scmp.lt.s32.totalorder %s4723_s6, 9  ;;  %p6414_p6 = scmp.ge.s32.totalorder %s4723_s6, 1 }
  0x4d   : > { %s3615_s12 = sadd.s32 4294967294, %s4723_s6   ;;  %s45_s14 = sadd.s32 1, %s4703_s26 }
  0x4e   : > { %p4943_p13 = pnand %p6414_p6, %p6413_p1  ;;  %p6416_p0 = scmp.eq.s32.totalorder %s4854_s16, 0 }
  0x4f   : > { %p52_p4 = scmp.ne.s32.totalorder %s4703_s26, %s4699_s25  ;;  %p58_p5 = scmp.ne.s32.totalorder %s4699_s25, %s4695_s24 }
  0x50   : > { %s4952_s10 = scalar_select %p6416_p0, %s4703_s26, %s45_s14  }
  0x51   : > { %p198_p8 = scmp.eq.s32.totalorder %s4834_s7, 7  ;;  %p204_p7 = scmp.eq.s32.totalorder %s3615_s12, 7 }
  0x52   : > { %6417 = sst [smem:[#allocation25_spill]] %s4952_s10  ;;  %p6418_p10 = scmp.eq.s32.totalorder %s4723_s6, 0 }
  0x53   : > { %p6420_p3 = scmp.eq.s32.totalorder %s4834_s7, 0  ;;  %p4971_p2 = por %p198_p8, %p52_p4 }
  0x54   : > { %p4961_p12 = por %p6418_p10, %p52_p4  ;;  %p4975_p1 = por %p204_p7, %p58_p5 }
  0x55   : > { %p4967_p9 = por %p6420_p3, %p58_p5  ;;  %s230_s5 = sand.u32 1, %s4703_s26  }
  0x56   : > { %s6422_s16 = scalar_select %p4971_p2, 1, 0 }
  0x57   : > { %s6421_s17 = scalar_select %p4967_p9, 1, 0 }
  0x58   : > { %s6423_s15 = scalar_select %p4975_p1, 1, 0 }
  0x59   : > { %s3880_s13 = sshll.u32 %s4715_s29, 4  ;;  %s3624_s2 = sshll.u32 %s230_s5, 6 }
  0x5a   : > { %s241_s12 = sadd.s32 %s3880_s13, %s4886_s8  ;;  %s234_s4 = scalar_lea.vmem [#allocation3], %s3624_s2 }
  0x5b   : > { %s3628_s14 = sshll.u32 %s241_s12, 6  ;;  %s244_s27 = sshll.u32 %s234_s4, 4  ;;  %s4987_s27 = int_to_ptr.vmem [resolvable:$true] %s244_s27 }
  0x5c   : > { %s6424_s0 = sld [smem:[#allocation29_spill]]  ;;  %p6425_p6 = scmp.lt.s32.totalorder %s4723_s6, 8 }
  0x5d   : > { %s4997_s4 = scalar_lea.sflag [#allocation4], %s230_s5 }
  0x5e   : > { %p4993_p0 = pnand %p6425_p6, %p4961_p12 }
  0x60   : > { %p4511_p5 = pneg %p4993_p0 }
  0x62   : > { %s4985_s10 = scalar_lea.hbm %s6424_s0, %s3628_s14  ;;  %s4514_s22 = scalar_lea.hbm %s6424_s0, 8192 }
  0x63   : > { %s4509_s13 = scalar_lea.hbm %s4985_s10, 1024  ;;  %p4515_p10 = scmp.lt.u32.totalorder %s4985_s10, %s6424_s0 }
  0x64   : > { %p4510_p4 = scmp.ne.s32.totalorder %s4985_s10, %s4509_s13  ;;  %p4516_p12 = scmp.lt.u32.totalorder %s4514_s22, %s4509_s13 }
  0x65   : > { %p4518_p6 = scmp.lt.u32.totalorder %s4509_s13, %s4985_s10 }
  0x66   : > { %p4512_p8 = pnand %p4511_p5, %p4510_p4  ;;  %p4517_p3 = por %p4516_p12, %p4515_p10 }
  0x68   : > { %p4513_p7 = pneg %p4512_p8  ;;  %p4519_p1 = por %p4518_p6, %p4517_p3 }
  0x6a   : > { %p4520_p2 = pnand %p4519_p1, %p4513_p7 }
  0x6c   : > { %4523 = shalt.err (!%p4520_p2)
}
  0x6d   : > { %s4524_s5 = scalar_lea.vmem %s4987_s27, 1024  ;;  %s4728_s14 = smov [#allocation3]  }
  0x6e   : > { %p4525_p4 = scmp.ne.s32.totalorder %s4987_s27, %s4524_s5  ;;  %s4529_s1 = sshll.u32 %s4728_s14, 4  ;;  %s4530_s1 = int_to_ptr.vmem [resolvable:$false] %s4529_s1 }
  0x6f   : > { %s4531_s30 = scalar_lea.vmem %s4530_s1, 2048  ;;  %p4532_p9 = scmp.lt.s32.totalorder %s4987_s27, %s4530_s1 }
  0x70   : > { %p4527_p8 = pnand %p4525_p4, %p4511_p5  ;;  %p4533_p10 = scmp.lt.s32.totalorder %s4531_s30, %s4524_s5 }
  0x72   : > { %p4528_p11 = pneg %p4527_p8  ;;  %p4534_p12 = por %p4533_p10, %p4532_p9 }
  0x74   : > { %p4535_p3 = pnand %p4534_p12, %p4528_p11 }
  0x76   : > { %4538 = shalt.err (!%p4535_p3)
}
  0x77   : > { %s6427_s13 = smov 4   ;;  %s6428_s22 = smov 64  }
  0x78   : > { %s6429_s2 = sld [smem:[#allocation22_spill]]  ;;  %p6430_p11 = scmp.lt.s32.totalorder %s4862_s9, 31 }
  0x79   : > { %4311 = dma.hbm_to_vmem [thread:$0]  (!%p4993_p0), %s4985_s10, 1024, %s4987_s27, %s4997_s4, %s6428_s22, %s6428_s22, %s6427_s13  }
  0x7a   : > { %s6510_s9 = smov (!%p6430_p11, %s4862_s9), 31  ;;  %p6431_p9 = scmp.lt.s32.totalorder %s4878_s21, 31 }
  0x7b   : > { %s117_s29 = sadd.s32 1, %s4679_s20  ;;  %p124_p2 = scmp.ne.s32.totalorder %s4679_s20, %s4675_s19 }
  0x7c   : > { %s6512_s21 = smov (!%p6431_p9, %s4878_s21), 31  ;;  %p130_p1 = scmp.ne.s32.totalorder %s4675_s19, %s4671_s18 }
  0x7d   : > { %s113_s12 = ssub.s32 %s6510_s9, %s6512_s21  ;;  %p6432_p5 = scmp.eq.s32.totalorder %s4723_s6, 0 }
  0x7e   : > { %s114_s5 = sor.u32 %s113_s12, %s6429_s2  ;;  %p6434_p4 = scmp.eq.s32.totalorder %s4834_s7, 0 }
  0x7f   : > { %p5042_p7 = por %p124_p2, %p6432_p5  ;;  %p115_p6 = scmp.eq.s32.totalorder %s114_s5, 0 }
  0x80   : > { %p5048_p8 = por %p130_p1, %p6434_p4  ;;  %s283_s10 = sand.u32 1, %s4679_s20  }
  0x81   : > { %s3637_s4 = sshll.u32 %s6510_s9, 1  ;;  %s3635_s21 = sshll.u32 %s283_s10, 3 }
  0x82   : > { %s6435_s27 = scalar_select %p5048_p8, 1, 0 }
  0x83   : > { %s5054_s1 = scalar_select %p115_p6, %s4679_s20, %s117_s29  }
  0x84   : > { %s295_s30 = sadd.s32 %s3637_s4, %s4886_s8  ;;  %s6436_s0 = sld [smem:[#allocation31_spill]] }
  0x85   : > { %s3639_s18 = sshll.u32 %s295_s30, 6  ;;  %s285_s5 = scalar_lea.vmem [#allocation8], %s3635_s21 }
  0x86   : > { %s298_s11 = sshll.u32 %s285_s5, 4  ;;  %p6437_p0 = scmp.lt.s32.totalorder %s4723_s6, 8  ;;  %s5062_s11 = int_to_ptr.vmem [resolvable:$true] %s298_s11 }
  0x88   : > { %p5068_p10 = pnand %p6437_p0, %p5042_p7 }
  0x8a   : > { %s5060_s26 = scalar_lea.hbm %s6436_s0, %s3639_s18  ;;  %p4541_p3 = pneg %p5068_p10 }
  0x8b   : > { %s4539_s8 = scalar_lea.hbm %s5060_s26, 128  ;;  %s4544_s4 = scalar_lea.hbm %s6436_s0, 8192 }
  0x8c   : > { %p4540_p12 = scmp.ne.s32.totalorder %s5060_s26, %s4539_s8  ;;  %p4545_p2 = scmp.lt.u32.totalorder %s5060_s26, %s6436_s0 }
  0x8d   : > { %p4546_p1 = scmp.lt.u32.totalorder %s4544_s4, %s4539_s8  ;;  %p4548_p7 = scmp.lt.u32.totalorder %s4539_s8, %s5060_s26 }
  0x8e   : > { %p4542_p11 = pnand %p4541_p3, %p4540_p12 }
  0x8f   : > { %p4547_p5 = por %p4546_p1, %p4545_p2 }
  0x90   : > { %p4543_p9 = pneg %p4542_p11 }
  0x91   : > { %p4549_p6 = por %p4548_p7, %p4547_p5 }
  0x93   : > { %p4550_p4 = pnand %p4549_p6, %p4543_p9 }
  0x95   : > { %4553 = shalt.err (!%p4550_p4)
}
  0x96   : > { %s4554_s30 = scalar_lea.vmem %s5062_s11, 128  ;;  %s4729_s18 = smov [#allocation8]  }
  0x97   : > { %p4555_p0 = scmp.ne.s32.totalorder %s5062_s11, %s4554_s30  ;;  %s4559_s2 = sshll.u32 %s4729_s18, 4  ;;  %s4560_s2 = int_to_ptr.vmem [resolvable:$false] %s4559_s2 }
  0x98   : > { %s4561_s12 = scalar_lea.vmem %s4560_s2, 256  ;;  %p4562_p8 = scmp.lt.s32.totalorder %s5062_s11, %s4560_s2 }
  0x99   : > { %p4557_p12 = pnand %p4555_p0, %p4541_p3  ;;  %p4563_p2 = scmp.lt.s32.totalorder %s4561_s12, %s4554_s30 }
  0x9b   : > { %p4558_p11 = pneg %p4557_p12  ;;  %p4564_p1 = por %p4563_p2, %p4562_p8 }
  0x9d   : > { %p4565_p5 = pnand %p4564_p1, %p4558_p11 }
  0x9f   : > { %4568 = shalt.err (!%p4565_p5)
}
  0xa0   : > { %4317 = dma.hbm_to_vmem [thread:$0]  (!%p5068_p10), %s5060_s26, 128, %s5062_s11, %s4908_s3, %s6428_s22, %s6428_s22, %s6427_s13  }
  0xa1   : > { %310 = sbr.rel (%p4943_p13) target bundleno = 657 (0x291), region = 40 }
  0xa8   : > { %s5104_s5 = sand.u32 1, %s4699_s25   ;;  %p6439_p8 = scmp.ne.s32.totalorder %s6421_s17, 0 }
  0xa9   : > { %s3641_s8 = sshll.u32 %s5104_s5, 6  ;;  %s313_s29 = scalar_lea.sflag [#allocation4], %s5104_s5 }
  0xaa   : > { %s5110_s9 = scalar_lea.vmem [#allocation3], %s3641_s8 }
  0xab   : > { %4654 = dma.done.wait (%p6439_p8), %s313_s29, 1024  }
  0xac   : > { %4656 = vsyncadd (%p6439_p8), %s313_s29, 4294966272  ;;  %s6440_s26 = sld [smem:[#allocation14_spill]]  ;;  %s6441_s11 = sld [smem:[#allocation23_spill]] }
  0xad   : > { %s321_s3 = sand.u32 1, %s4834_s7  }
  0xae   : > { %s322_s22 = scalar_lea.sflag [#allocation7], %s321_s3 }
  0xb2   : > { %s323_s28 = sand.u32 1, %s6440_s26   ;;  %p6442_p13 = scmp.ne.s32.totalorder %s6441_s11, 0 }
  0xb3   : > { %s5118_s13 = sshll.u32 %s323_s28, 3 }
  0xb4   : > { %s325_s10 = scalar_lea.vmem [#allocation6], %s5118_s13 }
  0xb5   : > { %4658 = dma.done.wait (%p6442_p13), %s322_s22, 128  }
  0xb6   : > { %4660 = vsyncadd (%p6442_p13), %s322_s22, 4294967168  ;;  %s332_s4 = sand.u32 1, %s4675_s19   ;;  %p6443_p10 = scmp.ne.s32.totalorder %s6435_s27, 0 }
  0xb7   : > { %s5126_s17 = sshll.u32 %s332_s4, 3 }
  0xb8   : > { %s334_s14 = scalar_lea.vmem [#allocation8], %s5126_s17 }
  0xb9   : > { %4662 = dma.done.wait (%p6443_p10), %s322_s22, 128  }
  0xba   : > { %4664 = vsyncadd (%p6443_p10), %s322_s22, 4294967168  ;;  %s6444_s7 = sld [smem:[#allocation16_spill]]  ;;  %vm442_vm0 = vsmask.f32 256  ;;  %vm443_vm1 = vsmask.f32 4368 }
  0xbb   : > { %vm466_vm2 = vsmask.f32 7938  ;;  %s6446_s12 = sld [smem:[#allocation32_spill]]  ;;  %v426_v2 = vld [vmem:[%s5110_s9] sm:$0xf]  ;;  %vm465_vm3 = vcmask 257024   ;;  %vm5149_vm5 = vmor %vm442_vm0, %vm443_vm1 }
  0xbc   : > { %v427_v3 = vld [vmem:[%s5110_s9 + $0x4] sm:$0xf]  ;;  %vm473_vm4 = vcmask 253952   ;;  %v479_v5 = vshrl.u32 %v426_v2, 16  ;;  %v482_v6 = vshll.u32 %v426_v2, 16  ;;  %vm5159_vm6 = vmand %vm465_vm3, %vm466_vm2  ;;  %vm1051_vm11 = vcmask 261120  }
  0xbd   : > { %v487_v7 = vshrl.u32 %v427_v3, 16  ;;  %v490_v8 = vshll.u32 %v427_v3, 16  ;;  %v639_v9 = vld [vmem:[#allocation2 + $0xc] sm:$0xf]  ;;  %v428_v10 = vld [vmem:[%s5110_s9 + $0x8] sm:$0xf]  ;;  %vm5165_vm7 = vmand %vm473_vm4, %vm442_vm0 }
  0xbe   : > { %v429_v11 = vld [vmem:[%s5110_s9 + $0xc] sm:$0xf]  ;;  %v481_v13 = vrot.slane %v479_v5, 7  ;;  %v643_v15 = vld [vmem:[#allocation2 + $0x14] sm:$0x1]  ;;  %v496_v16 = vshrl.u32 %v428_v10, 16  ;;  %vm5206_vm8 = vmand %vm473_vm4, %vm466_vm2 }
  0xbf   : > { %v489_v14 = vrot.slane %v487_v7, 7  ;;  %v499_v17 = vshll.u32 %v428_v10, 16  ;;  %v504_v19 = vshrl.u32 %v429_v11, 16  ;;  %v507_v20 = vshll.u32 %v429_v11, 16  ;;  %v646_v25 = vld [vmem:[#allocation2 + $0x18] sm:$0xf] }
  0xc0   : > { %s3645_s21 = sshll.u32 %s6444_s7, 3  ;;  %v484_v21 = vor.u32 %v482_v6, %v481_v13  ;;  %v485_v22 = vrot.slane %v481_v13, 4  ;;  %v498_v28 = vrot.slane %v496_v16, 7  ;;  %v430_v30 = vld [vmem:[%s5110_s9 + $0x10] sm:$0xf]  ;;  %vm1370_vm13 = vcmask 1042432  }
  0xc1   : > { %p5136_p3 = scmp.ge.s32.totalorder %s3645_s21, 1  ;;  %v4440_v0 = vld [vmem:[%s6446_s12 + $0x40] sm:$0xff]   ;;  %v4441_v1 = vld [vmem:[%s6446_s12 + $0x48] sm:$0xff]   ;;  %v492_v23 = vor.u32 %v490_v8, %v489_v14  ;;  %v494_v24 = vrot.slane %v489_v14, 4  ;;  %v4442_v26 = vld [vmem:[%s6446_s12 + $0x10] sm:$0xff]   ;;  %v506_v29 = vrot.slane %v504_v19, 7 }
  0xc2   : > { %4068 = vmatprep.subr.bf16.mxu0 %v4440_v0  ;;  %v4443_v27 = vld [vmem:[%s6446_s12 + $0x18] sm:$0xff]   ;;  %v640_v32 = vsel %vm5159_vm6, %v484_v21, %v639_v9  ;;  %v650_v34 = vld [vmem:[#allocation2 + $0x20] sm:$0x1]  ;;  %3988 = vmatprep.subr.bf16.mxu1 %v4442_v26  ;;  %v431_v35 = vld [vmem:[%s5110_s9 + $0x14] sm:$0xf]  ;;  %v513_v36 = vshrl.u32 %v430_v30, 16  ;;  %v501_v38 = vor.u32 %v499_v17, %v498_v28 }
  0xc3   : > { %4069 = vmatpush3.bf16.msra.mxu0 %v4440_v0  ;;  %s386_s26 = scalar_select %p5136_p3, 1, 0  ;;  %v493_v31 = vsel %vm5149_vm5, %v485_v22, %v492_v23  ;;  %v644_v33 = vsel %vm5165_vm7, %v494_v24, %v643_v15  ;;  %v5188_v37 = vld [vmem:[%s6446_s12 + $0x50] sm:$0xff]   ;;  %641 = vst [vmem:[#allocation2 + $0xc] sm:$0xf] %v640_v32  ;;  %v502_v39 = vrot.slane %v498_v28, 4  ;;  %v509_v40 = vor.u32 %v507_v20, %v506_v29 }
  0xc4   : > { %4070 = vmatprep.subr.bf16.mxu0 %v4441_v1  ;;  %642 = vst.msk [vmem:[#allocation2 + $0x10] sm:$0xf] %vm465_vm3, %v493_v31  ;;  %645 = vst [vmem:[#allocation2 + $0x14] sm:$0x1] %v644_v33  ;;  %v511_v41 = vrot.slane %v506_v29, 4  ;;  %3989 = vmatpush3.bf16.msra.mxu1 %v4442_v26  ;;  %v515_v43 = vrot.slane %v513_v36, 7  ;;  %v647_v49 = vsel %vm5159_vm6, %v501_v38, %v646_v25 }
  0xc5   : > { %s5176_s4 = scvt.s32.f32 %s386_s26  ;;  %v432_v42 = vld [vmem:[%s5110_s9 + $0x18] sm:$0xf]  ;;  %3990 = vmatprep.subr.bf16.mxu1 %v4443_v27  ;;  %v516_v44 = vshll.u32 %v430_v30, 16  ;;  %v521_v45 = vshrl.u32 %v431_v35, 16  ;;  %v524_v46 = vshll.u32 %v431_v35, 16  ;;  %v510_v48 = vsel %vm5149_vm5, %v502_v39, %v509_v40  ;;  %v5216_v2 = vld [vmem:[%s6446_s12] sm:$0xff]  }
  0xc6   : > { %v433_v47 = vld [vmem:[%s5110_s9 + $0x1c] sm:$0xf]  ;;  %v651_v50 = vsel %vm5165_vm7, %v511_v41, %v650_v34  ;;  %v653_v51 = vld [vmem:[#allocation2 + $0x24] sm:$0xf]  ;;  %v657_v52 = vld [vmem:[#allocation2 + $0x2c] sm:$0x1] }
  0xc7   : > { %4071 = vmatpush3.bf16.msra.mxu0 %v4441_v1  ;;  %v530_v53 = vshrl.u32 %v432_v42, 16  ;;  %s390_s2 = sshrl.u32 %s5176_s4, 16  ;;  %648 = vst [vmem:[#allocation2 + $0x18] sm:$0xf] %v647_v49  ;;  %649 = vst.msk [vmem:[#allocation2 + $0x1c] sm:$0xf] %vm465_vm3, %v510_v48  ;;  %v518_v54 = vor.u32 %v516_v44, %v515_v43  ;;  %p389_p9 = scmp.ne.f32.partialorder %s5176_s4, %s5176_s4 }
  0xc8   : > { %4088 = vmatprep.subr.bf16.mxu0 %v5188_v37  ;;  %652 = vst [vmem:[#allocation2 + $0x20] sm:$0x1] %v651_v50  ;;  %v519_v55 = vrot.slane %v515_v43, 4  ;;  %v523_v56 = vrot.slane %v521_v45, 7  ;;  %v533_v57 = vshll.u32 %v432_v42, 16  ;;  %s391_s27 = sand.u32 1, %s390_s2  ;;  %3991 = vmatpush3.bf16.msra.mxu1 %v4443_v27 }
  0xc9   : > { %v532_v58 = vrot.slane %v530_v53, 7  ;;  %v538_v59 = vshrl.u32 %v433_v47, 16  ;;  %s392_s29 = sadd.s32 32767, %s391_s27  ;;  %v654_v63 = vsel %vm5159_vm6, %v518_v54, %v653_v51  ;;  %v541_v0 = vshll.u32 %v433_v47, 16  ;;  %v660_v1 = vld [vmem:[#allocation2 + $0x30] sm:$0xf]  ;;  %4008 = vmatprep.subr.bf16.mxu1 %v5216_v2 }
  0xca   : > { %v526_v61 = vor.u32 %v524_v46, %v523_v56  ;;  %v528_v62 = vrot.slane %v523_v56, 4  ;;  %s393_s26 = sadd.s32 %s392_s29, %s5176_s4  ;;  %655 = vst [vmem:[#allocation2 + $0x24] sm:$0xf] %v654_v63  ;;  %v664_v7 = vld [vmem:[#allocation2 + $0x38] sm:$0x1]  ;;  %vm1371_vm14 = vcmask 1046532  }
  0xcb   : > { %v535_v3 = vor.u32 %v533_v57, %v532_v58  ;;  %v536_v5 = vrot.slane %v532_v58, 4  ;;  %v540_v6 = vrot.slane %v538_v59, 7  ;;  %s394_s28 = sand.u32 4294901760, %s393_s26  ;;  %v726_v8 = vld [vmem:[#allocation2 + $0xc] sm:$0x1]  ;;  %vm5373_vm15 = vmor %vm1370_vm13, %vm1371_vm14  ;;  %s5379_s27 = sadd.s32 8, %s3645_s21 }
  0xcc   : > { %v757_v9 = vld [vmem:[#allocation2 + $0x14] sm:$0x1]  ;;  %vm820_vm9 = vsmask.f32 3328  ;;  %v5218_v10 = vld [vmem:[#allocation2 + $0x10] sm:$0xf]  ;;  %v527_v11 = vsel %vm5149_vm5, %v519_v55, %v526_v61  ;;  %v658_v13 = vsel %vm5165_vm7, %v528_v62, %v657_v52 }
  0xcd   : > { %v727_v14 = vsel %vm5165_vm7, 0, %v726_v8  ;;  %v758_v15 = vsel %vm5206_vm8, 0, %v757_v9  ;;  %v1854_v16 = vshll.u32 %v5218_v10, 16  ;;  %v1858_v17 = vshrl.u32 %v5218_v10, 16  ;;  %656 = vst.msk [vmem:[#allocation2 + $0x28] sm:$0xf] %vm465_vm3, %v527_v11 }
  0xce   : > { %659 = vst [vmem:[#allocation2 + $0x2c] sm:$0x1] %v658_v13  ;;  %s6514_s28 = smov (%p389_p9, %s394_s28), 2143289344  ;;  %728 = vst [vmem:[#allocation2 + $0xc] sm:$0x1] %v727_v14  ;;  %v543_v19 = vor.u32 %v541_v0, %v540_v6  ;;  %v545_v20 = vrot.slane %v540_v6, 4  ;;  %v661_v21 = vsel %vm5159_vm6, %v535_v3, %v660_v1 }
  0xcf   : > { %759 = vst [vmem:[#allocation2 + $0x14] sm:$0x1] %v758_v15  ;;  %vm821_vm10 = vsmask.f32 7440  ;;  %v5239_v22 = vrot.slane %v1854_v16, 5  ;;  %v1860_v23 = vrot.slane %v1858_v17, 4 }
  0xd0   : > { %v729_v24 = vld [vmem:[#allocation2 + $0x18] sm:$0x1]  ;;  %v760_v25 = vld [vmem:[#allocation2 + $0x20] sm:$0x1]  ;;  %662 = vst [vmem:[#allocation2 + $0x30] sm:$0xf] %v661_v21  ;;  %v544_v29 = vsel %vm5149_vm5, %v536_v5, %v543_v19  ;;  %v665_v30 = vsel %vm5165_vm7, %v545_v20, %v664_v7  ;;  %vm5291_vm12 = vmor %vm820_vm9, %vm821_vm10 }
  0xd1   : > { %v730_v26 = vsel %vm5165_vm7, 0, %v729_v24  ;;  %v761_v27 = vsel %vm5206_vm8, 0, %v760_v25  ;;  %v5245_v28 = vld [vmem:[#allocation2 + $0x1c] sm:$0xf]  ;;  %v383_v31 = vld [vmem:[%s325_s10] sm:$0xf]  ;;  %v1861_v32 = vor.u32 %v1860_v23, %v5239_v22 }
  0xd2   : > { %s397_s22 = sshrl.u32 %s6514_s28, 16  ;;  %731 = vst [vmem:[#allocation2 + $0x18] sm:$0x1] %v730_v26  ;;  %762 = vst [vmem:[#allocation2 + $0x20] sm:$0x1] %v761_v27  ;;  %v1878_v33 = vshll.u32 %v5245_v28, 16 }
  0xd3   : > { %v1882_v34 = vshrl.u32 %v5245_v28, 16  ;;  %v2250_v35 = vrot.slane %v5245_v28, 5  ;;  %663 = vst.msk [vmem:[#allocation2 + $0x34] sm:$0xf] %vm465_vm3, %v544_v29  ;;  %666 = vst [vmem:[#allocation2 + $0x38] sm:$0x1] %v665_v30 }
  0xd4   : > { %s398_s4 = sshll.u32 %s397_s22, 16  ;;  %v732_v36 = vld [vmem:[#allocation2 + $0x24] sm:$0x1]  ;;  %v5261_v38 = vld [vmem:[#allocation2 + $0x10] sm:$0xf]  ;;  %v5263_v39 = vrot.slane %v1861_v32, 4 }
  0xd5   : > { %s5259_s30 = sor.u32 %s398_s4, %s397_s22  ;;  %v2243_v40 = vrot.slane %v5218_v10, 5  ;;  %v5266_v41 = vrot.slane %v1878_v33, 5  ;;  %v1884_v42 = vrot.slane %v1882_v34, 4  ;;  %v384_v43 = vld [vmem:[%s325_s10 + $0x4] sm:$0xf]  ;;  %v5272_v44 = vrot.slane %v2250_v35, 4 }
  0xd6   : > { %v733_v45 = vsel %vm5165_vm7, 0, %v732_v36  ;;  %v763_v46 = vld [vmem:[#allocation2 + $0x2c] sm:$0x1]  ;;  %v5276_v47 = vld [vmem:[#allocation2 + $0x28] sm:$0xf]  ;;  %v400_v48 = vstv %s5259_s30  ;;  %v857_v59 = vshll.u32 %v5261_v38, 16 }
  0xd7   : > { %v1820_v49 = vld [vmem:[#allocation2 + $0xc] sm:$0xf]  ;;  %v5279_v50 = vld [vmem:[#allocation2 + $0x14] sm:$0x1]  ;;  %v1885_v51 = vor.u32 %v1884_v42, %v5266_v41  ;;  %734 = vst [vmem:[#allocation2 + $0x24] sm:$0x1] %v733_v45  ;;  %v5285_v54 = vmul.bf16 %v400_v48, %v383_v31  ;;  %v5300_v8 = vmul.bf16 %v400_v48, %v384_v43 }
  0xd8   : > { %v764_v52 = vsel %vm5206_vm8, 0, %v763_v46  ;;  %v1902_v53 = vshll.u32 %v5276_v47, 16  ;;  %v1845_v55 = vshrl.u32 %v1820_v49, 16  ;;  %v1848_v56 = vshll.u32 %v1820_v49, 16  ;;  %v735_v58 = vld [vmem:[#allocation2 + $0x30] sm:$0x1] }
  0xd9   : > { %v1864_v57 = vshll.u32 %v5279_v50, 16  ;;  %765 = vst [vmem:[#allocation2 + $0x2c] sm:$0x1] %v764_v52  ;;  %v1886_v62 = vrot.slane %v1885_v51, 4  ;;  %v1906_v0 = vshrl.u32 %v5276_v47, 16  ;;  %v736_v1 = vsel %vm5165_vm7, 0, %v735_v58 }
  0xda   : > { %v5295_v63 = vrot.slane %v1902_v53, 5  ;;  %v1847_v3 = vrot.slane %v1845_v55, 4  ;;  %v1850_v5 = vrot.slane %v1848_v56, 5  ;;  %v1823_v7 = vld [vmem:[#allocation2 + $0x18] sm:$0xf]  ;;  %v446_v15 = vshrl.u32 %v5285_v54, 16 }
  0xdb   : > { %v1866_v6 = vrot.slane %v1864_v57, 5  ;;  %737 = vst [vmem:[#allocation2 + $0x30] sm:$0x1] %v736_v1  ;;  %v5302_v9 = vld [vmem:[#allocation2 + $0x20] sm:$0x1]  ;;  %v1869_v11 = vshrl.u32 %v1823_v7, 16 }
  0xdc   : > { %v1872_v13 = vshll.u32 %v1823_v7, 16  ;;  %v1908_v14 = vrot.slane %v1906_v0, 4  ;;  %v1851_v16 = vor.u32 %v1850_v5, %v1847_v3  ;;  %v1888_v19 = vshll.u32 %v5302_v9, 16  ;;  %v766_v21 = vld [vmem:[#allocation2 + $0x38] sm:$0x1]  ;;  %p407_p7 = scmp.le.s32.totalorder %s5379_s27, 31 }
  0xdd   : > { %v1867_v17 = vsel %vm5291_vm12, %v5263_v39, %v1866_v6  ;;  %v2253_v20 = vrot.slane %v5302_v9, 5  ;;  %v5310_v23 = vld [vmem:[#allocation2 + $0x34] sm:$0xf]  ;;  %v1871_v24 = vrot.slane %v1869_v11, 4  ;;  %v767_v27 = vsel %vm5206_vm8, 0, %v766_v21  ;;  %s6226_s11 = scalar_lea.vmem [#allocation9], %s3641_s8 }
  0xde   : > { %v1874_v25 = vrot.slane %v1872_v13, 5  ;;  %v1909_v26 = vor.u32 %v1908_v14, %v5295_v63  ;;  %v1852_v29 = vrot.slane %v1851_v16, 4  ;;  %v1890_v30 = vrot.slane %v1888_v19, 5  ;;  %v1826_v31 = vld [vmem:[#allocation2 + $0x24] sm:$0xf]  ;;  %s6479_s8 = sld [smem:[#allocation17_spill]] }
  0xdf   : > { %768 = vst [vmem:[#allocation2 + $0x38] sm:$0x1] %v767_v27  ;;  %v1926_v32 = vshll.u32 %v5310_v23, 16  ;;  %v1930_v33 = vshrl.u32 %v5310_v23, 16  ;;  %v1893_v39 = vshrl.u32 %v1826_v31, 16  ;;  %v1896_v42 = vshll.u32 %v1826_v31, 16 }
  0xe0   : > { %v1875_v34 = vor.u32 %v1874_v25, %v1871_v24  ;;  %v5317_v36 = vld [vmem:[#allocation2 + $0x2c] sm:$0x1]  ;;  %v1910_v43 = vrot.slane %v1909_v26, 4  ;;  %v1857_v45 = vsel %vm5291_vm12, %v1852_v29, %v5239_v22  ;;  %v1891_v46 = vsel %vm5291_vm12, %v1886_v62, %v1890_v30  ;;  %v468_v6 = vld [vmem:[#allocation2] sm:$0xf]  ;;  %s3897_s3 = sshll.u32 %s6444_s7, 4 }
  0xe1   : > { %v1912_v48 = vshll.u32 %v5317_v36, 16  ;;  %v1928_v49 = vrot.slane %v1926_v32, 5  ;;  %v3738_v51 = vcombine.low %v1857_v45, %v1867_v17  ;;  %v1895_v53 = vrot.slane %v1893_v39, 4  ;;  %v5332_v16 = vld [vmem:[#allocation2 + $0xc] sm:$0xf]  ;;  %v4446_v17 = vld [vmem:[%s6446_s12 + $0x58] sm:$0xff]  }
  0xe2   : > { %v1876_v52 = vrot.slane %v1875_v34, 4  ;;  %v1898_v55 = vrot.slane %v1896_v42, 5  ;;  %v1829_v56 = vld [vmem:[#allocation2 + $0x30] sm:$0xf]  ;;  %v1932_v1 = vrot.slane %v1930_v33, 4  ;;  %v448_v3 = vrot.slane %v446_v15, 7 }
  0xe3   : > { %v1914_v57 = vrot.slane %v1912_v48, 5  ;;  %v1917_v58 = vshrl.u32 %v1829_v56, 16  ;;  %v1920_v0 = vshll.u32 %v1829_v56, 16  ;;  %4072 = vmatprep.mubr.msk.bf16.mxu0 %vm1051_vm11, %v3738_v51  ;;  %v449_v5 = vshll.u32 %v5285_v54, 16  ;;  %v475_v32 = vld [vmem:[#allocation2 + $0x8] sm:$0x1] }
  0xe4   : > { %v1881_v22 = vsel %vm5291_vm12, %v1876_v52, %v5266_v41  ;;  %v1899_v62 = vor.u32 %v1898_v55, %v1895_v53  ;;  %v1933_v41 = vor.u32 %v1932_v1, %v1928_v49  ;;  %v452_v24 = vrot.slane %v448_v3, 4  ;;  %v5349_v33 = vld [vmem:[#allocation2 + $0x14] sm:$0x1]  ;;  %v2210_v52 = vld [vmem:[#allocation2 + $0x18] sm:$0xe]  ;;  %s3459_s2 = scalar_lea.sflag [#allocation5], %s5104_s5 }
  0xe5   : > { %v3739_v7 = vcombine.low %v1881_v22, %v1891_v46  ;;  %v1915_v11 = vsel %vm5291_vm12, %v1910_v43, %v1914_v57  ;;  %v1919_v13 = vrot.slane %v1917_v58, 4  ;;  %v1922_v14 = vrot.slane %v1920_v0, 5  ;;  %v5363_v53 = vld [vmem:[#allocation2 + $0x18] sm:$0xf]  ;;  %v5420_v10 = vld [vmem:[#allocation2 + $0x28] sm:$0xf] }
  0xe6   : > { %v1900_v19 = vrot.slane %v1899_v62, 4  ;;  %v5337_v21 = vld [vmem:[#allocation2 + $0x38] sm:$0x1]  ;;  %v451_v15 = vor.u32 %v449_v5, %v448_v3  ;;  %v454_v26 = vshrl.u32 %v5300_v8, 16  ;;  %v457_v27 = vshll.u32 %v5300_v8, 16  ;;  %p6481_p0 = scmp.ne.s32.totalorder %s6422_s16, 0 }
  0xe7   : > { %4073 = vmatmul.mubr.msk.bf16.vlgmr.msra.gmra.mrb[0].mxu0 %vm1051_vm11, %v3739_v7  ;;  %v1923_v54 = vor.u32 %v1922_v14, %v1919_v13  ;;  %v1936_v25 = vshll.u32 %v5337_v21, 16  ;;  %v1934_v30 = vrot.slane %v1933_v41, 4  ;;  %v848_v34 = vshrl.u32 %v5332_v16, 16  ;;  %v2209_v8 = vld [vmem:[#allocation2 + $0xc] sm:$0xe] }
  0xe8   : > { %v1905_v29 = vsel %vm5291_vm12, %v1900_v19, %v5295_v63  ;;  %4089 = vmatpush3.bf16.msra.mxu0 %v5188_v37  ;;  %v469_v31 = vsel %vm5159_vm6, %v451_v15, %v468_v6  ;;  %v456_v45 = vrot.slane %v454_v26, 7  ;;  %v5355_v63 = vld [vmem:[%s6446_s12 + $0x60] sm:$0xff]   ;;  %v851_v46 = vshll.u32 %v5332_v16, 16  ;;  %v5391_v14 = vld [vmem:[#allocation2 + $0x1c] sm:$0xf] }
  0xe9   : > { %v3740_v39 = vcombine.low %v1905_v29, %v1915_v11  ;;  %v1924_v42 = vrot.slane %v1923_v54, 4  ;;  %v1938_v43 = vrot.slane %v1936_v25, 5  ;;  %470 = vst [vmem:[#allocation2] sm:$0xf] %v469_v31  ;;  %4090 = vmatprep.subr.bf16.mxu0 %v4446_v17  ;;  %v850_v37 = vrot.slane %v848_v34, 4 }
  0xea   : > { %v5360_v48 = vrot.slane %v857_v59, 5  ;;  %v861_v51 = vshrl.u32 %v5261_v38, 16  ;;  %v459_v57 = vor.u32 %v457_v27, %v456_v45  ;;  %v461_v58 = vrot.slane %v456_v45, 4  ;;  %v5401_v41 = vld [vmem:[#allocation2 + $0x20] sm:$0x1] }
  0xeb   : > { %4076 = vmatprep.mubr.msk.bf16.mxu0 %vm1051_vm11, %v3740_v39  ;;  %v1929_v55 = vsel %vm5291_vm12, %v1924_v42, %v1928_v49  ;;  %v1939_v56 = vsel %vm5291_vm12, %v1934_v30, %v1938_v43  ;;  %v853_v1 = vrot.slane %v851_v46, 5  ;;  %v867_v59 = vshll.u32 %v5349_v33, 16  ;;  %v5418_v30 = vld [vmem:[#allocation2 + $0x24] sm:$0xf]  ;;  %s5429_s21 = scalar_select %p407_p7, 1, 0 }
  0xec   : > { %v3741_v0 = vcombine.low %v1929_v55, %v1939_v56  ;;  %v863_v22 = vrot.slane %v861_v51, 4  ;;  %4091 = vmatpush3.bf16.msra.mxu0 %v4446_v17  ;;  %v2246_v49 = vrot.slane %v5279_v50, 5  ;;  %v460_v3 = vsel %vm5149_vm5, %v452_v24, %v459_v57  ;;  %v4474_v4 = vld [vmem:[#allocation2 + $0x10] sm:$0xf] }
  0xed   : > { %v476_v5 = vsel %vm5165_vm7, %v461_v58, %v475_v32  ;;  %4108 = vmatprep.subr.bf16.mxu0 %v5355_v63  ;;  %472 = vst.msk [vmem:[#allocation2 + $0x4] sm:$0xf] %vm465_vm3, %v460_v3  ;;  %v854_v6 = vor.u32 %v853_v1, %v850_v37  ;;  %v5389_v11 = vrot.slane %v867_v59, 5  ;;  %v3756_v13 = vrot.slane %v2209_v8, 9  ;;  %v4450_v8 = vld [vmem:[%s6446_s12 + $0x68] sm:$0xff]   ;;  %s5469_s28 = scvt.s32.f32 %s5429_s21 }
  0xee   : > { %477 = vst [vmem:[#allocation2 + $0x8] sm:$0x1] %v476_v5  ;;  %v864_v7 = vor.u32 %v863_v22, %v5360_v48  ;;  %v2245_v50 = vrot.slane %v2243_v40, 4  ;;  %v3757_v17 = vrot.slane %v2210_v52, 9  ;;  %v2254_v19 = vsel %vm5373_vm15, %v5272_v44, %v2253_v20  ;;  %v5448_v1 = vld [vmem:[#allocation2 + $0x2c] sm:$0x1] }
  0xef   : > { %4077 = vmatmul.mubr.msk.bf16.gmra.mrb[4].mxu0 %vm1051_vm11, %v3741_v0  ;;  %v872_v15 = vshrl.u32 %v5363_v53, 16  ;;  %v855_v54 = vrot.slane %v854_v6, 4  ;;  %v2244_v26 = vsel %vm5373_vm15, %v3756_v13, %v2243_v40  ;;  %v875_v9 = vshll.u32 %v5363_v53, 16  ;;  %v2211_v13 = vld [vmem:[#allocation2 + $0x24] sm:$0xe]  ;;  %s412_s22 = sshrl.u32 %s5469_s28, 16  ;;  %p411_p6 = scmp.ne.f32.partialorder %s5469_s28, %s5469_s28 }
  0xf0   : > { %v723_v24 = vld [vmem:[#allocation2] sm:$0x1]  ;;  %v865_v25 = vrot.slane %v864_v7, 4  ;;  %v2247_v44 = vsel %vm5373_vm15, %v2245_v50, %v2246_v49  ;;  %v2251_v20 = vsel %vm5373_vm15, %v3757_v17, %v2250_v35  ;;  %v881_v39 = vshll.u32 %v5391_v14, 16  ;;  %s5504_s4 = sand.u32 1, %s412_s22  ;;  %s3475_s22 = sshll.u32 %s6226_s11, 4  ;;  %s6269_s22 = int_to_ptr.vmem [resolvable:$true] %s3475_s22 }
  0xf1   : > { %v724_v27 = vsel %vm5165_vm7, 0, %v723_v24  ;;  %v874_v29 = vrot.slane %v872_v15, 4  ;;  %v860_v40 = vsel %vm5291_vm12, %v855_v54, %v5360_v48  ;;  %v3764_v31 = vcombine.low %v2244_v26, %v2247_v44  ;;  %v5463_v54 = vld [vmem:[%s6446_s12 + $0x70] sm:$0xff]   ;;  %s414_s10 = sadd.s32 32767, %s5504_s4 }
  0xf2   : > { %725 = vst [vmem:[#allocation2] sm:$0x1] %v724_v27  ;;  %v3765_v32 = vcombine.low %v2251_v20, %v2254_v19  ;;  %v877_v34 = vrot.slane %v875_v9, 5  ;;  %v885_v28 = vshrl.u32 %v5391_v14, 16  ;;  %v891_v35 = vshll.u32 %v5401_v41, 16  ;;  %s5545_s27 = sadd.s32 %s414_s10, %s5469_s28  ;;  %s3876_s28 = sshll.u32 %s6479_s8, 6 }
  0xf3   : > { %4092 = vmatprep.mubr.msk.bf16.mxu0 %vm1051_vm11, %v3764_v31  ;;  %v896_v42 = vshrl.u32 %v5418_v30, 16  ;;  %v899_v43 = vshll.u32 %v5418_v30, 16  ;;  %v905_v45 = vshll.u32 %v5420_v10, 16  ;;  %v870_v48 = vsel %vm5291_vm12, %v865_v25, %v5389_v11  ;;  %v2212_v31 = vld [vmem:[#allocation2 + $0x30] sm:$0xe]  ;;  %s416_s21 = sand.u32 4294901760, %s5545_s27  ;;  %s3472_s7 = sadd.s32 %s3897_s3, %s3876_s28 }
  0xf4   : > { %v5439_v46 = vld [vmem:[#allocation2 + $0x4] sm:$0xf]  ;;  %v878_v51 = vor.u32 %v877_v34, %v874_v29  ;;  %v883_v52 = vrot.slane %v881_v39, 5  ;;  %v887_v55 = vrot.slane %v885_v28, 4  ;;  %v893_v0 = vrot.slane %v891_v35, 5  ;;  %s6516_s21 = smov (%p411_p6, %s416_s21), 2143289344 }
  0xf5   : > { %v754_v37 = vld [vmem:[#allocation2 + $0x8] sm:$0x1]  ;;  %v833_v57 = vshll.u32 %v5439_v46, 16  ;;  %v837_v58 = vshrl.u32 %v5439_v46, 16  ;;  %v898_v49 = vrot.slane %v896_v42, 4  ;;  %v901_v3 = vrot.slane %v899_v43, 5 }
  0xf6   : > { %v755_v56 = vsel %vm5206_vm8, 0, %v754_v37  ;;  %v879_v22 = vrot.slane %v878_v51, 4  ;;  %v888_v59 = vor.u32 %v887_v55, %v883_v52  ;;  %v907_v7 = vrot.slane %v905_v45, 5  ;;  %v5475_v35 = vld [vmem:[#allocation2 + $0x30] sm:$0xf]  ;;  %s3877_s4 = sshll.u32 %s3472_s7, 6 }
  0xf7   : > { %756 = vst [vmem:[#allocation2 + $0x8] sm:$0x1] %v755_v56  ;;  %4093 = vmatmul.mubr.msk.bf16.vlgmr.msra.gmra.mrb[0].mxu0 %vm1051_vm11, %v3765_v32  ;;  %v5451_v5 = vrot.slane %v833_v57, 5  ;;  %v839_v6 = vrot.slane %v837_v58, 4  ;;  %v909_v11 = vshrl.u32 %v5420_v10, 16  ;;  %v902_v15 = vor.u32 %v901_v3, %v898_v49  ;;  %s6480_s10 = sld [smem:[#allocation34_spill]] }
  0xf8   : > { %4109 = vmatpush3.bf16.msra.mxu0 %v5355_v63  ;;  %v884_v17 = vsel %vm5291_vm12, %v879_v22, %v883_v52  ;;  %v889_v19 = vrot.slane %v888_v59, 4  ;;  %v915_v24 = vshll.u32 %v5448_v1, 16  ;;  %v5471_v27 = vcombine.low %v860_v40, %v870_v48  ;;  %v5492_v57 = vld [vmem:[#allocation2 + $0x34] sm:$0xf]  ;;  %v434_v59 = vld [vmem:[%s5110_s9 + $0x20] sm:$0xf] }
  0xf9   : > { %v5455_v50 = vld [vmem:[#allocation2] sm:$0xf]  ;;  %4110 = vmatprep.subr.bf16.mxu0 %v4450_v8  ;;  %v840_v63 = vor.u32 %v839_v6, %v5451_v5  ;;  %v911_v9 = vrot.slane %v909_v11, 4  ;;  %v903_v20 = vrot.slane %v902_v15, 4  ;;  %v3758_v29 = vrot.slane %v2211_v13, 9  ;;  %s4569_s27 = scalar_lea.vmem %s6269_s22, 1024 }
  0xfa   : > { %v824_v25 = vshrl.u32 %v5455_v50, 16  ;;  %v827_v26 = vshll.u32 %v5455_v50, 16  ;;  %v894_v44 = vsel %vm5291_vm12, %v889_v19, %v893_v0  ;;  %v917_v28 = vrot.slane %v915_v24, 5  ;;  %v435_v49 = vld [vmem:[%s5110_s9 + $0x24] sm:$0xf]  ;;  %p4570_p4 = scmp.ne.s32.totalorder %s6269_s22, %s4569_s27 }
  0xfb   : > { %v841_v39 = vrot.slane %v840_v63, 4  ;;  %v5477_v42 = vcombine.low %v884_v17, %v894_v44  ;;  %v912_v43 = vor.u32 %v911_v9, %v907_v7  ;;  %v2257_v40 = vrot.slane %v5276_v47, 5  ;;  %v5516_v24 = vld [vmem:[%s5110_s9 + $0x28] sm:$0xf]  ;;  %v437_v44 = vld [vmem:[%s5110_s9 + $0x2c] sm:$0xf] }
  0xfc   : > { %v826_v32 = vrot.slane %v824_v25, 4  ;;  %v829_v34 = vrot.slane %v827_v26, 5  ;;  %4111 = vmatpush3.bf16.msra.mxu0 %v4450_v8  ;;  %v2260_v45 = vrot.slane %v5317_v36, 5  ;;  %v3759_v51 = vrot.slane %v2212_v31, 9  ;;  %p4571_p12 = pnand %p4570_p4, %p6481_p0 }
  0xfd   : > { %4128 = vmatprep.subr.bf16.mxu0 %v5463_v54  ;;  %v2264_v52 = vrot.slane %v5310_v23, 5  ;;  %v2267_v55 = vrot.slane %v5337_v21, 5  ;;  %v908_v47 = vsel %vm5291_vm12, %v903_v20, %v907_v7  ;;  %v913_v56 = vrot.slane %v912_v43, 4  ;;  %v5496_v21 = vld [vmem:[#allocation2 + $0x38] sm:$0x1]  ;;  %s6276_s18 = scalar_lea.hbm %s6480_s10, %s3877_s4 }
  0xfe   : > { %v5482_v37 = vld [vmem:[#allocation2 + $0x8] sm:$0x1]  ;;  %v830_v48 = vor.u32 %v829_v34, %v826_v32  ;;  %v2258_v36 = vsel %vm5373_vm15, %v3758_v29, %v2257_v40  ;;  %v2259_v0 = vrot.slane %v2257_v40, 4  ;;  %v920_v7 = vshrl.u32 %v5475_v35, 16  ;;  %p4572_p11 = pneg %p4571_p12 }
  0xff   : > { %v843_v8 = vshll.u32 %v5482_v37, 16  ;;  %v2265_v23 = vsel %vm5373_vm15, %v3759_v51, %v2264_v52  ;;  %v2266_v22 = vrot.slane %v2264_v52, 4  ;;  %v918_v6 = vsel %vm5291_vm12, %v913_v56, %v917_v28  ;;  %v667_v52 = vld [vmem:[#allocation2 + $0x3c] sm:$0xf]  ;;  %v671_v56 = vld [vmem:[#allocation2 + $0x44] sm:$0x1] }
 0x100   : > { %v831_v58 = vrot.slane %v830_v48, 4  ;;  %v923_v11 = vshll.u32 %v5475_v35, 16  ;;  %v5509_v17 = vcombine.low %v908_v47, %v918_v6  ;;  %v2261_v19 = vsel %vm5373_vm15, %v2259_v0, %v2260_v45  ;;  %v674_v6 = vld [vmem:[#allocation2 + $0x48] sm:$0xf] }
 0x101   : > { %v845_v3 = vrot.slane %v843_v8, 5  ;;  %v2268_v15 = vsel %vm5373_vm15, %v2266_v22, %v2267_v55  ;;  %v3766_v26 = vcombine.low %v2258_v36, %v2261_v19  ;;  %v922_v9 = vrot.slane %v920_v7, 4  ;;  %v678_v7 = vld [vmem:[#allocation2 + $0x50] sm:$0x1] }
 0x102   : > { %v836_v13 = vsel %vm5291_vm12, %v831_v58, %v5451_v5  ;;  %v3767_v63 = vcombine.low %v2265_v23, %v2268_v15  ;;  %v4447_v5 = vld [vmem:[%s6446_s12 + $0x8] sm:$0xff]   ;;  %v925_v29 = vrot.slane %v923_v11, 5  ;;  %v929_v31 = vshll.u32 %v5492_v57, 16 }
 0x103   : > { %v846_v25 = vsel %vm5291_vm12, %v841_v39, %v845_v3  ;;  %v933_v32 = vshrl.u32 %v5492_v57, 16  ;;  %4096 = vmatprep.mubr.msk.bf16.mxu0 %vm1051_vm11, %v3766_v26  ;;  %v939_v34 = vshll.u32 %v5496_v21, 16  ;;  %v547_v39 = vshrl.u32 %v434_v59, 16  ;;  %v439_v11 = vld [vmem:[%s5110_s9 + $0x34] sm:$0xf] }
 0x104   : > { %v3646_v20 = vcombine.low %v836_v13, %v846_v25  ;;  %v550_v28 = vshll.u32 %v434_v59, 16  ;;  %v555_v43 = vshrl.u32 %v435_v49, 16  ;;  %4097 = vmatmul.mubr.msk.bf16.gmra.mrb[4].mxu0 %vm1051_vm11, %v3767_v63  ;;  %v926_v40 = vor.u32 %v925_v29, %v922_v9  ;;  %v438_v59 = vld [vmem:[%s5110_s9 + $0x30] sm:$0xf] }
 0x105   : > { %v931_v45 = vrot.slane %v929_v31, 5  ;;  %v935_v48 = vrot.slane %v933_v32, 4  ;;  %v558_v51 = vshll.u32 %v435_v49, 16  ;;  %v941_v55 = vrot.slane %v939_v34, 5  ;;  %v440_v34 = vld [vmem:[%s5110_s9 + $0x38] sm:$0xf] }
 0x106   : > { %3992 = vmatprep.mubr.msk.bf16.mxu1 %vm1051_vm11, %v3646_v20  ;;  %v549_v8 = vrot.slane %v547_v39, 7  ;;  %v557_v47 = vrot.slane %v555_v43, 7  ;;  %v564_v36 = vshrl.u32 %v5516_v24, 16  ;;  %v927_v58 = vrot.slane %v926_v40, 4 }
 0x107   : > { %3993 = vmatmul.mubr.msk.bf16.vlgmr.msra.gmra.mrb[0].mxu1 %vm1051_vm11, %v5471_v27  ;;  %v936_v0 = vor.u32 %v935_v48, %v931_v45  ;;  %v567_v23 = vshll.u32 %v5516_v24, 16  ;;  %v572_v22 = vshrl.u32 %v437_v44, 16  ;;  %v5542_v27 = vld [vmem:[%s6446_s12 + $0x20] sm:$0xff]   ;;  %v575_v9 = vshll.u32 %v437_v44, 16 }
 0x108   : > { %4009 = vmatpush3.bf16.msra.mxu1 %v5216_v2  ;;  %3996 = vmatprep.mubr.msk.bf16.mxu1 %vm1051_vm11, %v5477_v42  ;;  %v552_v2 = vor.u32 %v550_v28, %v549_v8  ;;  %v553_v49 = vrot.slane %v549_v8, 4  ;;  %v560_v3 = vor.u32 %v558_v51, %v557_v47  ;;  %v562_v42 = vrot.slane %v557_v47, 4 }
 0x109   : > { %4010 = vmatprep.subr.bf16.mxu1 %v4447_v5  ;;  %v932_v13 = vsel %vm5291_vm12, %v927_v58, %v931_v45  ;;  %v937_v19 = vrot.slane %v936_v0, 4  ;;  %v566_v15 = vrot.slane %v564_v36, 7  ;;  %v574_v24 = vrot.slane %v572_v22, 7  ;;  %v681_v58 = vld [vmem:[#allocation2 + $0x54] sm:$0xf] }
 0x10a   : > { %v561_v25 = vsel %vm5149_vm5, %v553_v49, %v560_v3  ;;  %v668_v26 = vsel %vm5159_vm6, %v552_v2, %v667_v52  ;;  %v672_v63 = vsel %vm5165_vm7, %v562_v42, %v671_v56  ;;  %v581_v43 = vshrl.u32 %v438_v59, 16  ;;  %v441_v52 = vld [vmem:[%s5110_s9 + $0x3c] sm:$0xf]  ;;  %s419_s9 = sshrl.u32 %s6516_s21, 16  ;;  %s4730_s21 = smov [#allocation9]  }
 0x10b   : > { %v942_v20 = vsel %vm5291_vm12, %v937_v19, %v941_v55  ;;  %669 = vst [vmem:[#allocation2 + $0x3c] sm:$0xf] %v668_v26  ;;  %670 = vst.msk [vmem:[#allocation2 + $0x40] sm:$0xf] %vm465_vm3, %v561_v25  ;;  %v569_v29 = vor.u32 %v567_v23, %v566_v15  ;;  %v570_v31 = vrot.slane %v566_v15, 4  ;;  %v579_v32 = vrot.slane %v574_v24, 4 }
 0x10c   : > { %673 = vst [vmem:[#allocation2 + $0x44] sm:$0x1] %v672_v63  ;;  %4011 = vmatpush3.bf16.msra.mxu1 %v4447_v5  ;;  %v3650_v39 = vcombine.low %v932_v13, %v942_v20  ;;  %v577_v28 = vor.u32 %v575_v9, %v574_v24  ;;  %v584_v44 = vshll.u32 %v438_v59, 16  ;;  %v589_v48 = vshrl.u32 %v439_v11, 16  ;;  %s420_s29 = sshll.u32 %s419_s9, 16 }
 0x10d   : > { %4028 = vmatprep.subr.bf16.mxu1 %v5542_v27  ;;  %v675_v40 = vsel %vm5159_vm6, %v569_v29, %v674_v6  ;;  %v679_v45 = vsel %vm5165_vm7, %v579_v32, %v678_v7  ;;  %v592_v51 = vshll.u32 %v439_v11, 16  ;;  %v583_v55 = vrot.slane %v581_v43, 7  ;;  %v688_v6 = vld [vmem:[#allocation2 + $0x60] sm:$0xf]  ;;  %s5620_s26 = sor.u32 %s420_s29, %s419_s9  ;;  %s4573_s9 = sshll.u32 %s4730_s21, 4  ;;  %s4574_s9 = int_to_ptr.vmem [resolvable:$false] %s4573_s9 }
 0x10e   : > { %v578_v5 = vsel %vm5149_vm5, %v570_v31, %v577_v28  ;;  %676 = vst [vmem:[#allocation2 + $0x48] sm:$0xf] %v675_v40  ;;  %680 = vst [vmem:[#allocation2 + $0x50] sm:$0x1] %v679_v45  ;;  %v598_v8 = vshrl.u32 %v440_v34, 16  ;;  %v601_v47 = vshll.u32 %v440_v34, 16  ;;  %p4576_p2 = scmp.lt.s32.totalorder %s6269_s22, %s4574_s9 }
 0x10f   : > { %3997 = vmatmul.mubr.msk.bf16.gmra.mrb[4].mxu1 %vm1051_vm11, %v5509_v17  ;;  %677 = vst.msk [vmem:[#allocation2 + $0x4c] sm:$0xf] %vm465_vm3, %v578_v5  ;;  %v591_v36 = vrot.slane %v589_v48, 7  ;;  %v586_v0 = vor.u32 %v584_v44, %v583_v55  ;;  %v587_v23 = vrot.slane %v583_v55, 4  ;;  %v685_v17 = vld [vmem:[#allocation2 + $0x5c] sm:$0x1] }
 0x110   : > { %4000 = vmatprep.mubr.msk.bf16.mxu1 %vm1051_vm11, %v3650_v39  ;;  %v600_v22 = vrot.slane %v598_v8, 7  ;;  %v606_v59 = vshrl.u32 %v441_v52, 16  ;;  %v609_v42 = vshll.u32 %v441_v52, 16  ;;  %s4575_s29 = scalar_lea.vmem %s4574_s9, 2048 }
 0x111   : > { %v594_v49 = vor.u32 %v592_v51, %v591_v36  ;;  %v596_v3 = vrot.slane %v591_v36, 4  ;;  %v682_v19 = vsel %vm5159_vm6, %v586_v0, %v681_v58  ;;  %p4577_p1 = scmp.lt.s32.totalorder %s4575_s29, %s4569_s27 }
 0x112   : > { %v738_v7 = vld [vmem:[#allocation2 + $0x3c] sm:$0x1]  ;;  %v5583_v13 = vld [vmem:[#allocation2 + $0x40] sm:$0xf]  ;;  %v603_v15 = vor.u32 %v601_v47, %v600_v22  ;;  %683 = vst [vmem:[#allocation2 + $0x54] sm:$0xf] %v682_v19 }
 0x113   : > { %v769_v11 = vld [vmem:[#allocation2 + $0x44] sm:$0x1]  ;;  %v739_v24 = vsel %vm5165_vm7, 0, %v738_v7  ;;  %v953_v26 = vshll.u32 %v5583_v13, 16  ;;  %v957_v63 = vshrl.u32 %v5583_v13, 16  ;;  %v595_v31 = vsel %vm5149_vm5, %v587_v23, %v594_v49  ;;  %p4578_p5 = por %p4577_p1, %p4576_p2 }
 0x114   : > { %v770_v25 = vsel %vm5206_vm8, 0, %v769_v11  ;;  %v1833_v9 = vld [vmem:[#allocation2 + $0x40] sm:$0xf]  ;;  %740 = vst [vmem:[#allocation2 + $0x3c] sm:$0x1] %v739_v24  ;;  %v686_v32 = vsel %vm5165_vm7, %v596_v3, %v685_v17  ;;  %v5597_v34 = vrot.slane %v606_v59, 7  ;;  %v689_v52 = vsel %vm5159_vm6, %v603_v15, %v688_v6 }
 0x115   : > { %771 = vst [vmem:[#allocation2 + $0x44] sm:$0x1] %v770_v25  ;;  %v2213_v20 = vld [vmem:[#allocation2 + $0x3c] sm:$0xe]  ;;  %v2271_v29 = vrot.slane %v1833_v9, 5  ;;  %v5599_v39 = vrot.slane %v953_v26, 5  ;;  %p4579_p8 = pnand %p4578_p5, %p4572_p11 }
 0x116   : > { %v959_v28 = vrot.slane %v957_v63, 4  ;;  %v772_v43 = vld [vmem:[#allocation2 + $0x50] sm:$0x1]  ;;  %684 = vst.msk [vmem:[#allocation2 + $0x58] sm:$0xf] %vm465_vm3, %v595_v31  ;;  %v604_v44 = vrot.slane %v600_v22, 4  ;;  %v611_v51 = vor.u32 %v609_v42, %v5597_v34  ;;  %v422_v63 = vstv %s5620_s26 }
 0x117   : > { %687 = vst [vmem:[#allocation2 + $0x5c] sm:$0x1] %v686_v32  ;;  %v3760_v40 = vrot.slane %v2213_v20, 9  ;;  %v773_v45 = vsel %vm5206_vm8, 0, %v772_v43  ;;  %v5606_v48 = vld [vmem:[#allocation2 + $0x4c] sm:$0xf] }
 0x118   : > { %v960_v5 = vor.u32 %v959_v28, %v5599_v39  ;;  %774 = vst [vmem:[#allocation2 + $0x50] sm:$0x1] %v773_v45  ;;  %v2214_v55 = vld [vmem:[#allocation2 + $0x48] sm:$0xe]  ;;  %v741_v8 = vld [vmem:[#allocation2 + $0x48] sm:$0x1]  ;;  %v612_v11 = vsel %vm5149_vm5, %v604_v44, %v611_v51 }
 0x119   : > { %v5612_v47 = vld [vmem:[#allocation2 + $0x4c] sm:$0xf]  ;;  %690 = vst [vmem:[#allocation2 + $0x60] sm:$0xf] %v689_v52  ;;  %v2273_v58 = vrot.slane %v2271_v29, 4  ;;  %v742_v0 = vsel %vm5165_vm7, 0, %v741_v8  ;;  %v2272_v25 = vsel %vm5373_vm15, %v3760_v40, %v2271_v29 }
 0x11a   : > { %v977_v23 = vshll.u32 %v5612_v47, 16  ;;  %v1974_v17 = vshll.u32 %v5606_v48, 16  ;;  %v2278_v59 = vrot.slane %v5606_v48, 5  ;;  %743 = vst [vmem:[#allocation2 + $0x48] sm:$0x1] %v742_v0  ;;  %v981_v49 = vshrl.u32 %v5612_v47, 16 }
 0x11b   : > { %v961_v3 = vrot.slane %v960_v5, 4  ;;  %v3761_v42 = vrot.slane %v2214_v55, 9  ;;  %v744_v7 = vld [vmem:[#allocation2 + $0x54] sm:$0x1]  ;;  %v5630_v19 = vld [vmem:[#allocation2 + $0x3c] sm:$0xf] }
 0x11c   : > { %v5626_v6 = vrot.slane %v977_v23, 5  ;;  %v5632_v15 = vld [vmem:[#allocation2 + $0x44] sm:$0x1]  ;;  %691 = vst.msk [vmem:[#allocation2 + $0x64] sm:$0xf] %vm465_vm3, %v612_v11  ;;  %v944_v9 = vshrl.u32 %v5630_v19, 16 }
 0x11d   : > { %v1834_v24 = vld [vmem:[#allocation2 + $0x44] sm:$0x1]  ;;  %v404_v26 = vld [vmem:[%s334_s14] sm:$0xf]  ;;  %v947_v20 = vshll.u32 %v5630_v19, 16  ;;  %v963_v31 = vshll.u32 %v5632_v15, 16  ;;  %v2279_v23 = vsel %vm5373_vm15, %v3761_v42, %v2278_v59 }
 0x11e   : > { %v2274_v32 = vrot.slane %v1834_v24, 5  ;;  %v775_v28 = vld [vmem:[#allocation2 + $0x5c] sm:$0x1]  ;;  %v2280_v43 = vrot.slane %v2278_v59, 4  ;;  %v983_v44 = vrot.slane %v981_v49, 4  ;;  %v745_v45 = vsel %vm5165_vm7, 0, %v744_v7 }
 0x11f   : > { %v776_v29 = vsel %vm5206_vm8, 0, %v775_v28  ;;  %v5647_v40 = vld [vmem:[#allocation2 + $0x58] sm:$0xf]  ;;  %v946_v51 = vrot.slane %v944_v9, 4  ;;  %v949_v52 = vrot.slane %v947_v20, 5  ;;  %v965_v5 = vrot.slane %v963_v31, 5 }
 0x120   : > { %v2275_v55 = vsel %vm5373_vm15, %v2273_v58, %v2274_v32  ;;  %v5651_v8 = vld [vmem:[#allocation2 + $0x50] sm:$0x1]  ;;  %746 = vst [vmem:[#allocation2 + $0x54] sm:$0x1] %v745_v45  ;;  %777 = vst [vmem:[#allocation2 + $0x5c] sm:$0x1] %v776_v29  ;;  %v984_v11 = vor.u32 %v983_v44, %v5626_v6  ;;  %v5665_v32 = vmul.bf16 %v422_v63, %v404_v26 }
 0x121   : > { %v3768_v0 = vcombine.low %v2272_v25, %v2275_v55  ;;  %v2281_v49 = vrot.slane %v5651_v8, 5  ;;  %v5656_v7 = vld [vmem:[#allocation2 + $0x50] sm:$0x1]  ;;  %v950_v24 = vor.u32 %v949_v52, %v946_v51  ;;  %v5659_v9 = vld [vmem:[#allocation2 + $0x48] sm:$0xf]  ;;  %v1001_v58 = vshll.u32 %v5647_v40, 16 }
 0x122   : > { %v987_v20 = vshll.u32 %v5656_v7, 16  ;;  %v2215_v31 = vld [vmem:[#allocation2 + $0x54] sm:$0xe]  ;;  %v966_v59 = vsel %vm5291_vm12, %v961_v3, %v965_v5  ;;  %v968_v25 = vshrl.u32 %v5659_v9, 16  ;;  %v971_v28 = vshll.u32 %v5659_v9, 16 }
 0x123   : > { %4100 = vmatprep.mubr.msk.bf16.mxu0 %vm1051_vm11, %v3768_v0  ;;  %v2282_v42 = vsel %vm5373_vm15, %v2280_v43, %v2281_v49  ;;  %v5674_v44 = vld [vmem:[#allocation2 + $0x58] sm:$0xf]  ;;  %v951_v45 = vrot.slane %v950_v24, 4  ;;  %v985_v51 = vrot.slane %v984_v11, 4  ;;  %v1003_v2 = vrot.slane %v1001_v58, 5 }
 0x124   : > { %v3769_v29 = vcombine.low %v2279_v23, %v2282_v42  ;;  %v989_v26 = vrot.slane %v987_v20, 5  ;;  %v970_v52 = vrot.slane %v968_v25, 4  ;;  %v973_v55 = vrot.slane %v971_v28, 5  ;;  %v692_v5 = vld [vmem:[#allocation2 + $0x68] sm:$0x1] }
 0x125   : > { %v1005_v3 = vshrl.u32 %v5647_v40, 16  ;;  %v956_v43 = vsel %vm5291_vm12, %v951_v45, %v5599_v39  ;;  %v3762_v49 = vrot.slane %v2215_v31, 9  ;;  %v2285_v23 = vrot.slane %v5674_v44, 5  ;;  %v405_v11 = vld [vmem:[%s334_s14 + $0x4] sm:$0xf]  ;;  %s6478_s14 = sld [smem:[#allocation33_spill]] }
 0x126   : > { %4101 = vmatmul.mubr.msk.bf16.gmra.mrb[8].mxu0 %vm1051_vm11, %v3769_v29  ;;  %v990_v0 = vsel %vm5291_vm12, %v985_v51, %v989_v26  ;;  %v3651_v24 = vcombine.low %v956_v43, %v966_v59  ;;  %v974_v20 = vor.u32 %v973_v55, %v970_v52  ;;  %v613_v28 = vrot.slane %v5597_v34, 4 }
 0x127   : > { %v5686_v58 = vld [vmem:[#allocation2 + $0x54] sm:$0xf]  ;;  %v5688_v42 = vld [vmem:[#allocation2 + $0x5c] sm:$0x1]  ;;  %v1007_v25 = vrot.slane %v1005_v3, 4  ;;  %v2286_v59 = vsel %vm5373_vm15, %v3762_v49, %v2285_v23  ;;  %v2287_v52 = vrot.slane %v2285_v23, 4  ;;  %v425_v23 = vmul.bf16 %v422_v63, %v405_v11 }
 0x128   : > { %v992_v39 = vshrl.u32 %v5686_v58, 16  ;;  %v995_v45 = vshll.u32 %v5686_v58, 16  ;;  %v1011_v29 = vshll.u32 %v5688_v42, 16  ;;  %v5694_v31 = vld [vmem:[#allocation2 + $0x5c] sm:$0x1]  ;;  %4001 = vmatmul.mubr.msk.bf16.gmra.mrb[8].mxu1 %vm1051_vm11, %v3651_v24  ;;  %v975_v51 = vrot.slane %v974_v20, 4 }
 0x129   : > { %6459 = vst [vmem:[#allocation26_spill] sm:$0xff] %v5694_v31  ;;  %v1008_v26 = vor.u32 %v1007_v25, %v1003_v2  ;;  %v2288_v55 = vrot.slane %v5694_v31, 5  ;;  %v693_v36 = vsel %vm5165_vm7, %v613_v28, %v692_v5  ;;  %v747_v24 = vld [vmem:[#allocation2 + $0x60] sm:$0x1]  ;;  %v1346_v20 = vld [vmem:[#allocation2] sm:$0xe] }
 0x12a   : > { %v994_v34 = vrot.slane %v992_v39, 4  ;;  %v997_v3 = vrot.slane %v995_v45, 5  ;;  %v1013_v43 = vrot.slane %v1011_v29, 5  ;;  %v980_v56 = vsel %vm5291_vm12, %v975_v51, %v5626_v6  ;;  %694 = vst [vmem:[#allocation2 + $0x68] sm:$0x1] %v693_v36 }
 0x12b   : > { %v1009_v22 = vrot.slane %v1008_v26, 4  ;;  %v2289_v49 = vsel %vm5373_vm15, %v2287_v52, %v2288_v55  ;;  %v5711_v25 = vrot.slane %v1974_v17, 5  ;;  %v3652_v39 = vcombine.low %v980_v56, %v990_v0  ;;  %v1347_v28 = vld [vmem:[#allocation2 + $0xc] sm:$0xe]  ;;  %v6218_v61 = vld [vmem:[%s6478_s14] ss:$0 sm:$0xff] }
 0x12c   : > { %v998_v45 = vor.u32 %v997_v3, %v994_v34  ;;  %v3770_v5 = vcombine.low %v2286_v59, %v2289_v49  ;;  %v3664_v6 = vcombine.low %v5455_v50, %v5439_v46  ;;  %v6460_v29 = vshrl.u32 %v5606_v48, 16 }
 0x12d   : > { %4004 = vmatprep.mubr.msk.bf16.mxu1 %vm1051_vm11, %v3652_v39  ;;  %v1014_v63 = vsel %vm5291_vm12, %v1009_v22, %v1013_v43  ;;  %v748_v56 = vsel %vm5165_vm7, 0, %v747_v24  ;;  %v696_v17 = vshrl.u32 %v5665_v32, 16  ;;  %v699_v0 = vshll.u32 %v5665_v32, 16  ;;  %v716_v39 = vld [vmem:[#allocation2 + $0x6c] sm:$0xf] }
 0x12e   : > { %v1980_v51 = vrot.slane %v6460_v29, 4  ;;  %v999_v36 = vrot.slane %v998_v45, 4  ;;  %4104 = vmatprep.mubr.msk.bf16.mxu0 %vm1051_vm11, %v3770_v5  ;;  %749 = vst [vmem:[#allocation2 + $0x60] sm:$0x1] %v748_v56  ;;  %v704_v50 = vshrl.u32 %v425_v23, 16  ;;  %v707_v11 = vshll.u32 %v425_v23, 16 }
 0x12f   : > { %v3682_v59 = vrot.slane %v1346_v20, 9  ;;  %v1375_v26 = vrot.slane %v5439_v46, 5  ;;  %v3683_v52 = vrot.slane %v1347_v28, 9  ;;  %v698_v55 = vrot.slane %v696_v17, 7  ;;  %v5744_v45 = vld [vmem:[#allocation2 + $0x64] sm:$0xf] }
 0x130   : > { %v1004_v48 = vsel %vm5291_vm12, %v999_v36, %v1003_v2  ;;  %v706_v34 = vrot.slane %v704_v50, 7  ;;  %v6461_v3 = vrot.slane %v5261_v38, 5  ;;  %v1981_v49 = vor.u32 %v1980_v51, %v5711_v25  ;;  %6463 = vst [vmem:[#allocation27_spill] sm:$0xff] %v5744_v45 }
 0x131   : > { %v3653_v22 = vcombine.low %v1004_v48, %v1014_v63  ;;  %v778_v24 = vld [vmem:[#allocation2 + $0x68] sm:$0x1]  ;;  %v5733_v32 = vsel %vm5373_vm15, %v3682_v59, %v1375_v26  ;;  %v1377_v23 = vrot.slane %v1375_v26, 4  ;;  %v701_v5 = vor.u32 %v699_v0, %v698_v55  ;;  %v2216_v0 = vld [vmem:[#allocation2 + $0x60] sm:$0xe] }
 0x132   : > { %v1384_v43 = vrot.slane %v6461_v3, 4  ;;  %v6462_v2 = vmov %v6461_v3  ;;  %v779_v20 = vsel %vm5206_vm8, 0, %v778_v24  ;;  %v702_v28 = vrot.slane %v698_v55, 4  ;;  %v5782_v3 = vld [vmem:[#allocation2 + $0x1c] sm:$0xf] }
 0x133   : > { %v5739_v46 = vsel %vm5373_vm15, %v3683_v52, %v6462_v2  ;;  %4005 = vmatmul.mubr.msk.bf16.gmra.mrb[12].mxu1 %vm1051_vm11, %v3653_v22  ;;  %v709_v29 = vor.u32 %v707_v11, %v706_v34  ;;  %v1984_v51 = vshll.u32 %v5651_v8, 16  ;;  %780 = vst [vmem:[#allocation2 + $0x68] sm:$0x1] %v779_v20  ;;  %v711_v38 = vrot.slane %v706_v34, 4  ;;  %v720_v11 = vld [vmem:[#allocation2 + $0x74] sm:$0x1] }
 0x134   : > { %4012 = vmatprep.mubr.msk.bf16.mxu1 %vm1051_vm11, %v3664_v6  ;;  %v6464_v36 = vrot.slane %v5482_v37, 5  ;;  %v6465_v56 = vrot.slane %v5349_v33, 5  ;;  %v717_v6 = vsel %vm5159_vm6, %v701_v5, %v716_v39  ;;  %v2292_v33 = vrot.slane %v5744_v45, 5  ;;  %v4455_v52 = vld [vmem:[%s6446_s12 + $0x28] sm:$0xff]   ;;  %v2689_v22 = vld [vmem:[#allocation2 + $0x18] sm:$0xf] }
 0x135   : > { %v710_v8 = vsel %vm5149_vm5, %v702_v28, %v709_v29  ;;  %718 = vst [vmem:[#allocation2 + $0x6c] sm:$0xf] %v717_v6  ;;  %v721_v48 = vsel %vm5165_vm7, %v711_v38, %v720_v11  ;;  %v3665_v59 = vcombine.low %v5332_v16, %v4474_v4  ;;  %v3763_v12 = vrot.slane %v2216_v0, 9  ;;  %v2692_v16 = vld [vmem:[#allocation2 + $0x24] sm:$0xf]  ;;  %v4451_v38 = vld [vmem:[#allocation2 + $0x18] sm:$0xff]  }
 0x136   : > { %v5752_v63 = vsel %vm5373_vm15, %v1377_v23, %v6464_v36  ;;  %v5758_v17 = vsel %vm5373_vm15, %v1384_v43, %v6465_v56  ;;  %719 = vst.msk [vmem:[#allocation2 + $0x70] sm:$0xf] %vm465_vm3, %v710_v8  ;;  %722 = vst [vmem:[#allocation2 + $0x74] sm:$0x1] %v721_v48  ;;  %v3666_v26 = vcombine.low %v5363_v53, %v5391_v14  ;;  %v5778_v55 = vrot.slane %v1981_v49, 4  ;;  %v5795_v49 = vld [vmem:[%s6446_s12 + $0x30] sm:$0xff]  }
 0x137   : > { %v3690_v37 = vcombine.low %v5733_v32, %v5752_v63  ;;  %v5780_v34 = vrot.slane %v1984_v51, 5  ;;  %v2294_v43 = vrot.slane %v2292_v33, 4  ;;  %v2293_v53 = vsel %vm5373_vm15, %v3763_v12, %v2292_v33  ;;  %v5797_v20 = vld [vmem:[#allocation2 + $0x28] sm:$0xf]  ;;  %v5813_v33 = vld [vmem:[#allocation2 + $0x20] sm:$0x1] }
 0x138   : > { %v2714_v23 = vshrl.u32 %v2689_v22, 16  ;;  %v2717_v2 = vshll.u32 %v2689_v22, 16  ;;  %v2723_v28 = vshll.u32 %v5782_v3, 16  ;;  %v2727_v29 = vshrl.u32 %v5782_v3, 16  ;;  %v4459_v32 = vld [vmem:[#allocation2 + $0x60] sm:$0xff]  }
 0x139   : > { %v2738_v56 = vshrl.u32 %v2692_v16, 16  ;;  %v2741_v0 = vshll.u32 %v2692_v16, 16  ;;  %v3667_v6 = vcombine.low %v5418_v30, %v5420_v10  ;;  %v3668_v11 = vcombine.low %v5475_v35, %v5492_v57 }
 0x13a   : > { %v5784_v24 = vld [vmem:[#allocation2 + $0x68] sm:$0x1]  ;;  %v2716_v48 = vrot.slane %v2714_v23, 4  ;;  %v2747_v4 = vshll.u32 %v5797_v20, 16  ;;  %v2719_v18 = vrot.slane %v2717_v2, 5  ;;  %v2729_v12 = vrot.slane %v2727_v29, 4 }
 0x13b   : > { %6466 = vst [vmem:[#allocation28_spill] sm:$0xff] %v5784_v24  ;;  %4013 = vmatmul.mubr.msk.bf16.vlgmr.msra.gmra.mrb[0].mxu1 %vm1051_vm11, %v3665_v59  ;;  %v2295_v39 = vrot.slane %v5784_v24, 5  ;;  %v5818_v59 = vrot.slane %v2723_v28, 5  ;;  %v2751_v30 = vshrl.u32 %v5797_v20, 16  ;;  %v2743_v35 = vrot.slane %v2741_v0, 5 }
 0x13c   : > { %4029 = vmatpush3.bf16.msra.mxu1 %v5542_v27  ;;  %4016 = vmatprep.mubr.msk.bf16.mxu1 %vm1051_vm11, %v3666_v26  ;;  %v750_v5 = vld [vmem:[#allocation2 + $0x6c] sm:$0x1]  ;;  %v2740_v26 = vrot.slane %v2738_v56, 4  ;;  %v2733_v22 = vshll.u32 %v5813_v33, 16  ;;  %v5827_v16 = vrot.slane %v2747_v4, 5  ;;  %v2720_v23 = vor.u32 %v2719_v18, %v2716_v48 }
 0x13d   : > { %4030 = vmatprep.subr.bf16.mxu1 %v4455_v52  ;;  %v2296_v51 = vsel %vm5373_vm15, %v2294_v43, %v2295_v39  ;;  %v751_v36 = vsel %vm5165_vm7, 0, %v750_v5  ;;  %v5825_v43 = vld [vmem:[#allocation2 + $0x2c] sm:$0x1]  ;;  %v4453_v39 = vld [vmem:[#allocation2 + $0x30] sm:$0xff]   ;;  %v2730_v2 = vor.u32 %v2729_v12, %v5818_v59  ;;  %v1348_v28 = vld [vmem:[#allocation2 + $0x18] sm:$0xe]  ;;  %v3670_v56 = vcombine.low %v5659_v9, %v5612_v47 }
 0x13e   : > { %v3771_v8 = vcombine.low %v2293_v53, %v2296_v51  ;;  %752 = vst [vmem:[#allocation2 + $0x6c] sm:$0x1] %v751_v36  ;;  %v2753_v53 = vrot.slane %v2751_v30, 4  ;;  %v2744_v5 = vor.u32 %v2743_v35, %v2740_v26  ;;  %v1389_v29 = vrot.slane %v5391_v14, 5  ;;  %v2695_v36 = vld [vmem:[#allocation2 + $0x30] sm:$0xf] }
 0x13f   : > { %v3669_v51 = vcombine.low %v5630_v19, %v5583_v13  ;;  %v5838_v0 = vrot.slane %v2733_v22, 5  ;;  %v1392_v19 = vrot.slane %v5401_v41, 5  ;;  %v1349_v48 = vld [vmem:[#allocation2 + $0x24] sm:$0xe]  ;;  %v5846_v4 = vrot.slane %v2720_v23, 4  ;;  %v4454_v26 = vld [vmem:[#allocation2 + $0x3c] sm:$0xff]  }
 0x140   : > { %4031 = vmatpush3.bf16.msra.mxu1 %v4455_v52  ;;  %4105 = vmatmul.mubr.msk.bf16.gmra.mrb[12].mxu0 %vm1051_vm11, %v3771_v8  ;;  %v4452_v52 = vld [vmem:[#allocation2 + $0x24] sm:$0xff]   ;;  %v2757_v8 = vshll.u32 %v5825_v43, 16  ;;  %v2754_v14 = vor.u32 %v2753_v53, %v5827_v16  ;;  %v5848_v9 = vrot.slane %v2730_v2, 4  ;;  %v5850_v18 = vrot.slane %v2744_v5, 4  ;;  %v5852_v30 = vld [vmem:[#allocation2 + $0x34] sm:$0xf] }
 0x141   : > { %4048 = vmatprep.subr.bf16.mxu1 %v5795_v49  ;;  %4112 = vmatprep.mubr.msk.bf16.mxu0 %vm1051_vm11, %v4451_v38  ;;  %v4462_v38 = vld [vmem:[%s6446_s12 + $0x78] sm:$0xff]   ;;  %v1391_v12 = vrot.slane %v1389_v29, 4  ;;  %v1396_v41 = vrot.slane %v5420_v10, 5  ;;  %v2762_v35 = vshrl.u32 %v2695_v36, 16  ;;  %v1410_v22 = vrot.slane %v5583_v13, 5 }
 0x142   : > { %v2765_v53 = vshll.u32 %v2695_v36, 16  ;;  %v3671_v23 = vcombine.low %v5686_v58, %v5647_v40  ;;  %v5866_v2 = vrot.slane %v2754_v14, 4  ;;  %v5868_v10 = vrot.slane %v2757_v8, 5  ;;  %v5888_v8 = vld [vmem:[#allocation2 + $0x38] sm:$0x1] }
 0x143   : > { %4017 = vmatmul.mubr.msk.bf16.gmra.mrb[4].mxu1 %vm1051_vm11, %v3667_v6  ;;  %v1351_v6 = vld [vmem:[#allocation2 + $0x3c] sm:$0xe]  ;;  %v2771_v13 = vshll.u32 %v5852_v30, 16  ;;  %v5895_v14 = vrot.slane %v2762_v35, 4  ;;  %v1350_v27 = vld [vmem:[#allocation2 + $0x30] sm:$0xe]  ;;  %v6467_v31 = vcombine.low %v5739_v46, %v5758_v17 }
 0x144   : > { %4020 = vmatprep.mubr.msk.bf16.mxu1 %vm1051_vm11, %v3668_v11  ;;  %v3684_v11 = vrot.slane %v1348_v28, 9  ;;  %v4457_v28 = vld [vmem:[#allocation2 + $0x48] sm:$0xff]   ;;  %v1420_v50 = vrot.slane %v5656_v7, 5  ;;  %v5990_v46 = vld [vmem:[#allocation2 + $0x50] sm:$0x1] }
 0x145   : > { %v2701_v58 = vld [vmem:[#allocation2 + $0x48] sm:$0xf] }
 0x146   : > { %v5872_v5 = vsel %vm5373_vm15, %v3684_v11, %v1389_v29  ;;  %v1398_v29 = vrot.slane %v1396_v41, 4  ;;  %v5897_v11 = vrot.slane %v2765_v53, 5 }
 0x148   : > { %4113 = vmatmul.mubr.msk.bf16.vlgmr.msra.gmra.mrb[0].mxu0 %vm1051_vm11, %v4452_v52  ;;  %v3687_v52 = vrot.slane %v1351_v6, 9  ;;  %v3686_v6 = vrot.slane %v1350_v27, 9 }
 0x149   : > { %4116 = vmatprep.mubr.msk.bf16.mxu0 %vm1051_vm11, %v4453_v39  ;;  %4129 = vmatpush3.bf16.msra.mxu0 %v5463_v54  ;;  %v5859_v54 = vld [vmem:[%s6446_s12 + $0x80] sm:$0xff]   ;;  %v1413_v39 = vrot.slane %v5632_v15, 5  ;;  %v1412_v15 = vrot.slane %v1410_v22, 4 }
 0x14a   : > { %4130 = vmatprep.subr.bf16.mxu0 %v4462_v38  ;;  %v5877_v36 = vsel %vm5373_vm15, %v3687_v52, %v1410_v22  ;;  %v2775_v52 = vshrl.u32 %v5852_v30, 16  ;;  %v5913_v22 = vld [vmem:[#allocation2 + $0x40] sm:$0xf] }
 0x14b   : > { %4021 = vmatmul.mubr.msk.bf16.gmra.mrb[8].mxu1 %vm1051_vm11, %v3669_v51  ;;  %v3685_v51 = vrot.slane %v1349_v48, 9  ;;  %v2698_v48 = vld [vmem:[#allocation2 + $0x3c] sm:$0xf] }
 0x14c   : > { %4024 = vmatprep.mubr.msk.bf16.mxu1 %vm1051_vm11, %v3670_v56  ;;  %v5885_v56 = vsel %vm5373_vm15, %v1391_v12, %v1392_v19  ;;  %v5901_v19 = vsel %vm5373_vm15, %v1412_v15, %v1413_v39  ;;  %v1352_v12 = vld [vmem:[#allocation2 + $0x48] sm:$0xe]  ;;  %v5924_v15 = vrot.slane %v2771_v13, 5  ;;  %v2786_v53 = vshrl.u32 %v2698_v48, 16  ;;  %v1353_v13 = vld [vmem:[#allocation2 + $0x54] sm:$0xe] }
 0x14d   : > { %4131 = vmatpush3.bf16.msra.mxu0 %v4462_v38  ;;  %v1399_v38 = vrot.slane %v5448_v1, 5  ;;  %v5922_v39 = vsel %vm5373_vm15, %v3685_v51, %v1396_v41  ;;  %v1403_v1 = vrot.slane %v5492_v57, 5  ;;  %v2768_v57 = vor.u32 %v5897_v11, %v5895_v14 }
 0x14e   : > { %4148 = vmatprep.subr.bf16.mxu0 %v5859_v54  ;;  %v2789_v41 = vshll.u32 %v2698_v48, 16  ;;  %v1417_v51 = vrot.slane %v5612_v47, 5  ;;  %v2810_v48 = vshrl.u32 %v2701_v58, 16  ;;  %v2813_v47 = vshll.u32 %v2701_v58, 16  ;;  %v4463_v58 = vld [vmem:[%s6446_s12 + $0x38] sm:$0xff]  }
 0x14f   : > { %v5930_v35 = vsel %vm5373_vm15, %v1398_v29, %v1399_v38  ;;  %v2777_v29 = vrot.slane %v2775_v52, 4  ;;  %v2799_v38 = vshrl.u32 %v5913_v22, 16  ;;  %v1405_v63 = vrot.slane %v1403_v1, 4 }
 0x150   : > { %4117 = vmatmul.mubr.msk.bf16.gmra.mrb[4].mxu0 %vm1051_vm11, %v4454_v26  ;;  %v3692_v26 = vcombine.low %v5872_v5, %v5885_v56  ;;  %v3688_v5 = vrot.slane %v1352_v12, 9  ;;  %v4458_v56 = vld [vmem:[#allocation2 + $0x54] sm:$0xff]   ;;  %v5942_v12 = vld [vmem:[#allocation2 + $0x4c] sm:$0xf]  ;;  %v1419_v11 = vrot.slane %v1417_v51, 4  ;;  %v3689_v24 = vrot.slane %v1353_v13, 9 }
 0x151   : > { %4120 = vmatprep.mubr.msk.bf16.mxu0 %vm1051_vm11, %v4457_v28  ;;  %v2781_v28 = vshll.u32 %v5888_v8, 16  ;;  %v1424_v52 = vrot.slane %v5647_v40, 5  ;;  %v2819_v27 = vshll.u32 %v5942_v12, 16  ;;  %v2823_v45 = vshrl.u32 %v5942_v12, 16  ;;  %v5978_v40 = vld [vmem:[#allocation2 + $0x44] sm:$0x1] }
 0x152   : > { %v5948_v14 = vsel %vm5373_vm15, %v3688_v5, %v1417_v51  ;;  %v5955_v7 = vsel %vm5373_vm15, %v1419_v11, %v1420_v50  ;;  %v5959_v5 = vrot.slane %v2786_v53, 4  ;;  %v2791_v50 = vrot.slane %v2789_v41, 5  ;;  %v781_v11 = vld [vmem:[#allocation2 + $0x74] sm:$0x1] }
 0x153   : > { %4025 = vmatmul.mubr.msk.bf16.gmra.mrb[12].mxu1 %vm1051_vm11, %v3671_v23  ;;  %v2795_v23 = vshll.u32 %v5913_v22, 16  ;;  %v5968_v51 = vsel %vm5373_vm15, %v3689_v24, %v1424_v52  ;;  %v1426_v13 = vrot.slane %v1424_v52, 4  ;;  %v2801_v53 = vrot.slane %v2799_v38, 4 }
 0x154   : > { %4032 = vmatprep.mubr.msk.bf16.mxu1 %vm1051_vm11, %v3690_v37  ;;  %v1406_v37 = vrot.slane %v5496_v21, 5  ;;  %v1427_v21 = vrot.slane %v5688_v42, 5  ;;  %v2778_v42 = vor.u32 %v2777_v29, %v5924_v15  ;;  %v1404_v24 = vsel %vm5373_vm15, %v3686_v6, %v1403_v1  ;;  %v4460_v1 = vld [vmem:[#allocation2 + $0x6c] sm:$0xff]  }
 0x155   : > { %v2812_v52 = vrot.slane %v2810_v48, 4  ;;  %v5992_v17 = vrot.slane %v2819_v27, 5  ;;  %v6468_v29 = vsel %vm5291_vm12, %v5848_v9, %v5838_v0  ;;  %v6471_v38 = vsel %vm5291_vm12, %v5850_v18, %v5827_v16  ;;  %v2704_v9 = vld [vmem:[#allocation2 + $0x54] sm:$0xf] }
 0x156   : > { %v5986_v41 = vsel %vm5373_vm15, %v1426_v13, %v1427_v21  ;;  %v3693_v0 = vcombine.low %v5922_v39, %v5930_v35  ;;  %v2783_v48 = vrot.slane %v2781_v28, 5  ;;  %v2779_v16 = vrot.slane %v2778_v42, 4  ;;  %v6026_v39 = vld [vmem:[#allocation2 + $0x64] sm:$0xf] }
 0x157   : > { %v3697_v6 = vcombine.low %v5968_v51, %v5986_v41  ;;  %v2829_v35 = vshll.u32 %v5990_v46, 16  ;;  %v2837_v28 = vshll.u32 %v2704_v9, 16  ;;  %v3115_v51 = vrot.slane %v5813_v33, 5  ;;  %v3079_v41 = vld [vmem:[#allocation2 + $0x24] sm:$0xe] }
 0x158   : > { %4121 = vmatmul.mubr.msk.bf16.gmra.mrb[8].mxu0 %vm1051_vm11, %v4458_v56  ;;  %v5972_v56 = vrot.slane %v2795_v23, 5  ;;  %v2825_v23 = vrot.slane %v2823_v45, 4  ;;  %v6470_v45 = vsel %vm5291_vm12, %v5866_v2, %v5868_v10  ;;  %v2792_v2 = vor.u32 %v2791_v50, %v5959_v5 }
 0x159   : > { %4124 = vmatprep.mubr.msk.bf16.mxu0 %vm1051_vm11, %v4459_v32  ;;  %v1407_v32 = vsel %vm5373_vm15, %v1405_v63, %v1406_v37  ;;  %v3813_v63 = vcombine.low %v6471_v38, %v6470_v45  ;;  %v6018_v37 = vld [vmem:[#allocation2 + $0x58] sm:$0xf]  ;;  %v2805_v10 = vshll.u32 %v5978_v40, 16  ;;  %v2839_v45 = vrot.slane %v2837_v28, 5 }
 0x15a   : > { %v2802_v18 = vor.u32 %v2801_v53, %v5972_v56  ;;  %v3694_v27 = vcombine.low %v1404_v24, %v1407_v32  ;;  %v2826_v60 = vor.u32 %v2825_v23, %v5992_v17  ;;  %v2843_v5 = vshll.u32 %v6018_v37, 16  ;;  %v6035_v53 = vld [vmem:[%s6446_s12 + $0x40] sm:$0xff]  }
 0x15b   : > { %4033 = vmatmul.mubr.msk.bf16.vlgmr.msra.gmra.mrb[0].mxu1 %vm1051_vm11, %v6467_v31  ;;  %v2815_v31 = vrot.slane %v2813_v47, 5  ;;  %v2707_v47 = vld [vmem:[#allocation2 + $0x60] sm:$0xf]  ;;  %v2847_v13 = vshrl.u32 %v6018_v37, 16  ;;  %v2867_v24 = vshll.u32 %v6026_v39, 16  ;;  %v2871_v32 = vshrl.u32 %v6026_v39, 16 }
 0x15c   : > { %4049 = vmatpush3.bf16.msra.mxu1 %v5795_v49  ;;  %4036 = vmatprep.mubr.msk.bf16.mxu1 %vm1051_vm11, %v3692_v26  ;;  %v6469_v49 = vsel %vm5291_vm12, %v5846_v4, %v5818_v59  ;;  %v782_v59 = vsel %vm5206_vm8, 0, %v781_v11  ;;  %v2769_v4 = vrot.slane %v2768_v57, 4  ;;  %v2834_v57 = vshrl.u32 %v2704_v9, 16 }
 0x15d   : > { %v3812_v26 = vcombine.low %v6469_v49, %v6468_v29  ;;  %4050 = vmatprep.subr.bf16.mxu1 %v4463_v58  ;;  %783 = vst [vmem:[#allocation2 + $0x74] sm:$0x1] %v782_v59  ;;  %v2816_v21 = vor.u32 %v2815_v31, %v2812_v52  ;;  %v2858_v42 = vshrl.u32 %v2707_v47, 16  ;;  %v2861_v50 = vshll.u32 %v2707_v47, 16  ;;  %v2710_v47 = vld [vmem:[#allocation2 + $0x6c] sm:$0xf] }
 0x15e   : > { %v2807_v11 = vrot.slane %v2805_v10, 5  ;;  %v2784_v52 = vsel %vm5291_vm12, %v2779_v16, %v2783_v48  ;;  %v2793_v31 = vrot.slane %v2792_v2, 4  ;;  %v2803_v23 = vrot.slane %v2802_v18, 4  ;;  %v6052_v10 = vld [vmem:[#allocation2 + $0x68] sm:$0x1] }
 0x15f   : > { %v2817_v29 = vrot.slane %v2816_v21, 4  ;;  %v2827_v49 = vrot.slane %v2826_v60, 4  ;;  %v6050_v38 = vrot.slane %v2843_v5, 5  ;;  %v2849_v9 = vrot.slane %v2847_v13, 4 }
 0x160   : > { %4051 = vmatpush3.bf16.msra.mxu1 %v4463_v58  ;;  %4125 = vmatmul.mubr.msk.bf16.gmra.mrb[12].mxu0 %vm1051_vm11, %v4460_v1  ;;  %v2774_v58 = vsel %vm5291_vm12, %v2769_v4, %v5924_v15  ;;  %v2831_v1 = vrot.slane %v2829_v35, 5  ;;  %v6048_v15 = vld [vmem:[#allocation2 + $0x5c] sm:$0x1]  ;;  %v2860_v59 = vrot.slane %v2858_v42, 4  ;;  %v2863_v4 = vrot.slane %v2861_v50, 5  ;;  %v4466_v35 = vld [vmem:[%s6446_s12 + $0x88] sm:$0xff]  }
 0x161   : > { %4168 = vmatprep.subr.bf16.mxu1 %v6035_v53  ;;  %4132 = vmatprep.mubr.msk.bf16.mxu0 %vm1051_vm11, %v3812_v26  ;;  %v2836_v26 = vrot.slane %v2834_v57, 4  ;;  %v2869_v48 = vrot.slane %v2867_v24, 5  ;;  %v2873_v2 = vrot.slane %v2871_v32, 4  ;;  %v2798_v16 = vsel %vm5291_vm12, %v2793_v31, %v5972_v56 }
 0x162   : > { %v2808_v18 = vsel %vm5291_vm12, %v2803_v23, %v2807_v11  ;;  %v2822_v21 = vsel %vm5291_vm12, %v2817_v29, %v5992_v17  ;;  %v2832_v60 = vsel %vm5291_vm12, %v2827_v49, %v2831_v1  ;;  %v2853_v28 = vshll.u32 %v6048_v15, 16 }
 0x163   : > { %4037 = vmatmul.mubr.msk.bf16.gmra.mrb[4].mxu1 %vm1051_vm11, %v3693_v0  ;;  %v3814_v0 = vcombine.low %v2774_v58, %v2784_v52  ;;  %v2840_v57 = vor.u32 %v2839_v45, %v2836_v26  ;;  %v2850_v56 = vor.u32 %v2849_v9, %v6050_v38  ;;  %v2864_v5 = vor.u32 %v2863_v4, %v2860_v59  ;;  %v4465_v59 = vld [vmem:[#allocation2 + $0xc] sm:$0xff]   ;;  %v1835_v4 = vld [vmem:[#allocation2 + $0x48] sm:$0xf] }
 0x164   : > { %4040 = vmatprep.mubr.msk.bf16.mxu1 %vm1051_vm11, %v3694_v27  ;;  %v6059_v27 = vld [vmem:[#allocation2 + $0x70] sm:$0xf]  ;;  %v2877_v13 = vshll.u32 %v6052_v10, 16  ;;  %v2882_v42 = vshrl.u32 %v2710_v47, 16  ;;  %v2874_v50 = vor.u32 %v2873_v2, %v2869_v48  ;;  %v2885_v17 = vshll.u32 %v2710_v47, 16 }
 0x165   : > { %v2891_v58 = vshll.u32 %v6059_v27, 16  ;;  %v2895_v11 = vshrl.u32 %v6059_v27, 16  ;;  %v6472_v24 = vcombine.low %v5877_v36, %v5901_v19  ;;  %v3816_v32 = vcombine.low %v2822_v21, %v2832_v60  ;;  %v6085_v19 = vld [vmem:[#allocation2 + $0x74] sm:$0x1] }
 0x166   : > { %v2841_v52 = vrot.slane %v2840_v57, 4  ;;  %v2855_v31 = vrot.slane %v2853_v28, 5  ;;  %v6473_v23 = vcombine.low %v5948_v14, %v5955_v7  ;;  %v2865_v1 = vrot.slane %v2864_v5, 4 }
 0x167   : > { %v2879_v29 = vrot.slane %v2877_v13, 5  ;;  %v2884_v49 = vrot.slane %v2882_v42, 4  ;;  %v2875_v26 = vrot.slane %v2874_v50, 4  ;;  %v2887_v45 = vrot.slane %v2885_v17, 5  ;;  %v4467_v17 = vld [vmem:[#allocation2 + $0x18] sm:$0xff]  }
 0x168   : > { %4133 = vmatmul.mubr.msk.bf16.vlgmr.msra.gmra.mrb[0].mxu0 %vm1051_vm11, %v3813_v63  ;;  %v3815_v63 = vcombine.low %v2798_v16, %v2808_v18  ;;  %v2893_v9 = vrot.slane %v2891_v58, 5  ;;  %v2897_v36 = vrot.slane %v2895_v11, 4  ;;  %v2846_v14 = vsel %vm5291_vm12, %v2841_v52, %v6050_v38 }
 0x169   : > { %4136 = vmatprep.mubr.msk.bf16.mxu0 %vm1051_vm11, %v3814_v0  ;;  %4149 = vmatpush3.bf16.msra.mxu0 %v5859_v54  ;;  %v2851_v54 = vrot.slane %v2850_v56, 4  ;;  %v2870_v0 = vsel %vm5291_vm12, %v2865_v1, %v2869_v48  ;;  %v2880_v2 = vsel %vm5291_vm12, %v2875_v26, %v2879_v29  ;;  %v2888_v47 = vor.u32 %v2887_v45, %v2884_v49  ;;  %v3080_v29 = vld [vmem:[#allocation2 + $0x30] sm:$0xe] }
 0x16a   : > { %4150 = vmatprep.subr.bf16.mxu0 %v4466_v35  ;;  %v2898_v16 = vor.u32 %v2897_v36, %v2893_v9  ;;  %v2901_v18 = vshll.u32 %v6085_v19, 16  ;;  %v3112_v38 = vrot.slane %v5782_v3, 5  ;;  %v1965_v21 = vshrl.u32 %v1835_v4, 16  ;;  %v4468_v3 = vld [vmem:[#allocation2 + $0x24] sm:$0xff]  }
 0x16b   : > { %4041 = vmatmul.mubr.msk.bf16.gmra.mrb[8].mxu1 %vm1051_vm11, %v6472_v24  ;;  %v2856_v7 = vsel %vm5291_vm12, %v2851_v54, %v2855_v31  ;;  %v1968_v48 = vshll.u32 %v1835_v4, 16  ;;  %v3818_v57 = vcombine.low %v2870_v0, %v2880_v2  ;;  %v2889_v5 = vrot.slane %v2888_v47, 4  ;;  %v1832_v24 = vld [vmem:[#allocation2 + $0x3c] sm:$0xf]  ;;  %v4476_v36 = vld [vmem:[%s6446_s12 + $0x48] sm:$0xff]  }
 0x16c   : > { %4044 = vmatprep.mubr.msk.bf16.mxu1 %vm1051_vm11, %v6473_v23  ;;  %v3817_v60 = vcombine.low %v2846_v14, %v2856_v7  ;;  %v1967_v56 = vrot.slane %v1965_v21, 4  ;;  %v2899_v13 = vrot.slane %v2898_v16, 4  ;;  %v2903_v42 = vrot.slane %v2901_v18, 5  ;;  %v4469_v7 = vld [vmem:[#allocation2 + $0x30] sm:$0xff]   ;;  %v3081_v47 = vld [vmem:[#allocation2 + $0x3c] sm:$0xe] }
 0x16d   : > { %4151 = vmatpush3.bf16.msra.mxu0 %v4466_v35  ;;  %v3078_v35 = vld [vmem:[#allocation2 + $0x18] sm:$0xe]  ;;  %v1970_v50 = vrot.slane %v1968_v48, 5  ;;  %v3114_v58 = vrot.slane %v3112_v38, 4  ;;  %v3831_v31 = vrot.slane %v3079_v41, 9  ;;  %v3122_v23 = vrot.slane %v5825_v43, 5 }
 0x16e   : > { %v3830_v28 = vrot.slane %v3078_v35, 9  ;;  %v3126_v54 = vrot.slane %v5852_v30, 5  ;;  %v1941_v49 = vshrl.u32 %v1832_v24, 16  ;;  %v1944_v26 = vshll.u32 %v1832_v24, 16  ;;  %v4477_v43 = vld [vmem:[#allocation2 + $0x40] sm:$0xf] }
 0x16f   : > { %v1971_v11 = vor.u32 %v1970_v50, %v1967_v56  ;;  %v1950_v30 = vshll.u32 %v4477_v43, 16  ;;  %v3832_v0 = vrot.slane %v3080_v29, 9  ;;  %v3129_v2 = vrot.slane %v5888_v8, 5  ;;  %v4470_v18 = vld [vmem:[#allocation2 + $0x3c] sm:$0xff]  }
 0x170   : > { %4137 = vmatmul.mubr.msk.bf16.gmra.mrb[4].mxu0 %vm1051_vm11, %v3815_v63  ;;  %v2894_v63 = vsel %vm5291_vm12, %v2889_v5, %v2893_v9  ;;  %v3113_v52 = vsel %vm5373_vm15, %v3830_v28, %v3112_v38  ;;  %v3133_v16 = vrot.slane %v5913_v22, 5  ;;  %v1943_v35 = vrot.slane %v1941_v49, 4 }
 0x171   : > { %4140 = vmatprep.mubr.msk.bf16.mxu0 %vm1051_vm11, %v3816_v32  ;;  %v2904_v32 = vsel %vm5291_vm12, %v2899_v13, %v2903_v42  ;;  %v1972_v33 = vrot.slane %v1971_v11, 4  ;;  %v1946_v38 = vrot.slane %v1944_v26, 5  ;;  %v6142_v21 = vrot.slane %v1950_v30, 5  ;;  %v3082_v42 = vld [vmem:[#allocation2 + $0x48] sm:$0xe] }
 0x172   : > { %v3819_v9 = vcombine.low %v2894_v63, %v2904_v32  ;;  %v3833_v8 = vrot.slane %v3081_v47, 9  ;;  %v3136_v22 = vrot.slane %v5978_v40, 5  ;;  %v3135_v56 = vrot.slane %v3133_v16, 4  ;;  %v4471_v63 = vld [vmem:[#allocation2 + $0x48] sm:$0xff]  }
 0x173   : > { %4045 = vmatmul.mubr.msk.bf16.gmra.mrb[12].mxu1 %vm1051_vm11, %v3697_v6  ;;  %v3119_v6 = vrot.slane %v5797_v20, 5  ;;  %v3116_v20 = vsel %vm5373_vm15, %v3114_v58, %v3115_v51  ;;  %v1977_v45 = vsel %vm5291_vm12, %v1972_v33, %v5711_v25  ;;  %v3128_v25 = vrot.slane %v3126_v54, 4 }
 0x174   : > { %4052 = vmatprep.mubr.msk.bf16.mxu1 %vm1051_vm11, %v4465_v59  ;;  %v1954_v59 = vshrl.u32 %v4477_v43, 16  ;;  %v3838_v14 = vcombine.low %v3113_v52, %v3116_v20  ;;  %v3140_v5 = vrot.slane %v5942_v12, 5  ;;  %v1947_v50 = vor.u32 %v1946_v38, %v1943_v35  ;;  %v4472_v20 = vld [vmem:[#allocation2 + $0x54] sm:$0xff]  }
 0x175   : > { %v3121_v1 = vrot.slane %v3119_v6, 4  ;;  %v3130_v28 = vsel %vm5373_vm15, %v3128_v25, %v3129_v2  ;;  %v3134_v24 = vsel %vm5373_vm15, %v3833_v8, %v3133_v16  ;;  %v3137_v12 = vsel %vm5373_vm15, %v3135_v56, %v3136_v22  ;;  %v3083_v43 = vld [vmem:[#allocation2 + $0x54] sm:$0xe]  ;;  %v6476_v25 = vld [vmem:[#allocation27_spill] sm:$0xff] }
 0x176   : > { %v1956_v48 = vrot.slane %v1954_v59, 4  ;;  %v3834_v32 = vrot.slane %v3082_v42, 9  ;;  %v3142_v52 = vrot.slane %v3140_v5, 4  ;;  %v3143_v33 = vrot.slane %v5990_v46, 5 }
 0x177   : > { %v3154_v30 = vrot.slane %v6026_v39, 5  ;;  %v2026_v2 = vshrl.u32 %v6476_v25, 16  ;;  %v3835_v38 = vrot.slane %v3083_v43, 9  ;;  %v3157_v22 = vrot.slane %v6052_v10, 5 }
 0x178   : > { %4141 = vmatmul.mubr.msk.bf16.gmra.mrb[8].mxu0 %vm1051_vm11, %v3817_v60  ;;  %v1838_v60 = vld [vmem:[#allocation2 + $0x54] sm:$0xf]  ;;  %v1957_v40 = vor.u32 %v1956_v48, %v6142_v21  ;;  %v3141_v46 = vsel %vm5373_vm15, %v3834_v32, %v3140_v5  ;;  %v4473_v48 = vld [vmem:[#allocation2 + $0x60] sm:$0xff]   ;;  %v3161_v10 = vrot.slane %v6059_v27, 5 }
 0x179   : > { %4144 = vmatprep.mubr.msk.bf16.mxu0 %vm1051_vm11, %v3818_v57  ;;  %v3127_v57 = vsel %vm5373_vm15, %v3832_v0, %v3126_v54  ;;  %v1989_v51 = vshrl.u32 %v1838_v60, 16  ;;  %v1992_v41 = vshll.u32 %v1838_v60, 16  ;;  %v3156_v8 = vrot.slane %v3154_v30, 4 }
 0x17a   : > { %v3840_v11 = vcombine.low %v3127_v57, %v3130_v28 }
 0x17b   : > { %4053 = vmatmul.mubr.msk.bf16.vlgmr.msra.gmra.mrb[0].mxu1 %vm1051_vm11, %v4467_v17  ;;  %v4478_v17 = vld [vmem:[#allocation2 + $0x44] sm:$0x1]  ;;  %v1991_v54 = vrot.slane %v1989_v51, 4  ;;  %v1994_v29 = vrot.slane %v1992_v41, 5  ;;  %v3158_v51 = vsel %vm5373_vm15, %v3156_v8, %v3157_v22 }
 0x17c   : > { %4170 = vmatpush3.bf16.msra.mxu1 %v6035_v53  ;;  %4056 = vmatprep.mubr.msk.bf16.mxu1 %vm1051_vm11, %v4468_v3  ;;  %v6474_v53 = vsel %vm5291_vm12, %v5778_v55, %v5780_v34  ;;  %v3120_v55 = vsel %vm5373_vm15, %v3831_v31, %v3119_v6  ;;  %v3123_v34 = vsel %vm5373_vm15, %v3121_v1, %v3122_v23  ;;  %v1960_v58 = vshll.u32 %v4478_v17, 16  ;;  %v1841_v1 = vld [vmem:[#allocation2 + $0x60] sm:$0xf] }
 0x17d   : > { %4169 = vmatprep.subr.bf16.mxu1 %v4476_v36  ;;  %v6133_v4 = vcombine.low %v1977_v45, %v6474_v53  ;;  %v3839_v13 = vcombine.low %v3120_v55, %v3123_v34  ;;  %v1998_v6 = vshll.u32 %v5674_v44, 16  ;;  %v2002_v3 = vshrl.u32 %v5674_v44, 16  ;;  %v3084_v53 = vld [vmem:[#allocation2 + $0x60] sm:$0xe] }
 0x17e   : > { %v1948_v31 = vrot.slane %v1947_v50, 4  ;;  %v1962_v23 = vrot.slane %v1960_v58, 5  ;;  %v1958_v44 = vrot.slane %v1957_v40, 4  ;;  %v3841_v45 = vcombine.low %v3134_v24, %v3137_v12  ;;  %v3085_v40 = vld [vmem:[#allocation2 + $0x6c] sm:$0xe] }
 0x17f   : > { %v2000_v49 = vrot.slane %v1998_v6, 5  ;;  %v2004_v26 = vrot.slane %v2002_v3, 4  ;;  %v2013_v59 = vshrl.u32 %v1841_v1, 16  ;;  %v2016_v0 = vshll.u32 %v1841_v1, 16  ;;  %v6477_v3 = vld [vmem:[#allocation28_spill] sm:$0xff] }
 0x180   : > { %4171 = vmatpush3.bf16.msra.mxu1 %v4476_v36  ;;  %4145 = vmatmul.mubr.msk.bf16.gmra.mrb[12].mxu0 %vm1051_vm11, %v3819_v9  ;;  %v3147_v9 = vrot.slane %v6018_v37, 5  ;;  %v3144_v36 = vsel %vm5373_vm15, %v3142_v52, %v3143_v33  ;;  %v2022_v37 = vshll.u32 %v6476_v25, 16  ;;  %v1953_v47 = vsel %vm5291_vm12, %v1948_v31, %v6142_v21 }
 0x181   : > { %4152 = vmatprep.mubr.msk.bf16.mxu0 %vm1051_vm11, %v3838_v14  ;;  %v6475_v14 = vld [vmem:[#allocation26_spill] sm:$0xff]  ;;  %v1963_v16 = vsel %vm5291_vm12, %v1958_v44, %v1962_v23  ;;  %v2005_v39 = vor.u32 %v2004_v26, %v2000_v49  ;;  %v3842_v35 = vcombine.low %v3141_v46, %v3144_v36  ;;  %v3150_v34 = vrot.slane %v6048_v15, 5 }
 0x182   : > { %v3149_v55 = vrot.slane %v3147_v9, 4  ;;  %v3836_v60 = vrot.slane %v3084_v53, 9  ;;  %v2015_v57 = vrot.slane %v2013_v59, 4  ;;  %v3742_v28 = vcombine.low %v1953_v47, %v1963_v16 }
 0x183   : > { %4057 = vmatmul.mubr.msk.bf16.gmra.mrb[4].mxu1 %vm1051_vm11, %v4469_v7  ;;  %v2008_v7 = vshll.u32 %v6475_v14, 16  ;;  %v2018_v56 = vrot.slane %v2016_v0, 5  ;;  %v2024_v5 = vrot.slane %v2022_v37, 5  ;;  %v2028_v21 = vrot.slane %v2026_v2, 4 }
 0x184   : > { %4060 = vmatprep.mubr.msk.bf16.mxu1 %vm1051_vm11, %v4470_v18  ;;  %v1995_v18 = vor.u32 %v1994_v29, %v1991_v54  ;;  %v2006_v42 = vrot.slane %v2005_v39, 4  ;;  %v3148_v15 = vsel %vm5373_vm15, %v3835_v38, %v3147_v9  ;;  %v3151_v17 = vsel %vm5373_vm15, %v3149_v55, %v3150_v34 }
 0x185   : > { %v2010_v50 = vrot.slane %v2008_v7, 5  ;;  %v3155_v58 = vsel %vm5373_vm15, %v3836_v60, %v3154_v30  ;;  %v2019_v41 = vor.u32 %v2018_v56, %v2015_v57  ;;  %v2029_v6 = vor.u32 %v2028_v21, %v2024_v5 }
 0x186   : > { %v3843_v24 = vcombine.low %v3148_v15, %v3151_v17  ;;  %v3837_v32 = vrot.slane %v3085_v40, 9  ;;  %v3163_v52 = vrot.slane %v3161_v10, 4  ;;  %v3164_v33 = vrot.slane %v6085_v19, 5 }
 0x187   : > { %v2011_v27 = vsel %vm5291_vm12, %v2006_v42, %v2010_v50  ;;  %v2020_v31 = vrot.slane %v2019_v41, 4  ;;  %v2030_v23 = vrot.slane %v2029_v6, 4 }
 0x188   : > { %4153 = vmatmul.mubr.msk.bf16.vlgmr.msra.gmra.mrb[0].mxu0 %vm1051_vm11, %v3839_v13  ;;  %v1996_v13 = vrot.slane %v1995_v18, 4  ;;  %v3162_v1 = vsel %vm5373_vm15, %v3837_v32, %v3161_v10  ;;  %v3165_v44 = vsel %vm5373_vm15, %v3163_v52, %v3164_v33 }
 0x189   : > { %4156 = vmatprep.mubr.msk.bf16.mxu0 %vm1051_vm11, %v3840_v11  ;;  %v2032_v11 = vshll.u32 %v6477_v3, 16  ;;  %v2025_v19 = vsel %vm5291_vm12, %v2020_v31, %v2024_v5 }
 0x18a   : > { %v2001_v12 = vsel %vm5291_vm12, %v1996_v13, %v2000_v49  ;;  %v3845_v49 = vcombine.low %v3162_v1, %v3165_v44 }
 0x18b   : > { %4061 = vmatmul.mubr.msk.bf16.gmra.mrb[8].mxu1 %vm1051_vm11, %v4471_v63  ;;  %v3844_v63 = vcombine.low %v3155_v58, %v3158_v51  ;;  %v2034_v54 = vrot.slane %v2032_v11, 5 }
 0x18c   : > { %4064 = vmatprep.mubr.msk.bf16.mxu1 %vm1051_vm11, %v4472_v20  ;;  %v3744_v20 = vcombine.low %v2001_v12, %v2011_v27 }
 0x18d   : > { %v2035_v29 = vsel %vm5291_vm12, %v2030_v23, %v2034_v54 }
 0x18e   : > { %v3745_v26 = vcombine.low %v2025_v19, %v2035_v29 }
 0x190   : > { %4157 = vmatmul.mubr.msk.bf16.gmra.mrb[4].mxu0 %vm1051_vm11, %v3841_v45 }
 0x191   : > { %4160 = vmatprep.mubr.msk.bf16.mxu0 %vm1051_vm11, %v3842_v35 }
 0x193   : > { %4065 = vmatmul.mubr.msk.bf16.gmra.mrb[12].mxu1 %vm1051_vm11, %v4473_v48 }
 0x194   : > { %4080 = vmatprep.mubr.msk.bf16.mxu1 %vm1051_vm11, %v3742_v28 }
 0x198   : > { %4161 = vmatmul.mubr.msk.bf16.gmra.mrb[8].mxu0 %vm1051_vm11, %v3843_v24 }
 0x199   : > { %4164 = vmatprep.mubr.msk.bf16.mxu0 %vm1051_vm11, %v3844_v63 }
 0x19b   : > { %4081 = vmatmul.mubr.msk.bf16.vlgmr.msra.gmra.mrb[8].mxu1 %vm1051_vm11, %v6133_v4 }
 0x19c   : > { %4084 = vmatprep.mubr.msk.bf16.mxu1 %vm1051_vm11, %v3744_v20 }
 0x1a0   : > { %4165 = vmatmul.mubr.msk.bf16.gmra.mrb[12].mxu0 %vm1051_vm11, %v3845_v49 }
 0x1a3   : > { %4085 = vmatmul.mubr.msk.bf16.gmra.mrb[12].mxu1 %vm1051_vm11, %v3745_v26 }
 0x24e   : > { %v4054_v45 = vpop.f32.mrb[0].mxu1 }
 0x24f   : > { %v1741_v62 = vpop.f32.mrb[1].mxu1 }
 0x250   : > { %v4055_v9 = vpop.f32.mrb[2].mxu1 }
 0x251   : > { %v1744_v46 = vpop.f32.mrb[3].mxu1 }
 0x256   : > { %v4058_v36 = vpop.f32.mrb[4].mxu1 }
 0x257   : > { %v1757_v4 = vpop.f32.mrb[5].mxu1 }
 0x258   : > { %v4059_v43 = vpop.f32.mrb[6].mxu1 }
 0x259   : > { %v1760_v30 = vpop.f32.mrb[7].mxu1 }
 0x25b   : > { %v4154_v59 = vpop.f32.mrb[0].mxu0 }
 0x25c   : > { %v4172_v53 = vadd.f32 %v4154_v59, %v4054_v45  ;;  %v3260_v14 = vpop.f32.mrb[1].mxu0 }
 0x25d   : > { %v4173_v7 = vadd.f32 %v3260_v14, %v1741_v62  ;;  %v4155_v0 = vpop.f32.mrb[2].mxu0 }
 0x25e   : > { %v3348_v25 = vadd.f32 %v4172_v53, %v6218_v61  ;;  %v4174_v37 = vadd.f32 %v4155_v0, %v4055_v9  ;;  %v3263_v2 = vpop.f32.mrb[3].mxu0 }
 0x25f   : > { %v3346_v47 = vadd.f32 %v4173_v7, %v6218_v61  ;;  %v4175_v16 = vadd.f32 %v3263_v2, %v1744_v46 }
 0x260   : > { %v3364_v18 = vmax.f32 %v3348_v25, 0.0  ;;  %v3349_v39 = vadd.f32 %v4174_v37, %v6218_v61 }
 0x261   : > { %v3362_v35 = vmax.f32 %v3346_v47, 0.0  ;;  %v3347_v38 = vadd.f32 %v4175_v16, %v6218_v61 }
 0x262   : > { %v3883_v55 = vpack.c.bf16 %v3364_v18, %v3364_v18  ;;  %v3365_v34 = vmax.f32 %v3349_v39, 0.0 }
 0x263   : > { %v3881_v48 = vpack.c.bf16 %v3362_v35, %v3362_v35  ;;  %v3363_v60 = vmax.f32 %v3347_v38, 0.0  ;;  %v4158_v8 = vpop.f32.mrb[4].mxu0 }
 0x264   : > { %3444 = vst.msk [vmem:[%s6226_s11 + $0x8] sm:$0xf] %vm465_vm3, %v3883_v55  ;;  %v3884_v22 = vpack.c.bf16 %v3365_v34, %v3365_v34  ;;  %v4176_v57 = vadd.f32 %v4158_v8, %v4058_v36  ;;  %v3276_v28 = vpop.f32.mrb[5].mxu0 }
 0x265   : > { %3442 = vst.msk [vmem:[%s6226_s11] sm:$0xf] %vm465_vm3, %v3881_v48  ;;  %v3882_v56 = vpack.c.bf16 %v3363_v60, %v3363_v60  ;;  %v4177_v5 = vadd.f32 %v3276_v28, %v1757_v4  ;;  %v4159_v21 = vpop.f32.mrb[6].mxu0 }
 0x266   : > { %3445 = vst.msk [vmem:[%s6226_s11 + $0xc] sm:$0xf] %vm465_vm3, %v3884_v22  ;;  %v3352_v13 = vadd.f32 %v4176_v57, %v6218_v61  ;;  %v4178_v42 = vadd.f32 %v4159_v21, %v4059_v43  ;;  %v3279_v50 = vpop.f32.mrb[7].mxu0 }
 0x267   : > { %3443 = vst.msk [vmem:[%s6226_s11 + $0x4] sm:$0xf] %vm465_vm3, %v3882_v56  ;;  %v3350_v15 = vadd.f32 %v4177_v5, %v6218_v61  ;;  %v4179_v17 = vadd.f32 %v3279_v50, %v1760_v30 }
 0x268   : > { %v3368_v10 = vmax.f32 %v3352_v13, 0.0  ;;  %v3353_v58 = vadd.f32 %v4178_v42, %v6218_v61 }
 0x269   : > { %v3366_v51 = vmax.f32 %v3350_v15, 0.0  ;;  %v3351_v40 = vadd.f32 %v4179_v17, %v6218_v61 }
 0x26a   : > { %v3887_v41 = vpack.c.bf16 %v3368_v10, %v3368_v10  ;;  %v3369_v6 = vmax.f32 %v3353_v58, 0.0 }
 0x26b   : > { %v3885_v3 = vpack.c.bf16 %v3366_v51, %v3366_v51  ;;  %v3367_v11 = vmax.f32 %v3351_v40, 0.0  ;;  %v4162_v24 = vpop.f32.mrb[8].mxu0 }
 0x26c   : > { %3448 = vst.msk [vmem:[%s6226_s11 + $0x18] sm:$0xf] %vm465_vm3, %v3887_v41  ;;  %v3888_v12 = vpack.c.bf16 %v3369_v6, %v3369_v6  ;;  %v3292_v27 = vpop.f32.mrb[9].mxu0 }
 0x26d   : > { %3446 = vst.msk [vmem:[%s6226_s11 + $0x10] sm:$0xf] %vm465_vm3, %v3885_v3  ;;  %v3886_v63 = vpack.c.bf16 %v3367_v11, %v3367_v11  ;;  %v4163_v32 = vpop.f32.mrb[10].mxu0 }
 0x26e   : > { %v4082_v52 = vpop.f32.mrb[8].mxu1  ;;  %3449 = vst.msk [vmem:[%s6226_s11 + $0x1c] sm:$0xf] %vm465_vm3, %v3888_v12  ;;  %v3295_v33 = vpop.f32.mrb[11].mxu0 }
 0x26f   : > { %v4180_v20 = vadd.f32 %v4162_v24, %v4082_v52  ;;  %v2162_v31 = vpop.f32.mrb[9].mxu1  ;;  %3447 = vst.msk [vmem:[%s6226_s11 + $0x14] sm:$0xf] %vm465_vm3, %v3886_v63 }
 0x270   : > { %v4181_v23 = vadd.f32 %v3292_v27, %v2162_v31  ;;  %v4083_v54 = vpop.f32.mrb[10].mxu1 }
 0x271   : > { %v3356_v1 = vadd.f32 %v4180_v20, %v6218_v61  ;;  %v4182_v44 = vadd.f32 %v4163_v32, %v4083_v54  ;;  %v2165_v19 = vpop.f32.mrb[11].mxu1 }
 0x272   : > { %v3354_v29 = vadd.f32 %v4181_v23, %v6218_v61  ;;  %v4183_v49 = vadd.f32 %v3295_v33, %v2165_v19 }
 0x273   : > { %v3372_v26 = vmax.f32 %v3356_v1, 0.0  ;;  %v3357_v45 = vadd.f32 %v4182_v44, %v6218_v61  ;;  %v4166_v62 = vpop.f32.mrb[12].mxu0 }
 0x274   : > { %v3370_v9 = vmax.f32 %v3354_v29, 0.0  ;;  %v3355_v46 = vadd.f32 %v4183_v49, %v6218_v61  ;;  %v3308_v36 = vpop.f32.mrb[13].mxu0 }
 0x275   : > { %v3891_v4 = vpack.c.bf16 %v3372_v26, %v3372_v26  ;;  %v3373_v43 = vmax.f32 %v3357_v45, 0.0  ;;  %v4167_v30 = vpop.f32.mrb[14].mxu0 }
 0x276   : > { %v3889_v59 = vpack.c.bf16 %v3370_v9, %v3370_v9  ;;  %v3371_v53 = vmax.f32 %v3355_v46, 0.0  ;;  %v4086_v14 = vpop.f32.mrb[12].mxu1  ;;  %v3311_v7 = vpop.f32.mrb[15].mxu0 }
 0x277   : > { %3452 = vst.msk [vmem:[%s6226_s11 + $0x28] sm:$0xf] %vm465_vm3, %v3891_v4  ;;  %v3892_v0 = vpack.c.bf16 %v3373_v43, %v3373_v43  ;;  %v4184_v25 = vadd.f32 %v4166_v62, %v4086_v14  ;;  %v2178_v37 = vpop.f32.mrb[13].mxu1 }
 0x278   : > { %3450 = vst.msk [vmem:[%s6226_s11 + $0x20] sm:$0xf] %vm465_vm3, %v3889_v59  ;;  %v3890_v2 = vpack.c.bf16 %v3371_v53, %v3371_v53  ;;  %v4185_v47 = vadd.f32 %v3308_v36, %v2178_v37  ;;  %v4087_v16 = vpop.f32.mrb[14].mxu1 }
 0x279   : > { %3453 = vst.msk [vmem:[%s6226_s11 + $0x2c] sm:$0xf] %vm465_vm3, %v3892_v0  ;;  %v3360_v18 = vadd.f32 %v4184_v25, %v6218_v61  ;;  %v4186_v39 = vadd.f32 %v4167_v30, %v4087_v16  ;;  %v2181_v35 = vpop.f32.mrb[15].mxu1 }
 0x27a   : > { %3451 = vst.msk [vmem:[%s6226_s11 + $0x24] sm:$0xf] %vm465_vm3, %v3890_v2  ;;  %v3358_v38 = vadd.f32 %v4185_v47, %v6218_v61  ;;  %v4187_v55 = vadd.f32 %v3311_v7, %v2181_v35 }
 0x27b   : > { %v3376_v34 = vmax.f32 %v3360_v18, 0.0  ;;  %v3361_v48 = vadd.f32 %v4186_v39, %v6218_v61 }
 0x27c   : > { %v3374_v60 = vmax.f32 %v3358_v38, 0.0  ;;  %v3359_v8 = vadd.f32 %v4187_v55, %v6218_v61 }
 0x27d   : > { %v3895_v22 = vpack.c.bf16 %v3376_v34, %v3376_v34  ;;  %v3377_v57 = vmax.f32 %v3361_v48, 0.0 }
 0x27e   : > { %v3893_v28 = vpack.c.bf16 %v3374_v60, %v3374_v60  ;;  %v3375_v56 = vmax.f32 %v3359_v8, 0.0 }
 0x27f   : > { %3456 = vst.msk [vmem:[%s6226_s11 + $0x38] sm:$0xf] %vm465_vm3, %v3895_v22  ;;  %v3896_v5 = vpack.c.bf16 %v3377_v57, %v3377_v57 }
 0x280   : > { %3454 = vst.msk [vmem:[%s6226_s11 + $0x30] sm:$0xf] %vm465_vm3, %v3893_v28  ;;  %v3894_v21 = vpack.c.bf16 %v3375_v56, %v3375_v56 }
 0x281   : > { %3457 = vst.msk [vmem:[%s6226_s11 + $0x3c] sm:$0xf] %vm465_vm3, %v3896_v5 }
 0x282   : > { %3455 = vst.msk [vmem:[%s6226_s11 + $0x34] sm:$0xf] %vm465_vm3, %v3894_v21 }
 0x283   : > { %4582 = shalt.err (!%p4579_p8)
}
 0x284   : > { %s4583_s26 = scalar_lea.hbm %s6276_s18, 1024  ;;  %s4587_s11 = scalar_lea.hbm %s6480_s10, 8192 }
 0x285   : > { %p4584_p13 = scmp.ne.s32.totalorder %s6276_s18, %s4583_s26  ;;  %p4588_p9 = scmp.lt.u32.totalorder %s6276_s18, %s6480_s10 }
 0x286   : > { %p4589_p7 = scmp.lt.u32.totalorder %s4587_s11, %s4583_s26  ;;  %p4591_p4 = scmp.lt.u32.totalorder %s4583_s26, %s6276_s18 }
 0x287   : > { %p4585_p10 = pnand %p4584_p13, %p6481_p0 }
 0x288   : > { %p4590_p6 = por %p4589_p7, %p4588_p9 }
 0x289   : > { %p4586_p3 = pneg %p4585_p10 }
 0x28a   : > { %p4592_p12 = por %p4591_p4, %p4590_p6 }
 0x28c   : > { %p4593_p11 = pnand %p4592_p12, %p4586_p3 }
 0x28e   : > { %4596 = shalt.err (!%p4593_p11)
}
 0x28f   : > { %s4731_s28 = smov 64   ;;  %s4732_s7 = smov 4  }
 0x290   : > { %4306 = dma.vmem_to_hbm [thread:$0]  (%p6481_p0), %s6269_s22, 1024, %s6276_s18, %s3459_s2, %s4731_s28, %s4731_s28, %s4732_s7  }
 0x291 PF: > { %p4323_p2 = scmp.ge.s32.totalorder %s4723_s6, 2  ;;  %s3490_s4 = sand.u32 1, %s4695_s24  }
 0x292   : > { %p6482_p1 = scmp.ne.s32.totalorder %s6423_s15, 0  ;;  %s3491_s30 = scalar_lea.sflag [#allocation5], %s3490_s4 }
 0x294   : > { %p4319_p5 = pnand %p4323_p2, %p6482_p1 }
 0x296   : > { %4666 = dma.done.wait (!%p4319_p5), %s3491_s30, 1024  }
 0x297   : > { %4668 = vsyncadd (!%p4319_p5), %s3491_s30, 4294966272  ;;  %s24_s6 = sadd.s32 1, %s4723_s6   ;;  %s6484_s21 = sld [smem:[#allocation14_spill]] }
 0x298   : > { %p6311_p8 = scmp.ge.s32.totalorder %s24_s6, 10   ;;  %s6485_s16 = sld [smem:[#allocation24_spill]] }
 0x299   : > { %s6486_s5 = sld [smem:[#allocation15_spill]]  ;;  %s6487_s26 = sld [smem:[#allocation25_spill]] }
 0x29a   : > { %s6488_s27 = sld [smem:[#allocation18_spill]]  ;;  %s6489_s28 = sld [smem:[#allocation19_spill]] }
 0x29b   : > { %s6490_s29 = sld [smem:[#allocation20_spill]]  ;;  %s6491_s30 = sld [smem:[#allocation21_spill]] }
 0x29c   : > { %s6492_s18 = smov %s4675_s19  ;;  %s6493_s19 = smov %s4679_s20 }
 0x29d   : > { %s6494_s20 = smov %s5054_s1  ;;  %s6495_s22 = smov %s4691_s23 }
 0x29e   : > { %s6496_s23 = smov %s6485_s16  ;;  %s6497_s24 = smov %s4699_s25 }
 0x29f   : > { %s6498_s25 = smov %s6486_s5  ;;  %23 = sbr.rel (!%p6311_p8) target bundleno = 19 (0x13), region = 114 }
 0x2a6   :  { %3496 = vsyncpa [#allocation4], 1 }
 0x2a7   :  { %3498 = vsyncpa [#allocation4 + $0x1], 1 }
 0x2a8   :  { %3499 = vsyncpa [#allocation7], 1 }
 0x2a9   :  { %3501 = vsyncpa [#allocation7 + $0x1], 1 }
 0x2aa   :  { %3502 = vsyncpa [#allocation5], 1 }
 0x2ab   :  { %3504 = vsyncpa [#allocation5 + $0x1], 1 }

</bundles_post_ra>
